<compile_context>
chip_gen: v5e
topology: v5e:2x2
jax: 0.10.0
libtpu: 0.0.40
codegen_flags: <defaults>
</compile_context>

<pallas_src>
import math
from functools import partial

import jax
import jax.numpy as jnp
from jax.experimental import pallas as pl
from jax.experimental.pallas import tpu as pltpu


def _ru(x, m):
    return (x + m - 1) // m * m


def _pick_tile(total, target, quantum):
    """Largest multiple of `quantum` that divides `total` and is <= target.
    Falls back to a single full block if no such divisor exists."""
    t = min(target, total)
    t -= t % quantum
    while t >= quantum:
        if total % t == 0:
            return t
        t -= quantum
    return total


# ---------------------------------------------------------------------------
# Pallas kernels
# ---------------------------------------------------------------------------

def _mm_kernel(a_ref, b_ref, o_ref):
    """Whole-K MXU matmul tile (bf16 in, f32 acc, bf16 store)."""
    o_ref[0] = jnp.dot(a_ref[0], b_ref[...],
                       preferred_element_type=jnp.float32).astype(o_ref.dtype)


def matmul_plain(a, b, out_dtype=jnp.bfloat16, tm_target=1024):
    """a: (N, Mp, K) bf16, b: (K, Cp) bf16 -> (N, Mp, Cp) out_dtype."""
    N, Mp, K = a.shape
    Kb, Cp = b.shape
    assert K == Kb and Cp % 128 == 0 and Mp % 8 == 0
    tm = _pick_tile(Mp, tm_target, 8)
    return pl.pallas_call(
        _mm_kernel,
        out_shape=jax.ShapeDtypeStruct((N, Mp, Cp), out_dtype),
        grid=(N, Mp // tm),
        in_specs=[pl.BlockSpec((1, tm, K), lambda n, i: (n, i, 0)),
                  pl.BlockSpec((K, Cp), lambda n, i: (0, 0))],
        out_specs=pl.BlockSpec((1, tm, Cp), lambda n, i: (n, i, 0)),
        compiler_params=pltpu.CompilerParams(
            dimension_semantics=("parallel", "parallel"),
            vmem_limit_bytes=32 * 1024 * 1024),
    )(a, b)


def _mm_fuse_stats_kernel(a_ref, b_ref, y1_ref, keep_ref, o_ref, sum_ref, sq_ref):
    """Second matmul fused with the channel concat:
         y = y1 * keep + (A2 @ B33)
       Stores y in place over y1 (aliased, bf16) and emits per-channel
       sum / sum-of-squares of the fully-assembled tensor (f32, per-M-tile)."""
    acc = jnp.dot(a_ref[0], b_ref[...], preferred_element_type=jnp.float32)
    y = y1_ref[0].astype(jnp.float32) * keep_ref[0] + acc
    o_ref[0] = y.astype(o_ref.dtype)
    sum_ref[0, 0] = jnp.sum(y, axis=0, keepdims=True)
    sq_ref[0, 0] = jnp.sum(y * y, axis=0, keepdims=True)


def matmul_fuse_concat_stats(a, b, y1, keep, tm_target=1024):
    """a: (N, Mp, K) bf16, b: (K, Cp) bf16, y1: (N, Mp, Cp) bf16 (aliased output),
    keep: (1, 1, Cp) f32 column mask.
    Returns (y (N, Mp, Cp) bf16, sum (N, Cp) f32, sumsq (N, Cp) f32)."""
    N, Mp, K = a.shape
    Kb, Cp = b.shape
    assert K == Kb and y1.shape == (N, Mp, Cp) and Cp % 128 == 0
    tm = _pick_tile(Mp, tm_target, 8)
    nmt = Mp // tm
    y, s, q = pl.pallas_call(
        _mm_fuse_stats_kernel,
        out_shape=(jax.ShapeDtypeStruct((N, Mp, Cp), y1.dtype),
                   jax.ShapeDtypeStruct((nmt, N, 1, Cp), jnp.float32),
                   jax.ShapeDtypeStruct((nmt, N, 1, Cp), jnp.float32)),
        grid=(N, nmt),
        in_specs=[pl.BlockSpec((1, tm, K), lambda n, i: (n, i, 0)),
                  pl.BlockSpec((K, Cp), lambda n, i: (0, 0)),
                  pl.BlockSpec((1, tm, Cp), lambda n, i: (n, i, 0)),
                  pl.BlockSpec((1, 1, Cp), lambda n, i: (0, 0, 0))],
        out_specs=(pl.BlockSpec((1, tm, Cp), lambda n, i: (n, i, 0)),
                   pl.BlockSpec((1, 1, 1, Cp), lambda n, i: (i, n, 0, 0)),
                   pl.BlockSpec((1, 1, 1, Cp), lambda n, i: (i, n, 0, 0))),
        input_output_aliases={2: 0},   # fused concat overwrites y1 in place (P8)
        compiler_params=pltpu.CompilerParams(
            dimension_semantics=("parallel", "parallel"),
            vmem_limit_bytes=32 * 1024 * 1024),
    )(a, b, y1, keep)
    s = jnp.sum(s, axis=0)[:, 0, :]   # tiny (nmt, N, 1, Cp) -> (N, Cp) reduction
    q = jnp.sum(q, axis=0)[:, 0, :]
    return y, s, q


def _gn_relu_t_kernel(y_ref, scale_ref, shift_ref, o_ref, *, channels):
    """GroupNorm scale/shift + ReLU in f32 on a bf16 tile, then an in-kernel
    (XLU) transpose so the store is channels-major (C, tm) -> final NCDHW layout
    comes out of the kernel directly (no XLA full-tensor transpose)."""
    y = y_ref[0].astype(jnp.float32)                               # (tm, Cp)
    out = jnp.maximum(y * scale_ref[0] + shift_ref[0], 0.0)        # (tm, Cp)
    o_ref[0] = out.T[:channels, :]                                 # (P, tm)


def groupnorm_relu_nchw(y, scale, shift, P, tm_target=2048):
    N, Mp, Cp = y.shape
    tm = _pick_tile(Mp, tm_target, 128)   # lane dim of the transposed store
    return pl.pallas_call(
        partial(_gn_relu_t_kernel, channels=P),
        out_shape=jax.ShapeDtypeStruct((N, P, Mp), jnp.float32),
        grid=(N, Mp // tm),
        in_specs=[pl.BlockSpec((1, tm, Cp), lambda n, i: (n, i, 0)),
                  pl.BlockSpec((1, 1, Cp), lambda n, i: (n, 0, 0)),
                  pl.BlockSpec((1, 1, Cp), lambda n, i: (n, 0, 0))],
        out_specs=pl.BlockSpec((1, P, tm), lambda n, i: (n, 0, i)),
        compiler_params=pltpu.CompilerParams(
            dimension_semantics=("parallel", "parallel"),
            vmem_limit_bytes=32 * 1024 * 1024),
    )(y, scale, shift)


# ---------------------------------------------------------------------------
# Glue: window gathers (data movement) and tiny stats arithmetic
# ---------------------------------------------------------------------------
# TODO(synk): these gathers/avgpool are XLA slicing glue feeding the Pallas
# matmuls; moving them in-kernel with halo'd manual DMA would remove the
# (N, Mn, 54) and (N, Mn, 27*C3) HBM intermediates.

def avgpool3_cip(x):
    """AvgPool3d(k=3, s=1, p=1, count_include_pad=True) on (N, D, H, W)."""
    def box(v, axis):
        pad = [(0, 0)] * v.ndim
        pad[axis] = (1, 1)
        vp = jnp.pad(v, pad)
        n = v.shape[axis]
        s = lambda o: jax.lax.slice_in_dim(vp, o, o + n, axis=axis)
        return s(0) + s(1) + s(2)
    return box(box(box(x, 1), 2), 3) * (1.0 / 27.0)


def im2col_s2_1ch(x, Do, Ho, Wo):
    """3x3x3, stride 2, pad 1 window gather of a 1-channel volume.
    x: (N, D, H, W) -> (N, Do*Ho*Wo, 27), tap order kd-major, kh, kw."""
    N = x.shape[0]
    xp = jnp.pad(x, ((0, 0), (1, 1), (1, 1), (1, 1)))
    taps = []
    for kd in range(3):
        for kh in range(3):
            for kw in range(3):
                taps.append(xp[:, kd:kd + 2 * Do - 1:2,
                               kh:kh + 2 * Ho - 1:2,
                               kw:kw + 2 * Wo - 1:2])
    return jnp.stack(taps, axis=-1).reshape(N, Do * Ho * Wo, 27)


def im2col_s1(v):
    """3x3x3, stride 1, pad 1 window gather. v: (N,D,H,W,C) -> (N, D*H*W, 27*C)."""
    N, Do, Ho, Wo, C = v.shape
    vp = jnp.pad(v, ((0, 0), (1, 1), (1, 1), (1, 1), (0, 0)))
    taps = []
    for kd in range(3):
        for kh in range(3):
            for kw in range(3):
                taps.append(vp[:, kd:kd + Do, kh:kh + Ho, kw:kw + Wo, :])
    return jnp.stack(taps, axis=4).reshape(N, Do * Ho * Wo, 27 * C)


def _group_scale_shift(s, q, gamma, beta, P, Mn, eps=1e-5):
    """GroupNorm(2 groups) per-(n, channel) scale/shift rows from the fused
    per-channel sums of the fully-assembled tensor.  Width 128; channels >= P
    get scale=shift=0 (sliced away afterwards anyway)."""
    N, Cp = s.shape
    half = P // 2
    cnt = half * Mn
    sum_g = jnp.stack([jnp.sum(s[:, :half], axis=1),
                       jnp.sum(s[:, half:P], axis=1)], axis=1)      # (N, 2)
    sq_g = jnp.stack([jnp.sum(q[:, :half], axis=1),
                      jnp.sum(q[:, half:P], axis=1)], axis=1)
    mean_g = sum_g / cnt
    var_g = jnp.maximum(sq_g / cnt - mean_g * mean_g, 0.0)          # clamp >= 0
    inv_g = jax.lax.rsqrt(var_g + eps)
    c = jnp.arange(Cp)
    gsel = (c >= half).astype(jnp.int32)
    mean_c = mean_g[:, gsel]                                        # (N, Cp)
    inv_c = inv_g[:, gsel]
    gamma_p = jnp.zeros((Cp,), jnp.float32).at[:P].set(gamma)
    beta_p = jnp.zeros((Cp,), jnp.float32).at[:P].set(beta)
    scale = gamma_p[None, :] * inv_c
    shift = beta_p[None, :] - mean_c * gamma_p[None, :] * inv_c
    return scale.reshape(N, 1, Cp), shift.reshape(N, 1, Cp)


# ---------------------------------------------------------------------------
# Parameter init: torch-like raw weights, fused & pre-padded ONCE
# ---------------------------------------------------------------------------

def init_stem_params(key, inplanes):
    P = inplanes
    assert P % 8 == 0 and P <= 128
    C1, C2, C3, C4 = P // 4, P // 4, 3 * P // 8, P // 8
    Cp = 128
    off1, off2, off3, off4 = 0, C1, C1 + C2, C1 + C2 + C3
    ks = jax.random.split(key, 7)

    def conv_w(k, cout, cin, ksz):
        fan_in = cin * ksz ** 3
        return jax.random.normal(k, (cout, cin, ksz, ksz, ksz),
                                 jnp.float32) / math.sqrt(fan_in)

    # raw weights, same shapes as the torch Conv3d weights (all bias=False)
    w1 = conv_w(ks[0], C1, 1, 1)      # branch1  : 1x1, stride 2
    w21 = conv_w(ks[1], C2, 1, 1)     # branch21 : 1x1
    w22 = conv_w(ks[2], C2, C2, 3)    # branch22 : 3x3, stride 2
    w31 = conv_w(ks[3], C1, 1, 1)     # branch31 : 1x1
    w32 = conv_w(ks[4], C3, C1, 3)    # branch32 : 3x3, stride 2
    w33 = conv_w(ks[5], C3, C3, 3)    # branch33 : 3x3, stride 1
    w42 = conv_w(ks[6], C4, 1, 3)     # branch42 : 3x3, stride 2 (on avg-pooled x)
    gamma = jnp.ones((P,), jnp.float32)   # GroupNorm affine defaults
    beta = jnp.zeros((P,), jnp.float32)

    # ---- fuse & pre-pad to the MXU layout (done once; never re-padded per call) ----
    # A1 columns: [0:27) = stride-2 taps of x, [27:54) = stride-2 taps of avgpool(x)
    B1 = jnp.zeros((54, Cp), jnp.float32)
    # branch1: 1x1 stride-2 conv == center tap (index 13) of the stride-2 window
    B1 = B1.at[13, off1:off1 + C1].set(w1[:, 0, 0, 0, 0])
    # branch2: fold the 1x1 (w21) into the 3x3 stride-2 (w22)
    W2 = jnp.einsum('ocdhw,c->dhwo', w22, w21[:, 0, 0, 0, 0]).reshape(27, C2)
    B1 = B1.at[0:27, off2:off2 + C2].set(W2)
    # branch3 (first half): fold w31 into w32 -> mid3, placed in the out3 columns
    W3 = jnp.einsum('ocdhw,c->dhwo', w32, w31[:, 0, 0, 0, 0]).reshape(27, C3)
    B1 = B1.at[0:27, off3:off3 + C3].set(W3)
    # branch4: 3x3 stride-2 conv on avgpool(x) (taps 27:54)
    W4 = jnp.transpose(w42[:, 0], (1, 2, 3, 0)).reshape(27, C4)
    B1 = B1.at[27:54, off4:off4 + C4].set(W4)
    # branch33: 3x3 stride-1 conv on mid3; its output columns land at the final
    # out3 slots so the concat is a plain column mask (no lane shuffles).
    B33 = jnp.zeros((27 * C3, Cp), jnp.float32)
    W33 = jnp.transpose(w33, (2, 3, 4, 1, 0)).reshape(27 * C3, C3)
    B33 = B33.at[:, off3:off3 + C3].set(W33)
    # keep mask: 1 everywhere except the mid3/out3 columns (replaced by matmul #2)
    keep = jnp.ones((Cp,), jnp.float32).at[off3:off3 + C3].set(0.0).reshape(1, 1, Cp)

    return dict(B1=B1.astype(jnp.bfloat16), B33=B33.astype(jnp.bfloat16),
                keep=keep, gamma=gamma, beta=beta)


# ---------------------------------------------------------------------------
# stem forward (matches the PyTorch module's forward)
# ---------------------------------------------------------------------------

@jax.jit
def stem_forward(params, x_ncdhw):
    gamma = params['gamma']
    P = gamma.shape[0]
    C3 = 3 * P // 8
    off3 = P // 2

    N, Cin, D, H, W = x_ncdhw.shape
    assert Cin == 1, "stem expects a single input channel"
    x = x_ncdhw[:, 0].astype(jnp.float32)                         # (N, D, H, W)
    Do, Ho, Wo = (D - 1) // 2 + 1, (H - 1) // 2 + 1, (W - 1) // 2 + 1
    Mn = Do * Ho * Wo
    Mp = _ru(Mn, 8)                                               # <=7 pad rows

    # branch41 (AvgPool3d) + stride-2 window gathers (data-movement glue -> bf16 MXU)
    xa = avgpool3_cip(x)
    a1 = jnp.concatenate([im2col_s2_1ch(x, Do, Ho, Wo),
                          im2col_s2_1ch(xa, Do, Ho, Wo)], axis=-1)
    if Mp != Mn:
        a1 = jnp.pad(a1, ((0, 0), (0, Mp - Mn), (0, 0)))
    a1 = a1.astype(jnp.bfloat16)                                  # (N, Mp, 54)

    # fused matmul #1: branch1 | branch21->22 | branch31->32 (mid3) | branch41->42
    y1 = matmul_plain(a1, params['B1'])                           # (N, Mp, 128) bf16

    # branch33: 3x3 stride-1 conv on mid3 (half-resolution im2col), fused with
    # the channel concat + GroupNorm statistics; output aliases y1 in place.
    mid3 = y1[:, :Mn, off3:off3 + C3].reshape(N, Do, Ho, Wo, C3)
    a2 = im2col_s1(mid3)                                          # bf16 (N, Mn, 27*C3)
    if Mp != Mn:
        a2 = jnp.pad(a2, ((0, 0), (0, Mp - Mn), (0, 0)))
    y, s, q = matmul_fuse_concat_stats(a2, params['B33'], y1, params['keep'])

    # GroupNorm(2 groups) scale/shift from the fused statistics; GN + ReLU +
    # in-kernel transpose -> channels-major output, epilogue is a pure reshape.
    scale, shift = _group_scale_shift(s, q, gamma, params['beta'], P, Mn)
    out = groupnorm_relu_nchw(y, scale, shift, P)                 # (N, P, Mp) f32
    if Mp != Mn:
        out = out[:, :, :Mn]
    return out.reshape(N, P, Do, Ho, Wo)                          # NCDHW


if __name__ == "__main__":
    key = jax.random.PRNGKey(0)
    kx, kp = jax.random.split(key)

    inplanes = 32
    params = init_stem_params(kp, inplanes)

    # Input: (batch=2, channels=1, D=H=W=16) as the module implies (Conv3d(1, ...)).
    x = jax.random.normal(kx, (2, 1, 16, 16, 16), jnp.float32)

    out = stem_forward(params, x)
    jax.block_until_ready(out)

    assert out.shape == (2, inplanes, 8, 8, 8), out.shape
    assert bool(jnp.all(jnp.isfinite(out)))
    assert bool(jnp.all(out >= 0.0))      # ReLU output
    print("KERNEL_OK")
</pallas_src>

<mosaic_0001>
module attributes {stable_mosaic.version = 11 : i64} {
  func.func @_mm_kernel(%arg0: i32, %arg1: i32, %arg2: memref<1x512x54xbf16, #tpu.memory_space<vmem>>, %arg3: memref<54x128xbf16, #tpu.memory_space<vmem>>, %arg4: memref<1x512x128xbf16, #tpu.memory_space<vmem>>) attributes {dimension_semantics = [#tpu.dimension_semantics<parallel>, #tpu.dimension_semantics<parallel>], iteration_bounds = array<i64: 2, 1>, scalar_prefetch = 0 : i64, scratch_operands = 0 : i64, tpu.core_type = #tpu.core_type<tc>, window_params = [{transform_indices = @transform_0, window_bounds = array<i64: 1, 512, 54>}, {pipeline_mode = #tpu.pipeline_mode<synchronous>, transform_indices = @transform_1, window_bounds = array<i64: 54, 128>}, {transform_indices = @transform_2, window_bounds = array<i64: 1, 512, 128>}]} {
    %c0 = arith.constant 0 : index
    %c0_0 = arith.constant 0 : index
    %c0_1 = arith.constant 0 : index
    %0 = vector.load %arg2[%c0, %c0_0, %c0_1] : memref<1x512x54xbf16, #tpu.memory_space<vmem>>, vector<1x512x54xbf16>
    %1 = vector.shape_cast %0 : vector<1x512x54xbf16> to vector<512x54xbf16>
    %c0_2 = arith.constant 0 : index
    %c0_3 = arith.constant 0 : index
    %2 = vector.load %arg3[%c0_2, %c0_3] : memref<54x128xbf16, #tpu.memory_space<vmem>>, vector<54x128xbf16>
    %cst = arith.constant dense<0.000000e+00> : vector<512x128xf32>
    %3 = tpu.matmul %1, %2, %cst {dimension_numbers = #tpu.dot_dimension_numbers<[1], [0], [0], [1], [0, 0, 1, 1], [], []>} : vector<512x54xbf16>, vector<54x128xbf16>, vector<512x128xf32> -> vector<512x128xf32>
    %4 = arith.truncf %3 : vector<512x128xf32> to vector<512x128xbf16>
    %c0_4 = arith.constant 0 : index
    %c0_5 = arith.constant 0 : index
    %c0_6 = arith.constant 0 : index
    %5 = vector.load %arg4[%c0_4, %c0_5, %c0_6] : memref<1x512x128xbf16, #tpu.memory_space<vmem>>, vector<1x512x128xbf16>
    %6 = vector.shape_cast %5 : vector<1x512x128xbf16> to vector<512x128xbf16>
    %7 = vector.shape_cast %4 : vector<512x128xbf16> to vector<1x512x128xbf16>
    tpu.vector_store %arg4[%c0_4, %c0_5, %c0_6], %7 {strides = array<i32>} : memref<1x512x128xbf16, #tpu.memory_space<vmem>>, vector<1x512x128xbf16>,
    return
  }
  func.func @transform_0(%arg0: i32, %arg1: i32) -> (i32, i32, i32) {
    %c0_i32 = arith.constant 0 : i32
    %c0_i32_0 = arith.constant 0 : i32
    return %arg0, %arg1, %c0_i32 : i32, i32, i32
  }
  func.func @transform_1(%arg0: i32, %arg1: i32) -> (i32, i32) {
    %c0_i32 = arith.constant 0 : i32
    %c0_i32_0 = arith.constant 0 : i32
    %c0_i32_1 = arith.constant 0 : i32
    return %c0_i32, %c0_i32_0 : i32, i32
  }
  func.func @transform_2(%arg0: i32, %arg1: i32) -> (i32, i32, i32) {
    %c0_i32 = arith.constant 0 : i32
    %c0_i32_0 = arith.constant 0 : i32
    return %arg0, %arg1, %c0_i32 : i32, i32, i32
  }
}

module attributes {stable_mosaic.version = 11 : i64} {
  func.func @_mm_fuse_stats_kernel(%arg0: i32, %arg1: i32, %arg2: memref<1x512x324xbf16, #tpu.memory_space<vmem>>, %arg3: memref<324x128xbf16, #tpu.memory_space<vmem>>, %arg4: memref<1x512x128xbf16, #tpu.memory_space<vmem>>, %arg5: memref<1x1x128xf32, #tpu.memory_space<vmem>>, %arg6: memref<1x512x128xbf16, #tpu.memory_space<vmem>>, %arg7: memref<1x1x1x128xf32, #tpu.memory_space<vmem>>, %arg8: memref<1x1x1x128xf32, #tpu.memory_space<vmem>>) attributes {dimension_semantics = [#tpu.dimension_semantics<parallel>, #tpu.dimension_semantics<parallel>], iteration_bounds = array<i64: 2, 1>, scalar_prefetch = 0 : i64, scratch_operands = 0 : i64, tpu.core_type = #tpu.core_type<tc>, window_params = [{transform_indices = @transform_0, window_bounds = array<i64: 1, 512, 324>}, {pipeline_mode = #tpu.pipeline_mode<synchronous>, transform_indices = @transform_1, window_bounds = array<i64: 324, 128>}, {transform_indices = @transform_2, window_bounds = array<i64: 1, 512, 128>}, {pipeline_mode = #tpu.pipeline_mode<synchronous>, transform_indices = @transform_3, window_bounds = array<i64: 1, 1, 128>}, {transform_indices = @transform_4, window_bounds = array<i64: 1, 512, 128>}, {transform_indices = @transform_5, window_bounds = array<i64: 1, 1, 1, 128>}, {transform_indices = @transform_6, window_bounds = array<i64: 1, 1, 1, 128>}]} {
    %c0 = arith.constant 0 : index
    %c0_0 = arith.constant 0 : index
    %c0_1 = arith.constant 0 : index
    %0 = vector.load %arg2[%c0, %c0_0, %c0_1] : memref<1x512x324xbf16, #tpu.memory_space<vmem>>, vector<1x512x324xbf16>
    %1 = vector.shape_cast %0 : vector<1x512x324xbf16> to vector<512x324xbf16>
    %c0_2 = arith.constant 0 : index
    %c0_3 = arith.constant 0 : index
    %2 = vector.load %arg3[%c0_2, %c0_3] : memref<324x128xbf16, #tpu.memory_space<vmem>>, vector<324x128xbf16>
    %cst = arith.constant dense<0.000000e+00> : vector<512x128xf32>
    %3 = tpu.matmul %1, %2, %cst {dimension_numbers = #tpu.dot_dimension_numbers<[1], [0], [0], [1], [0, 0, 1, 1], [], []>} : vector<512x324xbf16>, vector<324x128xbf16>, vector<512x128xf32> -> vector<512x128xf32>
    %c0_4 = arith.constant 0 : index
    %c0_5 = arith.constant 0 : index
    %c0_6 = arith.constant 0 : index
    %4 = vector.load %arg4[%c0_4, %c0_5, %c0_6] : memref<1x512x128xbf16, #tpu.memory_space<vmem>>, vector<1x512x128xbf16>
    %5 = vector.shape_cast %4 : vector<1x512x128xbf16> to vector<512x128xbf16>
    %6 = arith.extf %5 : vector<512x128xbf16> to vector<512x128xf32>
    %c0_7 = arith.constant 0 : index
    %c0_8 = arith.constant 0 : index
    %c0_9 = arith.constant 0 : index
    %7 = vector.load %arg5[%c0_7, %c0_8, %c0_9] : memref<1x1x128xf32, #tpu.memory_space<vmem>>, vector<1x1x128xf32>
    %8 = vector.shape_cast %7 : vector<1x1x128xf32> to vector<1x128xf32>
    %9 = vector.broadcast %8 : vector<1x128xf32> to vector<512x128xf32>
    %10 = arith.mulf %6, %9 : vector<512x128xf32>
    %11 = arith.addf %10, %3 : vector<512x128xf32>
    %12 = arith.truncf %11 : vector<512x128xf32> to vector<512x128xbf16>
    %c0_10 = arith.constant 0 : index
    %c0_11 = arith.constant 0 : index
    %c0_12 = arith.constant 0 : index
    %13 = vector.load %arg6[%c0_10, %c0_11, %c0_12] : memref<1x512x128xbf16, #tpu.memory_space<vmem>>, vector<1x512x128xbf16>
    %14 = vector.shape_cast %13 : vector<1x512x128xbf16> to vector<512x128xbf16>
    %15 = vector.shape_cast %12 : vector<512x128xbf16> to vector<1x512x128xbf16>
    tpu.vector_store %arg6[%c0_10, %c0_11, %c0_12], %15 {strides = array<i32>} : memref<1x512x128xbf16, #tpu.memory_space<vmem>>, vector<1x512x128xbf16>,
    %cst_13 = arith.constant dense<0.000000e+00> : vector<128xf32>
    %16 = vector.multi_reduction <add>, %11, %cst_13 [0] : vector<512x128xf32> to vector<128xf32>
    %17 = vector.shape_cast %16 : vector<128xf32> to vector<1x128xf32>
    %c0_14 = arith.constant 0 : index
    %c0_15 = arith.constant 0 : index
    %c0_16 = arith.constant 0 : index
    %c0_17 = arith.constant 0 : index
    %18 = vector.load %arg7[%c0_14, %c0_15, %c0_16, %c0_17] : memref<1x1x1x128xf32, #tpu.memory_space<vmem>>, vector<1x1x1x128xf32>
    %19 = vector.shape_cast %18 : vector<1x1x1x128xf32> to vector<1x128xf32>
    %20 = vector.shape_cast %17 : vector<1x128xf32> to vector<1x1x1x128xf32>
    tpu.vector_store %arg7[%c0_14, %c0_15, %c0_16, %c0_17], %20 {strides = array<i32>} : memref<1x1x1x128xf32, #tpu.memory_space<vmem>>, vector<1x1x1x128xf32>,
    %21 = arith.mulf %11, %11 : vector<512x128xf32>
    %cst_18 = arith.constant dense<0.000000e+00> : vector<128xf32>
    %22 = vector.multi_reduction <add>, %21, %cst_18 [0] : vector<512x128xf32> to vector<128xf32>
    %23 = vector.shape_cast %22 : vector<128xf32> to vector<1x128xf32>
    %c0_19 = arith.constant 0 : index
    %c0_20 = arith.constant 0 : index
    %c0_21 = arith.constant 0 : index
    %c0_22 = arith.constant 0 : index
    %24 = vector.load %arg8[%c0_19, %c0_20, %c0_21, %c0_22] : memref<1x1x1x128xf32, #tpu.memory_space<vmem>>, vector<1x1x1x128xf32>
    %25 = vector.shape_cast %24 : vector<1x1x1x128xf32> to vector<1x128xf32>
    %26 = vector.shape_cast %23 : vector<1x128xf32> to vector<1x1x1x128xf32>
    tpu.vector_store %arg8[%c0_19, %c0_20, %c0_21, %c0_22], %26 {strides = array<i32>} : memref<1x1x1x128xf32, #tpu.memory_space<vmem>>, vector<1x1x1x128xf32>,
    return
  }
  func.func @transform_0(%arg0: i32, %arg1: i32) -> (i32, i32, i32) {
    %c0_i32 = arith.constant 0 : i32
    %c0_i32_0 = arith.constant 0 : i32
    return %arg0, %arg1, %c0_i32 : i32, i32, i32
  }
  func.func @transform_1(%arg0: i32, %arg1: i32) -> (i32, i32) {
    %c0_i32 = arith.constant 0 : i32
    %c0_i32_0 = arith.constant 0 : i32
    %c0_i32_1 = arith.constant 0 : i32
    return %c0_i32, %c0_i32_0 : i32, i32
  }
  func.func @transform_2(%arg0: i32, %arg1: i32) -> (i32, i32, i32) {
    %c0_i32 = arith.constant 0 : i32
    %c0_i32_0 = arith.constant 0 : i32
    return %arg0, %arg1, %c0_i32 : i32, i32, i32
  }
  func.func @transform_3(%arg0: i32, %arg1: i32) -> (i32, i32, i32) {
    %c0_i32 = arith.constant 0 : i32
    %c0_i32_0 = arith.constant 0 : i32
    %c0_i32_1 = arith.constant 0 : i32
    %c0_i32_2 = arith.constant 0 : i32
    return %c0_i32, %c0_i32_0, %c0_i32_1 : i32, i32, i32
  }
  func.func @transform_4(%arg0: i32, %arg1: i32) -> (i32, i32, i32) {
    %c0_i32 = arith.constant 0 : i32
    %c0_i32_0 = arith.constant 0 : i32
    return %arg0, %arg1, %c0_i32 : i32, i32, i32
  }
  func.func @transform_5(%arg0: i32, %arg1: i32) -> (i32, i32, i32, i32) {
    %c0_i32 = arith.constant 0 : i32
    %c0_i32_0 = arith.constant 0 : i32
    %c0_i32_1 = arith.constant 0 : i32
    return %arg1, %arg0, %c0_i32, %c0_i32_0 : i32, i32, i32, i32
  }
  func.func @transform_6(%arg0: i32, %arg1: i32) -> (i32, i32, i32, i32) {
    %c0_i32 = arith.constant 0 : i32
    %c0_i32_0 = arith.constant 0 : i32
    %c0_i32_1 = arith.constant 0 : i32
    return %arg1, %arg0, %c0_i32, %c0_i32_0 : i32, i32, i32, i32
  }
}

module attributes {stable_mosaic.version = 11 : i64} {
  func.func @_gn_relu_t_kernel(%arg0: i32, %arg1: i32, %arg2: memref<1x512x128xbf16, #tpu.memory_space<vmem>>, %arg3: memref<1x1x128xf32, #tpu.memory_space<vmem>>, %arg4: memref<1x1x128xf32, #tpu.memory_space<vmem>>, %arg5: memref<1x32x512xf32, #tpu.memory_space<vmem>>) attributes {dimension_semantics = [#tpu.dimension_semantics<parallel>, #tpu.dimension_semantics<parallel>], iteration_bounds = array<i64: 2, 1>, scalar_prefetch = 0 : i64, scratch_operands = 0 : i64, tpu.core_type = #tpu.core_type<tc>, window_params = [{transform_indices = @transform_0, window_bounds = array<i64: 1, 512, 128>}, {transform_indices = @transform_1, window_bounds = array<i64: 1, 1, 128>}, {transform_indices = @transform_2, window_bounds = array<i64: 1, 1, 128>}, {transform_indices = @transform_3, window_bounds = array<i64: 1, 32, 512>}]} {
    %c0 = arith.constant 0 : index
    %c0_0 = arith.constant 0 : index
    %c0_1 = arith.constant 0 : index
    %0 = vector.load %arg2[%c0, %c0_0, %c0_1] : memref<1x512x128xbf16, #tpu.memory_space<vmem>>, vector<1x512x128xbf16>
    %1 = vector.shape_cast %0 : vector<1x512x128xbf16> to vector<512x128xbf16>
    %2 = arith.extf %1 : vector<512x128xbf16> to vector<512x128xf32>
    %c0_2 = arith.constant 0 : index
    %c0_3 = arith.constant 0 : index
    %c0_4 = arith.constant 0 : index
    %3 = vector.load %arg3[%c0_2, %c0_3, %c0_4] : memref<1x1x128xf32, #tpu.memory_space<vmem>>, vector<1x1x128xf32>
    %4 = vector.shape_cast %3 : vector<1x1x128xf32> to vector<1x128xf32>
    %5 = vector.broadcast %4 : vector<1x128xf32> to vector<512x128xf32>
    %6 = arith.mulf %2, %5 : vector<512x128xf32>
    %c0_5 = arith.constant 0 : index
    %c0_6 = arith.constant 0 : index
    %c0_7 = arith.constant 0 : index
    %7 = vector.load %arg4[%c0_5, %c0_6, %c0_7] : memref<1x1x128xf32, #tpu.memory_space<vmem>>, vector<1x1x128xf32>
    %8 = vector.shape_cast %7 : vector<1x1x128xf32> to vector<1x128xf32>
    %9 = vector.broadcast %8 : vector<1x128xf32> to vector<512x128xf32>
    %10 = arith.addf %6, %9 : vector<512x128xf32>
    %cst = arith.constant 0.000000e+00 : f32
    %11 = vector.broadcast %cst : f32 to vector<512x128xf32>
    %12 = arith.maximumf %10, %11 : vector<512x128xf32>
    %13 = tpu.transpose %12, [1, 0] : vector<512x128xf32> -> vector<128x512xf32>
    %14 = vector.extract_strided_slice %13 {offsets = [0, 0], sizes = [32, 512], strides = [1, 1]} : vector<128x512xf32> to vector<32x512xf32>
    %c0_8 = arith.constant 0 : index
    %c0_9 = arith.constant 0 : index
    %c0_10 = arith.constant 0 : index
    %15 = vector.load %arg5[%c0_8, %c0_9, %c0_10] : memref<1x32x512xf32, #tpu.memory_space<vmem>>, vector<1x32x512xf32>
    %16 = vector.shape_cast %15 : vector<1x32x512xf32> to vector<32x512xf32>
    %17 = vector.shape_cast %14 : vector<32x512xf32> to vector<1x32x512xf32>
    tpu.vector_store %arg5[%c0_8, %c0_9, %c0_10], %17 {strides = array<i32>} : memref<1x32x512xf32, #tpu.memory_space<vmem>>, vector<1x32x512xf32>,
    return
  }
  func.func @transform_0(%arg0: i32, %arg1: i32) -> (i32, i32, i32) {
    %c0_i32 = arith.constant 0 : i32
    %c0_i32_0 = arith.constant 0 : i32
    return %arg0, %arg1, %c0_i32 : i32, i32, i32
  }
  func.func @transform_1(%arg0: i32, %arg1: i32) -> (i32, i32, i32) {
    %c0_i32 = arith.constant 0 : i32
    %c0_i32_0 = arith.constant 0 : i32
    %c0_i32_1 = arith.constant 0 : i32
    return %arg0, %c0_i32, %c0_i32_0 : i32, i32, i32
  }
  func.func @transform_2(%arg0: i32, %arg1: i32) -> (i32, i32, i32) {
    %c0_i32 = arith.constant 0 : i32
    %c0_i32_0 = arith.constant 0 : i32
    %c0_i32_1 = arith.constant 0 : i32
    return %arg0, %c0_i32, %c0_i32_0 : i32, i32, i32
  }
  func.func @transform_3(%arg0: i32, %arg1: i32) -> (i32, i32, i32) {
    %c0_i32 = arith.constant 0 : i32
    %c0_i32_0 = arith.constant 0 : i32
    return %arg0, %c0_i32, %arg1 : i32, i32, i32
  }
}

</mosaic_0001>

<bundles_post_ra>
// kernel: stem_forward.3
= control target key start
LH: loop header
LB: loop body
LE: loop exit
PB: predicated region body
PF: predicated region fallthrough
CT: control target
= control target key end

     0   :  { %s1407_s9 = smov 0   ;;  %s1409_s10 = smov 0   ;;  %s1559_s0 = inlined_call_operand.vmem [shape: bf16[2,512,54], index: 0, kind: input, shape index: {}]   ;;  %s1560_s1 = inlined_call_operand.vmem [shape: bf16[54,128], index: 1, kind: input, shape index: {}]   ;;  %s1561_s2 = inlined_call_operand.vmem [shape: bf16[2,512,128], index: 2, kind: output, shape index: {}]  }
   0x1   :  { %s1411_s11 = smov 0  }
   0x2 LB: > { %s24_s12 = sadd.s32 1, %s1386_s10  ;;  %p925_p0 = scmp.ge.s32.totalorder %s1390_s11, 1  ;;  %s1390_s11 = sphi %s1411_s11, %s12_s11   ;;  %s1386_s10 = sphi %s1409_s10, %s1563_s10   ;;  %s1382_s9 = sphi %s1407_s9, %s1562_s9  }
   0x3   : > { %p26_p1 = scmp.ge.s32.totalorder %s24_s12, 2  ;;  %p133_p2 = scmp.lt.s32.totalorder %s1390_s11, 3 }
   0x5   : > { %s1565_s12 = smov (%p26_p1, %s24_s12), 0  ;;  %p134_p3 = pnand %p925_p0, %p133_p2 }
   0x6   : > { %p164_p4 = scmp.lt.s32.totalorder (!%p134_p3), %s1382_s9, 1 }
   0x7   : > { %137 = sbr.rel (%p134_p3) target bundleno = 290 (0x122), region = 28 }
   0xc   : > { %v254_v0 = vld [vmem:[%s1560_s1 + $0x18] sm:$0x7]  ;;  %vm533_vm0 = vcmask 1042432   ;;  %v1140_v4 = vld [vmem:[%s1560_s1 + $0x10] sm:$0xff]  ;;  %s1567_s9 = smov (!%p164_p4, %s1382_s9), 1  ;;  %v1139_v5 = vld [vmem:[%s1560_s1 + $0x8] sm:$0xff] }
   0xd   : > { %v428_v1 = vunpack.c.l.b16 %v254_v0  ;;  %s1104_s19 = sshll.u32 %s1567_s9, 8  ;;  %v1138_v6 = vld [vmem:[%s1560_s1] sm:$0xff]  ;;  %vm436_vm1 = vcmask 441344  }
   0xe   : > { %s1445_s24 = scalar_lea.vmem %s1559_s0, %s1104_s19  ;;  %s1516_s27 = scalar_lea.vmem %s1561_s2, %s1104_s19 }
   0xf   : > { %v432_v2 = vpack.c.b16 %v428_v1, %v428_v1  ;;  %v1106_v7 = vld [vmem:[%s1445_s24] sm:$0xff]  ;;  %v1107_v11 = vld [vmem:[%s1445_s24 + $0x8] sm:$0xff]  ;;  %v1108_v15 = vld [vmem:[%s1445_s24 + $0x10] sm:$0xff] }
  0x10   : > { %v1114_v8 = vld [vmem:[%s1445_s24 + $0x40] sm:$0xff]  ;;  %v1115_v12 = vld [vmem:[%s1445_s24 + $0x48] sm:$0xff]  ;;  %v1116_v16 = vld [vmem:[%s1445_s24 + $0x50] sm:$0xff] }
  0x11   : > { %v535_v3 = vsel %vm533_vm0, %v432_v2, 0  ;;  %v1122_v9 = vld [vmem:[%s1445_s24 + $0x80] sm:$0xff]  ;;  %v1123_v13 = vld [vmem:[%s1445_s24 + $0x88] sm:$0xff]  ;;  %v1124_v17 = vld [vmem:[%s1445_s24 + $0x90] sm:$0xff] }
  0x12   : > { %541 = vmatpush.bf16.msra.mxu0 %v535_v3  ;;  %1332 = vmatpush.bf16.msra.mxu1 %v535_v3  ;;  %v1130_v10 = vld [vmem:[%s1445_s24 + $0xc0] sm:$0xff]  ;;  %v1131_v14 = vld [vmem:[%s1445_s24 + $0xc8] sm:$0xff]  ;;  %v1132_v18 = vld [vmem:[%s1445_s24 + $0xd0] sm:$0xff] }
  0x13   : > { %1333 = vmatpush.bf16.msra.mxu2 %v535_v3  ;;  %1334 = vmatpush.bf16.msra.mxu3 %v535_v3  ;;  %v1109_v19 = vld [vmem:[%s1445_s24 + $0x18] sm:$0xff]  ;;  %v1110_v23 = vld [vmem:[%s1445_s24 + $0x20] sm:$0xff]  ;;  %v1111_v27 = vld [vmem:[%s1445_s24 + $0x28] sm:$0xff] }
  0x14   : > { %v1117_v20 = vld [vmem:[%s1445_s24 + $0x58] sm:$0xff]  ;;  %v1118_v24 = vld [vmem:[%s1445_s24 + $0x60] sm:$0xff]  ;;  %v1119_v28 = vld [vmem:[%s1445_s24 + $0x68] sm:$0xff] }
  0x15   : > { %v1125_v21 = vld [vmem:[%s1445_s24 + $0x98] sm:$0xff]  ;;  %v1126_v25 = vld [vmem:[%s1445_s24 + $0xa0] sm:$0xff]  ;;  %v1127_v29 = vld [vmem:[%s1445_s24 + $0xa8] sm:$0xff] }
  0x16   : > { %542 = vmatpush.bf16.msra.mxu0 %v1140_v4  ;;  %1335 = vmatpush.bf16.msra.mxu1 %v1140_v4  ;;  %v1133_v22 = vld [vmem:[%s1445_s24 + $0xd8] sm:$0xff]  ;;  %v1134_v26 = vld [vmem:[%s1445_s24 + $0xe0] sm:$0xff]  ;;  %v1135_v30 = vld [vmem:[%s1445_s24 + $0xe8] sm:$0xff] }
  0x17   : > { %1336 = vmatpush.bf16.msra.mxu2 %v1140_v4  ;;  %1337 = vmatpush.bf16.msra.mxu3 %v1140_v4  ;;  %v1112_v31 = vld [vmem:[%s1445_s24 + $0x30] sm:$0xff]  ;;  %v1113_v35 = vld [vmem:[%s1445_s24 + $0x38] sm:$0xff] }
  0x18   : > { %v1120_v32 = vld [vmem:[%s1445_s24 + $0x70] sm:$0xff]  ;;  %v1121_v36 = vld [vmem:[%s1445_s24 + $0x78] sm:$0xff] }
  0x19   : > { %v1128_v33 = vld [vmem:[%s1445_s24 + $0xb0] sm:$0xff]  ;;  %v1129_v37 = vld [vmem:[%s1445_s24 + $0xb8] sm:$0xff] }
  0x1a   : > { %543 = vmatpush.bf16.msra.mxu0 %v1139_v5  ;;  %1338 = vmatpush.bf16.msra.mxu1 %v1139_v5  ;;  %v1136_v34 = vld [vmem:[%s1445_s24 + $0xf0] sm:$0xff]  ;;  %v1137_v38 = vld [vmem:[%s1445_s24 + $0xf8] sm:$0xff] }
  0x1b   : > { %1339 = vmatpush.bf16.msra.mxu2 %v1139_v5  ;;  %1340 = vmatpush.bf16.msra.mxu3 %v1139_v5 }
  0x1e   : > { %544 = vmatpush.bf16.msra.mxu0 %v1138_v6  ;;  %1341 = vmatpush.bf16.msra.mxu1 %v1138_v6 }
  0x1f   : > { %1342 = vmatpush.bf16.msra.mxu2 %v1138_v6  ;;  %1343 = vmatpush.bf16.msra.mxu3 %v1138_v6 }
  0x21   : > { %1070 = vmatmul.msk.bf16.vlgmr.msra.gmra.mxu0 %vm436_vm1, %v1106_v7  ;;  %1078 = vmatmul.msk.bf16.vlgmr.msra.gmra.mxu1 %vm436_vm1, %v1114_v8 }
  0x22   : > { %1086 = vmatmul.msk.bf16.vlgmr.msra.gmra.mxu2 %vm436_vm1, %v1122_v9  ;;  %1094 = vmatmul.msk.bf16.vlgmr.msra.gmra.mxu3 %vm436_vm1, %v1130_v10 }
  0x31   : > { %1071 = vmatmul.msk.bf16.gmra.mxu0 %vm436_vm1, %v1107_v11  ;;  %1079 = vmatmul.msk.bf16.gmra.mxu1 %vm436_vm1, %v1115_v12 }
  0x32   : > { %1087 = vmatmul.msk.bf16.gmra.mxu2 %vm436_vm1, %v1123_v13  ;;  %1095 = vmatmul.msk.bf16.gmra.mxu3 %vm436_vm1, %v1131_v14 }
  0x41   : > { %1072 = vmatmul.msk.bf16.gmra.mxu0 %vm436_vm1, %v1108_v15  ;;  %1080 = vmatmul.msk.bf16.gmra.mxu1 %vm436_vm1, %v1116_v16 }
  0x42   : > { %1088 = vmatmul.msk.bf16.gmra.mxu2 %vm436_vm1, %v1124_v17  ;;  %1096 = vmatmul.msk.bf16.gmra.mxu3 %vm436_vm1, %v1132_v18 }
  0x51   : > { %1073 = vmatmul.msk.bf16.gmra.mxu0 %vm436_vm1, %v1109_v19  ;;  %1081 = vmatmul.msk.bf16.gmra.mxu1 %vm436_vm1, %v1117_v20 }
  0x52   : > { %1089 = vmatmul.msk.bf16.gmra.mxu2 %vm436_vm1, %v1125_v21  ;;  %1097 = vmatmul.msk.bf16.gmra.mxu3 %vm436_vm1, %v1133_v22 }
  0x61   : > { %1074 = vmatmul.msk.bf16.gmra.mxu0 %vm436_vm1, %v1110_v23  ;;  %1082 = vmatmul.msk.bf16.gmra.mxu1 %vm436_vm1, %v1118_v24 }
  0x62   : > { %1090 = vmatmul.msk.bf16.gmra.mxu2 %vm436_vm1, %v1126_v25  ;;  %1098 = vmatmul.msk.bf16.gmra.mxu3 %vm436_vm1, %v1134_v26 }
  0x71   : > { %1075 = vmatmul.msk.bf16.gmra.mxu0 %vm436_vm1, %v1111_v27  ;;  %1083 = vmatmul.msk.bf16.gmra.mxu1 %vm436_vm1, %v1119_v28 }
  0x72   : > { %1091 = vmatmul.msk.bf16.gmra.mxu2 %vm436_vm1, %v1127_v29  ;;  %1099 = vmatmul.msk.bf16.gmra.mxu3 %vm436_vm1, %v1135_v30 }
  0x81   : > { %1076 = vmatmul.msk.bf16.gmra.mxu0 %vm436_vm1, %v1112_v31  ;;  %1084 = vmatmul.msk.bf16.gmra.mxu1 %vm436_vm1, %v1120_v32 }
  0x82   : > { %1092 = vmatmul.msk.bf16.gmra.mxu2 %vm436_vm1, %v1128_v33  ;;  %1100 = vmatmul.msk.bf16.gmra.mxu3 %vm436_vm1, %v1136_v34 }
  0x91   : > { %1077 = vmatmul.msk.bf16.gmra.mxu0 %vm436_vm1, %v1113_v35  ;;  %1085 = vmatmul.msk.bf16.gmra.mxu1 %vm436_vm1, %v1121_v36 }
  0x92   : > { %1093 = vmatmul.msk.bf16.gmra.mxu2 %vm436_vm1, %v1129_v37  ;;  %1101 = vmatmul.msk.bf16.gmra.mxu3 %vm436_vm1, %v1137_v38 }
  0x9e   : > { %v546_v39 = vpop.f32.mrf.mxu0  ;;  %v586_v40 = vpop.f32.mrf.mxu1 }
  0xa5   : > { %v626_v41 = vpop.f32.mrf.mxu2  ;;  %v666_v42 = vpop.f32.mrf.mxu3 }
  0xa6   : > { %v548_v43 = vpop.f32.mrf.mxu0  ;;  %v588_v44 = vpop.f32.mrf.mxu1 }
  0xa7   : > { %v1144_v45 = vpack.c.bf16 %v548_v43, %v546_v39  ;;  %v1184_v46 = vpack.c.bf16 %v588_v44, %v586_v40 }
  0xa9   : > { %1145 = vst [vmem:[%s1516_s27] sm:$0xff] %v1144_v45  }
  0xaa   : > { %1308 = vst [vmem:[%s1516_s27 + $0x40] sm:$0xff] %v1184_v46  }
  0xad   : > { %v628_v47 = vpop.f32.mrf.mxu2  ;;  %v668_v48 = vpop.f32.mrf.mxu3 }
  0xae   : > { %v1224_v49 = vpack.c.bf16 %v628_v47, %v626_v41  ;;  %v1264_v50 = vpack.c.bf16 %v668_v48, %v666_v42  ;;  %v551_v51 = vpop.f32.mrf.mxu0  ;;  %v591_v52 = vpop.f32.mrf.mxu1 }
  0xb0   : > { %1316 = vst [vmem:[%s1516_s27 + $0x80] sm:$0xff] %v1224_v49  }
  0xb1   : > { %1324 = vst [vmem:[%s1516_s27 + $0xc0] sm:$0xff] %v1264_v50  }
  0xb5   : > { %v631_v53 = vpop.f32.mrf.mxu2  ;;  %v671_v54 = vpop.f32.mrf.mxu3 }
  0xb6   : > { %v553_v55 = vpop.f32.mrf.mxu0  ;;  %v593_v56 = vpop.f32.mrf.mxu1 }
  0xb7   : > { %v1149_v57 = vpack.c.bf16 %v553_v55, %v551_v51  ;;  %v1189_v58 = vpack.c.bf16 %v593_v56, %v591_v52 }
  0xb9   : > { %1301 = vst [vmem:[%s1516_s27 + $0x8] sm:$0xff] %v1149_v57  }
  0xba   : > { %1309 = vst [vmem:[%s1516_s27 + $0x48] sm:$0xff] %v1189_v58  }
  0xbd   : > { %v633_v59 = vpop.f32.mrf.mxu2  ;;  %v673_v60 = vpop.f32.mrf.mxu3 }
  0xbe   : > { %v1229_v61 = vpack.c.bf16 %v633_v59, %v631_v53  ;;  %v1269_v62 = vpack.c.bf16 %v673_v60, %v671_v54  ;;  %v556_v63 = vpop.f32.mrf.mxu0  ;;  %v596_v0 = vpop.f32.mrf.mxu1 }
  0xc0   : > { %1317 = vst [vmem:[%s1516_s27 + $0x88] sm:$0xff] %v1229_v61  }
  0xc1   : > { %1325 = vst [vmem:[%s1516_s27 + $0xc8] sm:$0xff] %v1269_v62  }
  0xc5   : > { %v636_v1 = vpop.f32.mrf.mxu2  ;;  %v676_v2 = vpop.f32.mrf.mxu3 }
  0xc6   : > { %v558_v3 = vpop.f32.mrf.mxu0  ;;  %v598_v4 = vpop.f32.mrf.mxu1 }
  0xc7   : > { %v1154_v5 = vpack.c.bf16 %v558_v3, %v556_v63  ;;  %v1194_v6 = vpack.c.bf16 %v598_v4, %v596_v0 }
  0xc9   : > { %1302 = vst [vmem:[%s1516_s27 + $0x10] sm:$0xff] %v1154_v5  }
  0xca   : > { %1310 = vst [vmem:[%s1516_s27 + $0x50] sm:$0xff] %v1194_v6  }
  0xcd   : > { %v638_v7 = vpop.f32.mrf.mxu2  ;;  %v678_v8 = vpop.f32.mrf.mxu3 }
  0xce   : > { %v1234_v9 = vpack.c.bf16 %v638_v7, %v636_v1  ;;  %v1274_v10 = vpack.c.bf16 %v678_v8, %v676_v2  ;;  %v561_v11 = vpop.f32.mrf.mxu0  ;;  %v601_v12 = vpop.f32.mrf.mxu1 }
  0xd0   : > { %1318 = vst [vmem:[%s1516_s27 + $0x90] sm:$0xff] %v1234_v9  }
  0xd1   : > { %1326 = vst [vmem:[%s1516_s27 + $0xd0] sm:$0xff] %v1274_v10  }
  0xd5   : > { %v641_v13 = vpop.f32.mrf.mxu2  ;;  %v681_v14 = vpop.f32.mrf.mxu3 }
  0xd6   : > { %v563_v15 = vpop.f32.mrf.mxu0  ;;  %v603_v16 = vpop.f32.mrf.mxu1 }
  0xd7   : > { %v1159_v17 = vpack.c.bf16 %v563_v15, %v561_v11  ;;  %v1199_v18 = vpack.c.bf16 %v603_v16, %v601_v12 }
  0xd9   : > { %1303 = vst [vmem:[%s1516_s27 + $0x18] sm:$0xff] %v1159_v17  }
  0xda   : > { %1311 = vst [vmem:[%s1516_s27 + $0x58] sm:$0xff] %v1199_v18  }
  0xdd   : > { %v643_v19 = vpop.f32.mrf.mxu2  ;;  %v683_v20 = vpop.f32.mrf.mxu3 }
  0xde   : > { %v1239_v21 = vpack.c.bf16 %v643_v19, %v641_v13  ;;  %v1279_v22 = vpack.c.bf16 %v683_v20, %v681_v14  ;;  %v566_v23 = vpop.f32.mrf.mxu0  ;;  %v606_v24 = vpop.f32.mrf.mxu1 }
  0xe0   : > { %1319 = vst [vmem:[%s1516_s27 + $0x98] sm:$0xff] %v1239_v21  }
  0xe1   : > { %1327 = vst [vmem:[%s1516_s27 + $0xd8] sm:$0xff] %v1279_v22  }
  0xe5   : > { %v646_v25 = vpop.f32.mrf.mxu2  ;;  %v686_v26 = vpop.f32.mrf.mxu3 }
  0xe6   : > { %v568_v27 = vpop.f32.mrf.mxu0  ;;  %v608_v28 = vpop.f32.mrf.mxu1 }
  0xe7   : > { %v1164_v29 = vpack.c.bf16 %v568_v27, %v566_v23  ;;  %v1204_v30 = vpack.c.bf16 %v608_v28, %v606_v24 }
  0xe9   : > { %1304 = vst [vmem:[%s1516_s27 + $0x20] sm:$0xff] %v1164_v29  }
  0xea   : > { %1312 = vst [vmem:[%s1516_s27 + $0x60] sm:$0xff] %v1204_v30  }
  0xed   : > { %v648_v31 = vpop.f32.mrf.mxu2  ;;  %v688_v32 = vpop.f32.mrf.mxu3 }
  0xee   : > { %v1244_v33 = vpack.c.bf16 %v648_v31, %v646_v25  ;;  %v1284_v34 = vpack.c.bf16 %v688_v32, %v686_v26  ;;  %v571_v35 = vpop.f32.mrf.mxu0  ;;  %v611_v36 = vpop.f32.mrf.mxu1 }
  0xf0   : > { %1320 = vst [vmem:[%s1516_s27 + $0xa0] sm:$0xff] %v1244_v33  }
  0xf1   : > { %1328 = vst [vmem:[%s1516_s27 + $0xe0] sm:$0xff] %v1284_v34  }
  0xf5   : > { %v651_v37 = vpop.f32.mrf.mxu2  ;;  %v691_v38 = vpop.f32.mrf.mxu3 }
  0xf6   : > { %v573_v39 = vpop.f32.mrf.mxu0  ;;  %v613_v40 = vpop.f32.mrf.mxu1 }
  0xf7   : > { %v1169_v41 = vpack.c.bf16 %v573_v39, %v571_v35  ;;  %v1209_v42 = vpack.c.bf16 %v613_v40, %v611_v36 }
  0xf9   : > { %1305 = vst [vmem:[%s1516_s27 + $0x28] sm:$0xff] %v1169_v41  }
  0xfa   : > { %1313 = vst [vmem:[%s1516_s27 + $0x68] sm:$0xff] %v1209_v42  }
  0xfd   : > { %v653_v43 = vpop.f32.mrf.mxu2  ;;  %v693_v44 = vpop.f32.mrf.mxu3 }
  0xfe   : > { %v1249_v45 = vpack.c.bf16 %v653_v43, %v651_v37  ;;  %v1289_v46 = vpack.c.bf16 %v693_v44, %v691_v38  ;;  %v576_v47 = vpop.f32.mrf.mxu0  ;;  %v616_v48 = vpop.f32.mrf.mxu1 }
 0x100   : > { %1321 = vst [vmem:[%s1516_s27 + $0xa8] sm:$0xff] %v1249_v45  }
 0x101   : > { %1329 = vst [vmem:[%s1516_s27 + $0xe8] sm:$0xff] %v1289_v46  }
 0x105   : > { %v656_v49 = vpop.f32.mrf.mxu2  ;;  %v696_v50 = vpop.f32.mrf.mxu3 }
 0x106   : > { %v578_v51 = vpop.f32.mrf.mxu0  ;;  %v618_v52 = vpop.f32.mrf.mxu1 }
 0x107   : > { %v1174_v53 = vpack.c.bf16 %v578_v51, %v576_v47  ;;  %v1214_v54 = vpack.c.bf16 %v618_v52, %v616_v48 }
 0x109   : > { %1306 = vst [vmem:[%s1516_s27 + $0x30] sm:$0xff] %v1174_v53  }
 0x10a   : > { %1314 = vst [vmem:[%s1516_s27 + $0x70] sm:$0xff] %v1214_v54  }
 0x10d   : > { %v658_v55 = vpop.f32.mrf.mxu2  ;;  %v698_v56 = vpop.f32.mrf.mxu3 }
 0x10e   : > { %v1254_v57 = vpack.c.bf16 %v658_v55, %v656_v49  ;;  %v1294_v58 = vpack.c.bf16 %v698_v56, %v696_v50  ;;  %v581_v59 = vpop.f32.mrf.mxu0  ;;  %v621_v60 = vpop.f32.mrf.mxu1 }
 0x110   : > { %1322 = vst [vmem:[%s1516_s27 + $0xb0] sm:$0xff] %v1254_v57  }
 0x111   : > { %1330 = vst [vmem:[%s1516_s27 + $0xf0] sm:$0xff] %v1294_v58  }
 0x115   : > { %v661_v61 = vpop.f32.mrf.mxu2  ;;  %v701_v62 = vpop.f32.mrf.mxu3 }
 0x116   : > { %v583_v63 = vpop.f32.mrf.mxu0  ;;  %v623_v0 = vpop.f32.mrf.mxu1 }
 0x117   : > { %v1179_v1 = vpack.c.bf16 %v583_v63, %v581_v59  ;;  %v1219_v2 = vpack.c.bf16 %v623_v0, %v621_v60 }
 0x119   : > { %1307 = vst [vmem:[%s1516_s27 + $0x38] sm:$0xff] %v1179_v1  }
 0x11a   : > { %1315 = vst [vmem:[%s1516_s27 + $0x78] sm:$0xff] %v1219_v2  }
 0x11d   : > { %v663_v3 = vpop.f32.mrf.mxu2  ;;  %v703_v4 = vpop.f32.mrf.mxu3 }
 0x11e   : > { %v1259_v5 = vpack.c.bf16 %v663_v3, %v661_v61  ;;  %v1299_v6 = vpack.c.bf16 %v703_v4, %v701_v62 }
 0x120   : > { %1323 = vst [vmem:[%s1516_s27 + $0xb8] sm:$0xff] %v1259_v5  }
 0x121   : > { %1331 = vst [vmem:[%s1516_s27 + $0xf8] sm:$0xff] %v1299_v6  }
 0x122 PF: > { %s12_s11 = sadd.s32 1, %s1390_s11   ;;  %s1562_s9 = smov %s1386_s10 }
 0x123   : > { %p9_p5 = scmp.ge.s32.totalorder %s12_s11, 4   ;;  %s1563_s10 = smov %s1565_s12 }
 0x125   :  { %11 = sbr.rel (!%p9_p5) target bundleno = 2 (0x2), region = 58 }

// kernel: stem_forward.5
= control target key start
LH: loop header
LB: loop body
LE: loop exit
PB: predicated region body
PF: predicated region fallthrough
CT: control target
= control target key end

     0   :  { %s1057_s12 = smov 0   ;;  %s1059_s13 = smov 0   ;;  %s1286_s0 = inlined_call_operand.vmem [shape: bf16[2,512,128], index: 0, kind: input, shape index: {}]   ;;  %s1287_s1 = inlined_call_operand.vmem [shape: f32[2,1,128], index: 1, kind: input, shape index: {}]   ;;  %s1288_s2 = inlined_call_operand.vmem [shape: f32[2,1,128], index: 2, kind: input, shape index: {}]   ;;  %s1289_s3 = inlined_call_operand.vmem [shape: f32[2,32,512], index: 3, kind: output, shape index: {}]  }
   0x1   :  { %s1061_s14 = smov 0  }
   0x2 LB: > { %s25_s15 = sadd.s32 1, %s1031_s13  ;;  %p819_p0 = scmp.ge.s32.totalorder %s1035_s14, 1  ;;  %s1035_s14 = sphi %s1061_s14, %s13_s14   ;;  %s1031_s13 = sphi %s1059_s13, %s1291_s13   ;;  %s1027_s12 = sphi %s1057_s12, %s1290_s12  }
   0x3   : > { %p27_p1 = scmp.ge.s32.totalorder %s25_s15, 2  ;;  %p174_p2 = scmp.lt.s32.totalorder %s1035_s14, 3 }
   0x5   : > { %s1293_s15 = smov (%p27_p1, %s25_s15), 0  ;;  %p175_p3 = pnand %p819_p0, %p174_p2 }
   0x6   : > { %p213_p4 = scmp.lt.s32.totalorder (!%p175_p3), %s1027_s12, 1 }
   0x7   : > { %178 = sbr.rel (%p175_p3) target bundleno = 342 (0x156), region = 32 }
   0xc   : > { %s1295_s12 = smov (!%p213_p4, %s1027_s12), 1 }
   0xd   : > { %s826_s16 = sshll.u32 %s1295_s12, 8  ;;  %s224_s19 = scalar_lea.vmem %s1287_s1, %s1295_s12 }
   0xe   : > { %s1085_s22 = scalar_lea.vmem %s1286_s0, %s826_s16  ;;  %s227_s25 = scalar_lea.vmem %s1288_s2, %s1295_s12  ;;  %v1091_v0 = vld [vmem:[%s224_s19] ss:$0 sm:$0xff] }
   0xf   : > { %v829_v1 = vld [vmem:[%s1085_s22] sm:$0xff]   ;;  %v956_v8 = vld [vmem:[%s1085_s22 + $0x8] sm:$0xff]   ;;  %v957_v18 = vld [vmem:[%s1085_s22 + $0x10] sm:$0xff]   ;;  %s827_s26 = sshll.u32 %s1295_s12, 7 }
  0x10   : > { %v830_v2 = vunpack.c.l.bf16 %v829_v1  ;;  %v1094_v3 = vld [vmem:[%s227_s25] ss:$0 sm:$0xff]  ;;  %v831_v4 = vunpack.c.h.bf16 %v829_v1  ;;  %v834_v11 = vunpack.c.l.bf16 %v956_v8  ;;  %v835_v15 = vunpack.c.h.bf16 %v956_v8  ;;  %v958_v27 = vld [vmem:[%s1085_s22 + $0x18] sm:$0xff]   ;;  %v960_v45 = vld [vmem:[%s1085_s22 + $0x28] sm:$0xff]   ;;  %s1248_s29 = scalar_lea.vmem %s1289_s3, %s827_s26 }
  0x11   : > { %v838_v20 = vunpack.c.l.bf16 %v957_v18  ;;  %v839_v24 = vunpack.c.h.bf16 %v957_v18  ;;  %v842_v29 = vunpack.c.l.bf16 %v958_v27  ;;  %v843_v33 = vunpack.c.h.bf16 %v958_v27  ;;  %v959_v36 = vld [vmem:[%s1085_s22 + $0x20] sm:$0xff]   ;;  %v961_v54 = vld [vmem:[%s1085_s22 + $0x30] sm:$0xff]  }
  0x12   : > { %v370_v5 = vmul.f32 %v1091_v0, %v830_v2  ;;  %v371_v7 = vmul.f32 %v1091_v0, %v831_v4  ;;  %v372_v13 = vmul.f32 %v1091_v0, %v834_v11  ;;  %v373_v17 = vmul.f32 %v1091_v0, %v835_v15  ;;  %v963_v59 = vld [vmem:[%s1085_s22 + $0x40] sm:$0xff]  }
  0x13   : > { %v374_v22 = vmul.f32 %v1091_v0, %v838_v20  ;;  %v375_v26 = vmul.f32 %v1091_v0, %v839_v24  ;;  %v376_v31 = vmul.f32 %v1091_v0, %v842_v29  ;;  %v377_v35 = vmul.f32 %v1091_v0, %v843_v33  ;;  %v971_v11 = vld [vmem:[%s1085_s22 + $0x80] sm:$0xff]  }
  0x14   : > { %v438_v6 = vadd.f32 %v1094_v3, %v370_v5  ;;  %v439_v10 = vadd.f32 %v1094_v3, %v371_v7  ;;  %v440_v14 = vadd.f32 %v1094_v3, %v372_v13  ;;  %v441_v19 = vadd.f32 %v1094_v3, %v373_v17  ;;  %v962_v5 = vld [vmem:[%s1085_s22 + $0x38] sm:$0xff]   ;;  %v979_v29 = vld [vmem:[%s1085_s22 + $0xc0] sm:$0xff]  }
  0x15   : > { %v442_v23 = vadd.f32 %v1094_v3, %v374_v22  ;;  %v443_v28 = vadd.f32 %v1094_v3, %v375_v26  ;;  %v444_v32 = vadd.f32 %v1094_v3, %v376_v31  ;;  %v445_v37 = vadd.f32 %v1094_v3, %v377_v35 }
  0x16   : > { %v502_v9 = vmax.f32 %v438_v6, 0.0  ;;  %v503_v12 = vmax.f32 %v439_v10, 0.0  ;;  %v504_v16 = vmax.f32 %v440_v14, 0.0  ;;  %v505_v21 = vmax.f32 %v441_v19, 0.0  ;;  %v964_v19 = vld [vmem:[%s1085_s22 + $0x48] sm:$0xff]  }
  0x17   : > { %v506_v25 = vmax.f32 %v442_v23, 0.0  ;;  %v507_v30 = vmax.f32 %v443_v28, 0.0  ;;  %v508_v34 = vmax.f32 %v444_v32, 0.0  ;;  %v846_v38 = vunpack.c.l.bf16 %v959_v36 }
  0x18   : > { %566 = vxpose.xlu0.b32.start [1/16] (narrow) %v502_v9, 32  ;;  %v509_v39 = vmax.f32 %v445_v37, 0.0  ;;  %v847_v42 = vunpack.c.h.bf16 %v959_v36  ;;  %v850_v47 = vunpack.c.l.bf16 %v960_v45  ;;  %v851_v51 = vunpack.c.h.bf16 %v960_v45 }
  0x19   : > { %v378_v40 = vmul.f32 %v1091_v0, %v846_v38  ;;  %v854_v56 = vunpack.c.l.bf16 %v961_v54  ;;  %v855_v61 = vunpack.c.h.bf16 %v961_v54  ;;  %v862_v62 = vunpack.c.l.bf16 %v963_v59  ;;  %v972_v38 = vld [vmem:[%s1085_s22 + $0x88] sm:$0xff]  }
  0x1a   : > { %v379_v44 = vmul.f32 %v1091_v0, %v847_v42  ;;  %v380_v49 = vmul.f32 %v1091_v0, %v850_v47  ;;  %v381_v53 = vmul.f32 %v1091_v0, %v851_v51  ;;  %v858_v8 = vunpack.c.l.bf16 %v962_v5 }
  0x1b   : > { %v446_v41 = vadd.f32 %v1094_v3, %v378_v40  ;;  %v382_v58 = vmul.f32 %v1091_v0, %v854_v56  ;;  %v386_v63 = vmul.f32 %v1091_v0, %v862_v62  ;;  %v383_v2 = vmul.f32 %v1091_v0, %v855_v61  ;;  %v980_v56 = vld [vmem:[%s1085_s22 + $0xc8] sm:$0xff]  }
  0x1c   : > { %v447_v46 = vadd.f32 %v1094_v3, %v379_v44  ;;  %v448_v50 = vadd.f32 %v1094_v3, %v380_v49  ;;  %v449_v55 = vadd.f32 %v1094_v3, %v381_v53  ;;  %v863_v9 = vunpack.c.h.bf16 %v963_v59 }
  0x1d   : > { %v510_v43 = vmax.f32 %v446_v41, 0.0  ;;  %v450_v60 = vadd.f32 %v1094_v3, %v382_v58  ;;  %v454_v4 = vadd.f32 %v1094_v3, %v386_v63  ;;  %v451_v7 = vadd.f32 %v1094_v3, %v383_v2  ;;  %v973_v2 = vld [vmem:[%s1085_s22 + $0x90] sm:$0xff]  }
  0x1e   : > { %v511_v48 = vmax.f32 %v447_v46, 0.0  ;;  %v512_v52 = vmax.f32 %v448_v50, 0.0  ;;  %v513_v57 = vmax.f32 %v449_v55, 0.0  ;;  %v387_v10 = vmul.f32 %v1091_v0, %v863_v9  ;;  %v965_v46 = vld [vmem:[%s1085_s22 + $0x50] sm:$0xff]  }
  0x1f   : > { %v514_v1 = vmax.f32 %v450_v60, 0.0  ;;  %v518_v6 = vmax.f32 %v454_v4, 0.0  ;;  %v515_v13 = vmax.f32 %v451_v7, 0.0  ;;  %v384_v14 = vmul.f32 %v1091_v0, %v858_v8 }
  0x20   : > { %567 = vxpose.xlu0.b32.cont [2/16] (narrow) %v503_v12, 32  ;;  %v894_v12 = vunpack.c.l.bf16 %v971_v11  ;;  %v455_v15 = vadd.f32 %v1094_v3, %v387_v10  ;;  %v866_v22 = vunpack.c.l.bf16 %v964_v19  ;;  %v867_v35 = vunpack.c.h.bf16 %v964_v19 }
  0x21   : > { %598 = vxpose.xlu1.b32.start [1/16] (narrow) %v518_v6, 32  ;;  %v452_v20 = vadd.f32 %v1094_v3, %v384_v14  ;;  %v927_v47 = vunpack.c.h.bf16 %v979_v29  ;;  %v870_v49 = vunpack.c.l.bf16 %v965_v46  ;;  %v930_v61 = vunpack.c.l.bf16 %v980_v56 }
  0x22   : > { %v519_v17 = vmax.f32 %v455_v15, 0.0  ;;  %v388_v24 = vmul.f32 %v1091_v0, %v866_v22  ;;  %v389_v37 = vmul.f32 %v1091_v0, %v867_v35  ;;  %v871_v62 = vunpack.c.h.bf16 %v965_v46 }
  0x23   : > { %v516_v26 = vmax.f32 %v452_v20, 0.0  ;;  %v390_v51 = vmul.f32 %v1091_v0, %v870_v49  ;;  %v419_v54 = vmul.f32 %v1091_v0, %v927_v47  ;;  %v902_v4 = vunpack.c.l.bf16 %v973_v2 }
  0x24   : > { %v456_v28 = vadd.f32 %v1094_v3, %v388_v24  ;;  %v457_v42 = vadd.f32 %v1094_v3, %v389_v37  ;;  %v420_v6 = vmul.f32 %v1091_v0, %v930_v61 }
  0x25   : > { %v458_v55 = vadd.f32 %v1094_v3, %v390_v51  ;;  %v487_v60 = vadd.f32 %v1094_v3, %v419_v54  ;;  %v406_v8 = vmul.f32 %v1091_v0, %v902_v4 }
  0x26   : > { %v520_v31 = vmax.f32 %v456_v28, 0.0  ;;  %v521_v44 = vmax.f32 %v457_v42, 0.0 }
  0x27   : > { %v522_v58 = vmax.f32 %v458_v55, 0.0  ;;  %v474_v10 = vadd.f32 %v1094_v3, %v406_v8 }
  0x28   : > { %568 = vxpose.xlu0.b32.cont [3/16] (narrow) %v504_v16, 32  ;;  %v402_v16 = vmul.f32 %v1091_v0, %v894_v12  ;;  %v488_v12 = vadd.f32 %v1094_v3, %v420_v6 }
  0x29   : > { %599 = vxpose.xlu1.b32.cont [2/16] (narrow) %v519_v17, 32  ;;  %v538_v15 = vmax.f32 %v474_v10, 0.0  ;;  %v903_v17 = vunpack.c.h.bf16 %v973_v2  ;;  %v968_v2 = vld [vmem:[%s1085_s22 + $0x68] sm:$0xff]  }
  0x2a   : > { %v470_v18 = vadd.f32 %v1094_v3, %v402_v16  ;;  %v882_v6 = vunpack.c.l.bf16 %v968_v2 }
  0x2b   : > { %v407_v22 = vmul.f32 %v1091_v0, %v903_v17 }
  0x2c   : > { %v534_v23 = vmax.f32 %v470_v18, 0.0  ;;  %v552_v18 = vmax.f32 %v488_v12, 0.0  ;;  %v396_v8 = vmul.f32 %v1091_v0, %v882_v6 }
  0x2d   : > { %v475_v24 = vadd.f32 %v1094_v3, %v407_v22  ;;  %v976_v22 = vld [vmem:[%s1085_s22 + $0xa8] sm:$0xff]  }
  0x2e   : > { %630 = vxpose.xlu2.b32.start [1/16] (narrow) %v534_v23, 32  ;;  %v464_v12 = vadd.f32 %v1094_v3, %v396_v8 }
  0x2f   : > { %v539_v28 = vmax.f32 %v475_v24, 0.0 }
  0x30   : > { %569 = vxpose.xlu0.b32.cont [4/16] (narrow) %v505_v21, 32  ;;  %v859_v21 = vunpack.c.h.bf16 %v962_v5  ;;  %v551_v5 = vmax.f32 %v487_v60, 0.0 }
  0x31   : > { %600 = vxpose.xlu1.b32.cont [3/16] (narrow) %v520_v31, 32 }
  0x32   : > { %v385_v27 = vmul.f32 %v1091_v0, %v859_v21  ;;  %v981_v21 = vld [vmem:[%s1085_s22 + $0xd0] sm:$0xff]  }
  0x34   : > { %v453_v33 = vadd.f32 %v1094_v3, %v385_v27 }
  0x36   : > { %v517_v40 = vmax.f32 %v453_v33, 0.0 }
  0x38   : > { %570 = vxpose.xlu0.b32.cont [5/16] (narrow) %v506_v25, 32  ;;  %v895_v25 = vunpack.c.h.bf16 %v971_v11  ;;  %v966_v11 = vld [vmem:[%s1085_s22 + $0x58] sm:$0xff]  }
  0x39   : > { %601 = vxpose.xlu1.b32.cont [4/16] (narrow) %v521_v44, 32  ;;  %v874_v14 = vunpack.c.l.bf16 %v966_v11  ;;  %v875_v27 = vunpack.c.h.bf16 %v966_v11 }
  0x3b   : > { %v392_v16 = vmul.f32 %v1091_v0, %v874_v14 }
  0x3d   : > { %v460_v20 = vadd.f32 %v1094_v3, %v392_v16 }
  0x3f   : > { %v524_v23 = vmax.f32 %v460_v20, 0.0 }
  0x40   : > { %571 = vxpose.xlu0.b32.cont [6/16] (narrow) %v507_v30, 32  ;;  %v403_v30 = vmul.f32 %v1091_v0, %v895_v25 }
  0x41   : > { %602 = vxpose.xlu1.b32.cont [5/16] (narrow) %v522_v58, 32 }
  0x42   : > { %v471_v32 = vadd.f32 %v1094_v3, %v403_v30  ;;  %v974_v30 = vld [vmem:[%s1085_s22 + $0x98] sm:$0xff]  }
  0x43   : > { %v906_v31 = vunpack.c.l.bf16 %v974_v30  ;;  %v907_v44 = vunpack.c.h.bf16 %v974_v30  ;;  %v969_v30 = vld [vmem:[%s1085_s22 + $0x70] sm:$0xff]  }
  0x44   : > { %v535_v36 = vmax.f32 %v471_v32, 0.0 }
  0x45   : > { %v408_v35 = vmul.f32 %v1091_v0, %v906_v31  ;;  %v409_v49 = vmul.f32 %v1091_v0, %v907_v44 }
  0x46   : > { %631 = vxpose.xlu2.b32.cont [2/16] (narrow) %v535_v36, 32 }
  0x47   : > { %v476_v37 = vadd.f32 %v1094_v3, %v408_v35  ;;  %v477_v51 = vadd.f32 %v1094_v3, %v409_v49  ;;  %v977_v49 = vld [vmem:[%s1085_s22 + $0xb0] sm:$0xff]  }
  0x48   : > { %572 = vxpose.xlu0.b32.cont [7/16] (narrow) %v508_v34, 32  ;;  %v926_v34 = vunpack.c.l.bf16 %v979_v29  ;;  %v393_v29 = vmul.f32 %v1091_v0, %v875_v27 }
  0x49   : > { %v540_v42 = vmax.f32 %v476_v37, 0.0  ;;  %v541_v55 = vmax.f32 %v477_v51, 0.0 }
  0x4a   : > { %v418_v41 = vmul.f32 %v1091_v0, %v926_v34  ;;  %v461_v34 = vadd.f32 %v1094_v3, %v393_v29 }
  0x4c   : > { %v525_v36 = vmax.f32 %v461_v34, 0.0 }
  0x50   : > { %573 = vxpose.xlu0.b32.cont [8/16] (narrow) %v509_v39, 32  ;;  %v898_v39 = vunpack.c.l.bf16 %v972_v38 }
  0x58   : > { %574 = vxpose.xlu0.b32.cont [9/16] (narrow) %v510_v43, 32  ;;  %v404_v43 = vmul.f32 %v1091_v0, %v898_v39 }
  0x5a   : > { %v472_v45 = vadd.f32 %v1094_v3, %v404_v43 }
  0x5c   : > { %v536_v50 = vmax.f32 %v472_v45, 0.0 }
  0x5e   : > { %632 = vxpose.xlu2.b32.cont [3/16] (narrow) %v536_v50, 32 }
  0x60   : > { %575 = vxpose.xlu0.b32.cont [10/16] (narrow) %v511_v48, 32  ;;  %v486_v48 = vadd.f32 %v1094_v3, %v418_v41 }
  0x62   : > { %v550_v53 = vmax.f32 %v486_v48, 0.0  ;;  %v982_v48 = vld [vmem:[%s1085_s22 + $0xd8] sm:$0xff]  }
  0x68   : > { %576 = vxpose.xlu0.b32.cont [11/16] (narrow) %v512_v52, 32  ;;  %v899_v52 = vunpack.c.h.bf16 %v972_v38  ;;  %v967_v38 = vld [vmem:[%s1085_s22 + $0x60] sm:$0xff]  }
  0x69   : > { %v878_v41 = vunpack.c.l.bf16 %v967_v38  ;;  %v879_v54 = vunpack.c.h.bf16 %v967_v38 }
  0x6b   : > { %v394_v43 = vmul.f32 %v1091_v0, %v878_v41 }
  0x6d   : > { %v462_v47 = vadd.f32 %v1094_v3, %v394_v43 }
  0x6f   : > { %v526_v50 = vmax.f32 %v462_v47, 0.0 }
  0x70   : > { %577 = vxpose.xlu0.b32.cont [12/16] (narrow) %v513_v57, 32  ;;  %v405_v57 = vmul.f32 %v1091_v0, %v899_v52 }
  0x72   : > { %v473_v59 = vadd.f32 %v1094_v3, %v405_v57  ;;  %v975_v57 = vld [vmem:[%s1085_s22 + $0xa0] sm:$0xff]  }
  0x73   : > { %v910_v58 = vunpack.c.l.bf16 %v975_v57 }
  0x74   : > { %v537_v63 = vmax.f32 %v473_v59, 0.0 }
  0x76   : > { %633 = vxpose.xlu2.b32.cont [4/16] (narrow) %v537_v63, 32 }
  0x78   : > { %578 = vxpose.xlu0.b32.cont [13/16] (narrow) %v514_v1, 32  ;;  %v391_v1 = vmul.f32 %v1091_v0, %v871_v62  ;;  %v410_v62 = vmul.f32 %v1091_v0, %v910_v58 }
  0x7a   : > { %v459_v7 = vadd.f32 %v1094_v3, %v391_v1  ;;  %v478_v1 = vadd.f32 %v1094_v3, %v410_v62 }
  0x7c   : > { %v523_v9 = vmax.f32 %v459_v7, 0.0  ;;  %v542_v7 = vmax.f32 %v478_v1, 0.0 }
  0x7e   : > { %603 = vxpose.xlu1.b32.cont [6/16] (narrow) %v523_v9, 32  ;;  %634 = vxpose.xlu2.b32.cont [5/16] (narrow) %v538_v15, 32  ;;  %v911_v9 = vunpack.c.h.bf16 %v975_v57  ;;  %v528_v15 = vmax.f32 %v464_v12, 0.0  ;;  %v970_v57 = vld [vmem:[%s1085_s22 + $0x78] sm:$0xff]  }
  0x80   : > { %579 = vxpose.xlu0.b32.cont [14/16] (narrow) %v515_v13, 32  ;;  %v931_v13 = vunpack.c.h.bf16 %v980_v56  ;;  %v395_v56 = vmul.f32 %v1091_v0, %v879_v54  ;;  %v411_v14 = vmul.f32 %v1091_v0, %v911_v9 }
  0x82   : > { %v421_v19 = vmul.f32 %v1091_v0, %v931_v13  ;;  %v463_v61 = vadd.f32 %v1094_v3, %v395_v56  ;;  %v983_v13 = vld [vmem:[%s1085_s22 + $0xe0] sm:$0xff]   ;;  %v479_v16 = vadd.f32 %v1094_v3, %v411_v14  ;;  %v978_v14 = vld [vmem:[%s1085_s22 + $0xb8] sm:$0xff]  }
  0x84   : > { %v489_v25 = vadd.f32 %v1094_v3, %v421_v19  ;;  %v527_v63 = vmax.f32 %v463_v61, 0.0  ;;  %v883_v19 = vunpack.c.h.bf16 %v968_v2  ;;  %v543_v20 = vmax.f32 %v479_v16, 0.0 }
  0x86   : > { %604 = vxpose.xlu1.b32.cont [7/16] (narrow) %v524_v23, 32  ;;  %635 = vxpose.xlu2.b32.cont [6/16] (narrow) %v539_v28, 32  ;;  %v553_v32 = vmax.f32 %v489_v25, 0.0  ;;  %v914_v23 = vunpack.c.l.bf16 %v976_v22 }
  0x88   : > { %580 = vxpose.xlu0.b32.cont [15/16] (narrow) %v516_v26, 32  ;;  %v934_v26 = vunpack.c.l.bf16 %v981_v21  ;;  %v412_v27 = vmul.f32 %v1091_v0, %v914_v23 }
  0x8a   : > { %v422_v33 = vmul.f32 %v1091_v0, %v934_v26  ;;  %v480_v29 = vadd.f32 %v1094_v3, %v412_v27 }
  0x8c   : > { %v490_v39 = vadd.f32 %v1094_v3, %v422_v33  ;;  %v886_v33 = vunpack.c.l.bf16 %v969_v30  ;;  %v544_v34 = vmax.f32 %v480_v29, 0.0 }
  0x8e   : > { %605 = vxpose.xlu1.b32.cont [8/16] (narrow) %v525_v36, 32  ;;  %636 = vxpose.xlu2.b32.cont [7/16] (narrow) %v540_v42, 32  ;;  %v554_v45 = vmax.f32 %v490_v39, 0.0  ;;  %v398_v35 = vmul.f32 %v1091_v0, %v886_v33  ;;  %v915_v36 = vunpack.c.h.bf16 %v976_v22 }
  0x90   : > { %581 = vxpose.xlu0.b32.end [16/16] (narrow) %v517_v40, 32  ;;  %v935_v40 = vunpack.c.h.bf16 %v981_v21  ;;  %v397_v21 = vmul.f32 %v1091_v0, %v883_v19  ;;  %v466_v39 = vadd.f32 %v1094_v3, %v398_v35  ;;  %v413_v41 = vmul.f32 %v1091_v0, %v915_v36 }
  0x92   : > { %v423_v46 = vmul.f32 %v1091_v0, %v935_v40  ;;  %v465_v26 = vadd.f32 %v1094_v3, %v397_v21  ;;  %v984_v40 = vld [vmem:[%s1085_s22 + $0xe8] sm:$0xff]   ;;  %v530_v42 = vmax.f32 %v466_v39, 0.0  ;;  %v481_v43 = vadd.f32 %v1094_v3, %v413_v41 }
  0x94   : > { %v491_v52 = vadd.f32 %v1094_v3, %v423_v46  ;;  %v529_v28 = vmax.f32 %v465_v26, 0.0  ;;  %v887_v46 = vunpack.c.h.bf16 %v969_v30  ;;  %v545_v47 = vmax.f32 %v481_v43, 0.0 }
  0x96   : > { %606 = vxpose.xlu1.b32.cont [9/16] (narrow) %v526_v50, 32  ;;  %637 = vxpose.xlu2.b32.cont [8/16] (narrow) %v541_v55, 32  ;;  %v555_v59 = vmax.f32 %v491_v52, 0.0  ;;  %v918_v50 = vunpack.c.l.bf16 %v977_v49 }
  0x98   : > { %662 = vxpose.xlu0.b32.start [1/16] (narrow) %v550_v53, 32  ;;  %v938_v53 = vunpack.c.l.bf16 %v982_v48  ;;  %v414_v54 = vmul.f32 %v1091_v0, %v918_v50 }
  0x9a   : > { %v424_v60 = vmul.f32 %v1091_v0, %v938_v53  ;;  %v482_v56 = vadd.f32 %v1094_v3, %v414_v54 }
  0x9c   : > { %v492_v4 = vadd.f32 %v1094_v3, %v424_v60  ;;  %v890_v60 = vunpack.c.l.bf16 %v970_v57  ;;  %v546_v61 = vmax.f32 %v482_v56, 0.0 }
  0x9e   : > { %607 = vxpose.xlu1.b32.cont [10/16] (narrow) %v527_v63, 32  ;;  %638 = vxpose.xlu2.b32.cont [9/16] (narrow) %v542_v7, 32  ;;  %v556_v10 = vmax.f32 %v492_v4, 0.0  ;;  %v400_v62 = vmul.f32 %v1091_v0, %v890_v60  ;;  %v919_v63 = vunpack.c.h.bf16 %v977_v49 }
  0xa0   : > { %663 = vxpose.xlu0.b32.cont [2/16] (narrow) %v551_v5, 32  ;;  %v939_v5 = vunpack.c.h.bf16 %v982_v48  ;;  %v399_v48 = vmul.f32 %v1091_v0, %v887_v46  ;;  %v468_v4 = vadd.f32 %v1094_v3, %v400_v62  ;;  %v415_v6 = vmul.f32 %v1091_v0, %v919_v63 }
  0xa2   : > { %v425_v11 = vmul.f32 %v1091_v0, %v939_v5  ;;  %v467_v53 = vadd.f32 %v1094_v3, %v399_v48  ;;  %v985_v5 = vld [vmem:[%s1085_s22 + $0xf0] sm:$0xff]   ;;  %v532_v7 = vmax.f32 %v468_v4, 0.0  ;;  %v483_v8 = vadd.f32 %v1094_v3, %v415_v6 }
  0xa3   : > { %v951_v23 = vunpack.c.h.bf16 %v985_v5 }
  0xa4   : > { %v493_v17 = vadd.f32 %v1094_v3, %v425_v11  ;;  %v531_v55 = vmax.f32 %v467_v53, 0.0  ;;  %v891_v11 = vunpack.c.h.bf16 %v970_v57  ;;  %v547_v12 = vmax.f32 %v483_v8, 0.0 }
  0xa5   : > { %v431_v29 = vmul.f32 %v1091_v0, %v951_v23 }
  0xa6   : > { %608 = vxpose.xlu1.b32.cont [11/16] (narrow) %v528_v15, 32  ;;  %639 = vxpose.xlu2.b32.cont [10/16] (narrow) %v543_v20, 32  ;;  %v557_v24 = vmax.f32 %v493_v17, 0.0  ;;  %v922_v15 = vunpack.c.l.bf16 %v978_v14 }
  0xa7   : > { %v499_v33 = vadd.f32 %v1094_v3, %v431_v29 }
  0xa8   : > { %664 = vxpose.xlu0.b32.cont [3/16] (narrow) %v552_v18, 32  ;;  %v942_v18 = vunpack.c.l.bf16 %v983_v13  ;;  %v416_v19 = vmul.f32 %v1091_v0, %v922_v15 }
  0xa9   : > { %v563_v36 = vmax.f32 %v499_v33, 0.0 }
  0xaa   : > { %v426_v25 = vmul.f32 %v1091_v0, %v942_v18  ;;  %v484_v21 = vadd.f32 %v1094_v3, %v416_v19 }
  0xac   : > { %v494_v31 = vadd.f32 %v1094_v3, %v426_v25  ;;  %v548_v26 = vmax.f32 %v484_v21, 0.0 }
  0xae   : > { %609 = vxpose.xlu1.b32.cont [12/16] (narrow) %v529_v28, 32  ;;  %640 = vxpose.xlu2.b32.cont [11/16] (narrow) %v544_v34, 32  ;;  %v558_v37 = vmax.f32 %v494_v31, 0.0  ;;  %v986_v31 = vld [vmem:[%s1085_s22 + $0xf8] sm:$0xff]  }
  0xaf   : > { %v954_v34 = vunpack.c.l.bf16 %v986_v31  ;;  %v955_v39 = vunpack.c.h.bf16 %v986_v31 }
  0xb0   : > { %665 = vxpose.xlu0.b32.cont [4/16] (narrow) %v553_v32, 32  ;;  %v943_v32 = vunpack.c.h.bf16 %v983_v13  ;;  %v401_v13 = vmul.f32 %v1091_v0, %v891_v11 }
  0xb2   : > { %v427_v38 = vmul.f32 %v1091_v0, %v943_v32  ;;  %v469_v18 = vadd.f32 %v1094_v3, %v401_v13 }
  0xb4   : > { %v495_v44 = vadd.f32 %v1094_v3, %v427_v38  ;;  %v533_v20 = vmax.f32 %v469_v18, 0.0 }
  0xb6   : > { %610 = vxpose.xlu1.b32.cont [13/16] (narrow) %v530_v42, 32  ;;  %641 = vxpose.xlu2.b32.cont [12/16] (narrow) %v545_v47, 32  ;;  %v559_v51 = vmax.f32 %v495_v44, 0.0  ;;  %v433_v42 = vmul.f32 %v1091_v0, %v955_v39 }
  0xb8   : > { %666 = vxpose.xlu0.b32.cont [5/16] (narrow) %v554_v45, 32  ;;  %v946_v45 = vunpack.c.l.bf16 %v984_v40  ;;  %v501_v43 = vadd.f32 %v1094_v3, %v433_v42 }
  0xba   : > { %v428_v52 = vmul.f32 %v1091_v0, %v946_v45  ;;  %v565_v45 = vmax.f32 %v501_v43, 0.0 }
  0xbc   : > { %v496_v58 = vadd.f32 %v1094_v3, %v428_v52  ;;  %v582_v25 = vpop.trf.xlu0 }
  0xbd   : > { %694 = vst [vmem:[%s1248_s29] sm:$0xff] %v582_v25 }
  0xbe   : > { %611 = vxpose.xlu1.b32.cont [14/16] (narrow) %v531_v55, 32  ;;  %642 = vxpose.xlu2.b32.cont [13/16] (narrow) %v546_v61, 32  ;;  %v560_v1 = vmax.f32 %v496_v58, 0.0 }
  0xc0   : > { %667 = vxpose.xlu0.b32.cont [6/16] (narrow) %v555_v59, 32  ;;  %v947_v59 = vunpack.c.h.bf16 %v984_v40 }
  0xc2   : > { %v429_v2 = vmul.f32 %v1091_v0, %v947_v59 }
  0xc4   : > { %v497_v9 = vadd.f32 %v1094_v3, %v429_v2  ;;  %v583_v35 = vpop.trf.xlu0 }
  0xc5   : > { %698 = vst [vmem:[%s1248_s29 + $0x20] sm:$0xff] %v583_v35 }
  0xc6   : > { %612 = vxpose.xlu1.b32.cont [15/16] (narrow) %v532_v7, 32  ;;  %643 = vxpose.xlu2.b32.cont [14/16] (narrow) %v547_v12, 32  ;;  %v561_v16 = vmax.f32 %v497_v9, 0.0 }
  0xc8   : > { %668 = vxpose.xlu0.b32.cont [7/16] (narrow) %v556_v10, 32  ;;  %v950_v10 = vunpack.c.l.bf16 %v985_v5 }
  0xca   : > { %v430_v17 = vmul.f32 %v1091_v0, %v950_v10 }
  0xcc   : > { %v498_v22 = vadd.f32 %v1094_v3, %v430_v17  ;;  %v584_v40 = vpop.trf.xlu0 }
  0xcd   : > { %702 = vst [vmem:[%s1248_s29 + $0x40] sm:$0xff] %v584_v40 }
  0xce   : > { %613 = vxpose.xlu1.b32.end [16/16] (narrow) %v533_v20, 32  ;;  %644 = vxpose.xlu2.b32.cont [15/16] (narrow) %v548_v26, 32  ;;  %v562_v28 = vmax.f32 %v498_v22, 0.0 }
  0xd0   : > { %669 = vxpose.xlu0.b32.cont [8/16] (narrow) %v557_v24, 32  ;;  %v923_v24 = vunpack.c.h.bf16 %v978_v14 }
  0xd2   : > { %v417_v27 = vmul.f32 %v1091_v0, %v923_v24 }
  0xd4   : > { %v485_v30 = vadd.f32 %v1094_v3, %v417_v27  ;;  %v585_v44 = vpop.trf.xlu0 }
  0xd5   : > { %706 = vst [vmem:[%s1248_s29 + $0x60] sm:$0xff] %v585_v44 }
  0xd6   : > { %v549_v32 = vmax.f32 %v485_v30, 0.0 }
  0xd8   : > { %670 = vxpose.xlu0.b32.cont [9/16] (narrow) %v558_v37, 32  ;;  %645 = vxpose.xlu2.b32.end [16/16] (narrow) %v549_v32, 32  ;;  %v432_v37 = vmul.f32 %v1091_v0, %v954_v34 }
  0xda   : > { %v500_v38 = vadd.f32 %v1094_v3, %v432_v37 }
  0xdc   : > { %v564_v41 = vmax.f32 %v500_v38, 0.0 }
  0xe0   : > { %671 = vxpose.xlu0.b32.cont [10/16] (narrow) %v559_v51, 32 }
  0xe8   : > { %672 = vxpose.xlu0.b32.cont [11/16] (narrow) %v560_v1, 32 }
  0xf0   : > { %673 = vxpose.xlu0.b32.cont [12/16] (narrow) %v561_v16, 32 }
  0xf8   : > { %674 = vxpose.xlu0.b32.cont [13/16] (narrow) %v562_v28, 32 }
  0xf9   : > { %v646_v46 = vpop.trf.xlu2 }
  0xfa   : > { %v614_v47 = vpop.trf.xlu1  ;;  %696 = vst [vmem:[%s1248_s29 + $0x10] sm:$0xff] %v646_v46 }
  0xfb   : > { %695 = vst [vmem:[%s1248_s29 + $0x8] sm:$0xff] %v614_v47 }
 0x100   : > { %675 = vxpose.xlu0.b32.cont [14/16] (narrow) %v563_v36, 32 }
 0x101   : > { %v647_v48 = vpop.trf.xlu2 }
 0x102   : > { %v615_v49 = vpop.trf.xlu1  ;;  %700 = vst [vmem:[%s1248_s29 + $0x30] sm:$0xff] %v647_v48 }
 0x103   : > { %699 = vst [vmem:[%s1248_s29 + $0x28] sm:$0xff] %v615_v49 }
 0x108   : > { %676 = vxpose.xlu0.b32.cont [15/16] (narrow) %v564_v41, 32 }
 0x109   : > { %v648_v0 = vpop.trf.xlu2 }
 0x10a   : > { %v616_v3 = vpop.trf.xlu1  ;;  %704 = vst [vmem:[%s1248_s29 + $0x50] sm:$0xff] %v648_v0 }
 0x10b   : > { %703 = vst [vmem:[%s1248_s29 + $0x48] sm:$0xff] %v616_v3 }
 0x110   : > { %677 = vxpose.xlu0.b32.end [16/16] (narrow) %v565_v45, 32 }
 0x111   : > { %v649_v50 = vpop.trf.xlu2 }
 0x112   : > { %v617_v51 = vpop.trf.xlu1  ;;  %708 = vst [vmem:[%s1248_s29 + $0x70] sm:$0xff] %v649_v50 }
 0x113   : > { %707 = vst [vmem:[%s1248_s29 + $0x68] sm:$0xff] %v617_v51 }
 0x13c   : > { %v678_v52 = vpop.trf.xlu0 }
 0x13d   : > { %697 = vst [vmem:[%s1248_s29 + $0x18] sm:$0xff] %v678_v52 }
 0x144   : > { %v679_v53 = vpop.trf.xlu0 }
 0x145   : > { %701 = vst [vmem:[%s1248_s29 + $0x38] sm:$0xff] %v679_v53 }
 0x14c   : > { %v680_v54 = vpop.trf.xlu0 }
 0x14d   : > { %705 = vst [vmem:[%s1248_s29 + $0x58] sm:$0xff] %v680_v54 }
 0x154   : > { %v681_v55 = vpop.trf.xlu0 }
 0x155   : > { %709 = vst [vmem:[%s1248_s29 + $0x78] sm:$0xff] %v681_v55 }
 0x156 PF: > { %s13_s14 = sadd.s32 1, %s1035_s14   ;;  %s1290_s12 = smov %s1031_s13 }
 0x157   : > { %p10_p5 = scmp.ge.s32.totalorder %s13_s14, 4   ;;  %s1291_s13 = smov %s1293_s15 }
 0x159   :  { %12 = sbr.rel (!%p10_p5) target bundleno = 2 (0x2), region = 68 }

// kernel: stem_forward.4
= control target key start
LH: loop header
LB: loop body
LE: loop exit
PB: predicated region body
PF: predicated region fallthrough
CT: control target
= control target key end

     0   :  { %s3613_s21 = smov 0   ;;  %s3615_s22 = smov 0   ;;  %s4474_s0 = inlined_call_operand.vmem [shape: bf16[2,512,324], index: 0, kind: input, shape index: {}]   ;;  %s4475_s1 = inlined_call_operand.vmem [shape: bf16[324,128], index: 1, kind: input, shape index: {}]   ;;  %s4476_s2 = inlined_call_operand.vmem [shape: bf16[2,512,128], index: 2, kind: input, shape index: {}, may-alias: {2,4}]   ;;  %s4477_s3 = inlined_call_operand.vmem [shape: f32[1,1,128], index: 3, kind: input, shape index: {}]   ;;  %s4478_s4 = inlined_call_operand.vmem [shape: bf16[2,512,128], index: 4, kind: output, shape index: {0}, may-alias: {2,4}]   ;;  %s4479_s5 = inlined_call_operand.vmem [shape: f32[1,2,1,128], index: 5, kind: output, shape index: {1}]   ;;  %s4480_s6 = inlined_call_operand.vmem [shape: f32[1,2,1,128], index: 6, kind: output, shape index: {2}]  }
   0x1   :  { %s3617_s23 = smov 0  }
   0x2 LB: > { %s29_s24 = sadd.s32 1, %s3572_s22  ;;  %p2534_p0 = scmp.ge.s32.totalorder %s3576_s23, 1  ;;  %s3576_s23 = sphi %s3617_s23, %s17_s23   ;;  %s3572_s22 = sphi %s3615_s22, %s4503_s22   ;;  %s3568_s21 = sphi %s3613_s21, %s4502_s21  }
   0x3   : > { %p31_p1 = scmp.ge.s32.totalorder %s29_s24, 2  ;;  %p260_p2 = scmp.lt.s32.totalorder %s3576_s23, 3 }
   0x5   : > { %s4505_s24 = smov (%p31_p1, %s29_s24), 0  ;;  %p261_p3 = pnand %p2534_p0, %p260_p2 }
   0x7   : > { %264 = sbr.rel (%p261_p3) target bundleno = 610 (0x262), region = 36 }
   0xc   : > { %v3143_v0 = vld [vmem:[%s4475_s1 + $0x38] sm:$0xff]  ;;  %v536_v2 = vld [vmem:[%s4475_s1 + $0xa0] sm:$0x3]  ;;  %vm1237_vm0 = vcmask 1041408   ;;  %v3142_v4 = vld [vmem:[%s4475_s1 + $0x30] sm:$0xff]  ;;  %p323_p4 = scmp.lt.s32.totalorder %s3568_s21, 1 }
   0xd   : > { %v3639_v1 = vld [vmem:[%s4475_s1 + $0x78] sm:$0xff]  ;;  %v1098_v3 = vunpack.c.l.b16 %v536_v2  ;;  %1241 = vmatpush.bf16.msra.mxu0 %v3143_v0  ;;  %3506 = vmatpush.bf16.msra.mxu3 %v3143_v0  ;;  %v3651_v6 = vld [vmem:[%s4475_s1 + $0x70] sm:$0xff]  ;;  %v3141_v9 = vld [vmem:[%s4475_s1 + $0x28] sm:$0xff]  ;;  %vm1140_vm1 = vcmask 556032  }
   0xe   : > { %1410 = vmatpush.bf16.msra.mxu1 %v3639_v1  ;;  %v3660_v8 = vld [vmem:[%s4475_s1 + $0x98] sm:$0xff]  ;;  %v3149_v10 = vld [vmem:[%s4475_s1 + $0x68] sm:$0xff]  ;;  %s4507_s21 = smov (!%p323_p4, %s3568_s21), 1  ;;  %v3676_v11 = vld [vmem:[%s4475_s1 + $0x90] sm:$0xff] }
   0xf   : > { %v1119_v5 = vpack.c.b16 %v1098_v3, %v1098_v3  ;;  %v3140_v12 = vld [vmem:[%s4475_s1 + $0x20] sm:$0xff]  ;;  %s3527_s27 = smul.u32 768, %s4507_s21  ;;  %v3689_v14 = vld [vmem:[%s4475_s1 + $0x88] sm:$0xff]  ;;  %v3139_v15 = vld [vmem:[%s4475_s1 + $0x18] sm:$0xff]  ;;  %s3038_s7 = sshll.u32 %s4507_s21, 8 }
  0x10   : > { %v3148_v13 = vld [vmem:[%s4475_s1 + $0x60] sm:$0xff]  ;;  %v3147_v16 = vld [vmem:[%s4475_s1 + $0x58] sm:$0xff]  ;;  %v3138_v18 = vld [vmem:[%s4475_s1 + $0x10] sm:$0xff]  ;;  %s3821_s10 = scalar_lea.vmem %s4476_s2, %s3038_s7  ;;  %s3934_s16 = scalar_lea.vmem %s4478_s4, %s3038_s7 }
  0x11   : > { %v3654_v7 = vsel %vm1237_vm0, %v1119_v5, 0  ;;  %1242 = vmatpush.bf16.msra.mxu0 %v3142_v4  ;;  %3507 = vmatpush.bf16.msra.mxu3 %v3142_v4  ;;  %s3700_s12 = scalar_lea.vmem %s4474_s0, %s3527_s27  ;;  %v3705_v17 = vld [vmem:[%s4475_s1 + $0x80] sm:$0xff]  ;;  %v3146_v21 = vld [vmem:[%s4475_s1 + $0x50] sm:$0xff]  ;;  %v3137_v23 = vld [vmem:[%s4475_s1 + $0x8] sm:$0xff]  ;;  %s359_s20 = scalar_lea.vmem %s4479_s5, %s4507_s21 }
  0x12   : > { %1582 = vmatpush.bf16.msra.mxu2 %v3654_v7  ;;  %1411 = vmatpush.bf16.msra.mxu1 %v3651_v6  ;;  %v2550_v19 = vld [vmem:[%s3700_s12 + $0x8] sm:$0xf]  ;;  %v3042_v20 = vld [vmem:[%s3700_s12 + $0x10] sm:$0xf0]  ;;  %v3136_v25 = vld [vmem:[%s4475_s1] sm:$0xff]  ;;  %s366_s27 = scalar_lea.vmem %s4480_s6, %s4507_s21 }
  0x13   : > { %v2551_v22 = vor.u32 %v3042_v20, %v2550_v19  ;;  %v3145_v24 = vld [vmem:[%s4475_s1 + $0x48] sm:$0xff]  ;;  %v3144_v26 = vld [vmem:[%s4475_s1 + $0x40] sm:$0xff]  ;;  %v2544_v32 = vld [vmem:[%s3700_s12 + $0xc] sm:$0xf0] }
  0x14   : > { %v2542_v27 = vld [vmem:[%s3700_s12] sm:$0xf]  ;;  %v3041_v28 = vld [vmem:[%s3700_s12 + $0x8] sm:$0xf0]  ;;  %v3040_v31 = vld [vmem:[%s3700_s12 + $0x4] sm:$0xf] }
  0x15   : > { %1243 = vmatpush.bf16.msra.mxu0 %v3141_v9  ;;  %3508 = vmatpush.bf16.msra.mxu3 %v3141_v9  ;;  %v2830_v29 = vld [vmem:[%s3700_s12 + $0x240] sm:$0xf]  ;;  %v3113_v30 = vld [vmem:[%s3700_s12 + $0x248] sm:$0xf0]  ;;  %v2543_v33 = vor.u32 %v3041_v28, %v2542_v27  ;;  %v2547_v35 = vor.u32 %v3040_v31, %v2544_v32  ;;  %v2554_v39 = vld [vmem:[%s3700_s12 + $0x18] sm:$0xf] }
  0x16   : > { %1583 = vmatpush.bf16.msra.mxu2 %v3660_v8  ;;  %1412 = vmatpush.bf16.msra.mxu1 %v3149_v10  ;;  %v2831_v34 = vor.u32 %v3113_v30, %v2830_v29  ;;  %v2562_v36 = vld [vmem:[%s3700_s12 + $0x20] sm:$0xf]  ;;  %v3045_v37 = vld [vmem:[%s3700_s12 + $0x28] sm:$0xf0]  ;;  %v3044_v40 = vld [vmem:[%s3700_s12 + $0x20] sm:$0xf0] }
  0x17   : > { %v2563_v38 = vor.u32 %v3045_v37, %v2562_v36  ;;  %v2842_v41 = vld [vmem:[%s3700_s12 + $0x258] sm:$0xf]  ;;  %v3116_v42 = vld [vmem:[%s3700_s12 + $0x260] sm:$0xf0]  ;;  %v3043_v43 = vld [vmem:[%s3700_s12 + $0x1c] sm:$0xf]  ;;  %v2555_v45 = vor.u32 %v3044_v40, %v2554_v39 }
  0x18   : > { %v2556_v44 = vld [vmem:[%s3700_s12 + $0x24] sm:$0xf0]  ;;  %v2843_v46 = vor.u32 %v3116_v42, %v2842_v41  ;;  %v2574_v48 = vld [vmem:[%s3700_s12 + $0x38] sm:$0xf]  ;;  %v3048_v49 = vld [vmem:[%s3700_s12 + $0x40] sm:$0xf0] }
  0x19   : > { %1244 = vmatpush.bf16.msra.mxu0 %v3140_v12  ;;  %3509 = vmatpush.bf16.msra.mxu3 %v3140_v12  ;;  %v2559_v47 = vor.u32 %v3043_v43, %v2556_v44  ;;  %v2575_v50 = vor.u32 %v3048_v49, %v2574_v48  ;;  %v2566_v51 = vld [vmem:[%s3700_s12 + $0x30] sm:$0xf]  ;;  %v3047_v52 = vld [vmem:[%s3700_s12 + $0x38] sm:$0xf0]  ;;  %v3046_v55 = vld [vmem:[%s3700_s12 + $0x34] sm:$0xf] }
  0x1a   : > { %1584 = vmatpush.bf16.msra.mxu2 %v3676_v11  ;;  %1413 = vmatpush.bf16.msra.mxu1 %v3148_v13  ;;  %v2854_v53 = vld [vmem:[%s3700_s12 + $0x270] sm:$0xf]  ;;  %v3119_v54 = vld [vmem:[%s3700_s12 + $0x278] sm:$0xf0]  ;;  %v2568_v56 = vld [vmem:[%s3700_s12 + $0x3c] sm:$0xf0]  ;;  %v2567_v57 = vor.u32 %v3047_v52, %v2566_v51 }
  0x1b   : > { %v2855_v58 = vor.u32 %v3119_v54, %v2854_v53  ;;  %v2571_v59 = vor.u32 %v3046_v55, %v2568_v56  ;;  %v2586_v60 = vld [vmem:[%s3700_s12 + $0x50] sm:$0xf]  ;;  %v3051_v61 = vld [vmem:[%s3700_s12 + $0x58] sm:$0xf0]  ;;  %v2578_v63 = vld [vmem:[%s3700_s12 + $0x48] sm:$0xf] }
  0x1c   : > { %v2587_v62 = vor.u32 %v3051_v61, %v2586_v60  ;;  %v3050_v0 = vld [vmem:[%s3700_s12 + $0x50] sm:$0xf0]  ;;  %v3049_v3 = vld [vmem:[%s3700_s12 + $0x4c] sm:$0xf]  ;;  %v2580_v4 = vld [vmem:[%s3700_s12 + $0x54] sm:$0xf0] }
  0x1d   : > { %1245 = vmatpush.bf16.msra.mxu0 %v3139_v15  ;;  %3510 = vmatpush.bf16.msra.mxu3 %v3139_v15  ;;  %v3122_v2 = vld [vmem:[%s3700_s12 + $0x290] sm:$0xf0]  ;;  %v2579_v5 = vor.u32 %v3050_v0, %v2578_v63  ;;  %v3053_v12 = vld [vmem:[%s3700_s12 + $0x68] sm:$0xf0]  ;;  %v3052_v15 = vld [vmem:[%s3700_s12 + $0x64] sm:$0xf] }
  0x1e   : > { %1585 = vmatpush.bf16.msra.mxu2 %v3689_v14  ;;  %1414 = vmatpush.bf16.msra.mxu1 %v3147_v16  ;;  %v3054_v9 = vld [vmem:[%s3700_s12 + $0x70] sm:$0xf0]  ;;  %v2610_v20 = vld [vmem:[%s3700_s12 + $0x80] sm:$0xf]  ;;  %v3055_v27 = vld [vmem:[%s3700_s12 + $0x7c] sm:$0xf] }
  0x1f   : > { %v2604_v28 = vld [vmem:[%s3700_s12 + $0x84] sm:$0xf0]  ;;  %v2622_v32 = vld [vmem:[%s3700_s12 + $0x98] sm:$0xf]  ;;  %v3059_v36 = vld [vmem:[%s3700_s12 + $0x98] sm:$0xf0] }
  0x20   : > { %v2607_v31 = vor.u32 %v3055_v27, %v2604_v28  ;;  %v2902_v37 = vld [vmem:[%s3700_s12 + $0x2d0] sm:$0xf]  ;;  %v3058_v39 = vld [vmem:[%s3700_s12 + $0x94] sm:$0xf]  ;;  %v2616_v40 = vld [vmem:[%s3700_s12 + $0x9c] sm:$0xf0] }
  0x21   : > { %1246 = vmatpush.bf16.msra.mxu0 %v3138_v18  ;;  %3511 = vmatpush.bf16.msra.mxu3 %v3138_v18  ;;  %v2619_v43 = vor.u32 %v3058_v39, %v2616_v40  ;;  %v2634_v44 = vld [vmem:[%s3700_s12 + $0xb0] sm:$0xf]  ;;  %v3062_v48 = vld [vmem:[%s3700_s12 + $0xb0] sm:$0xf0]  ;;  %v2914_v49 = vld [vmem:[%s3700_s12 + $0x2e8] sm:$0xf] }
  0x22   : > { %1586 = vmatpush.bf16.msra.mxu2 %v3705_v17  ;;  %1415 = vmatpush.bf16.msra.mxu1 %v3146_v21  ;;  %v3061_v51 = vld [vmem:[%s3700_s12 + $0xac] sm:$0xf]  ;;  %v2628_v52 = vld [vmem:[%s3700_s12 + $0xb4] sm:$0xf0]  ;;  %v2646_v56 = vld [vmem:[%s3700_s12 + $0xc8] sm:$0xf] }
  0x23   : > { %v2631_v55 = vor.u32 %v3061_v51, %v2628_v52  ;;  %v3065_v60 = vld [vmem:[%s3700_s12 + $0xc8] sm:$0xf0]  ;;  %v3064_v61 = vld [vmem:[%s3700_s12 + $0xc4] sm:$0xf]  ;;  %v2832_v0 = vld [vmem:[%s3700_s12 + $0x24c] sm:$0xf0] }
  0x24   : > { %v3112_v63 = vld [vmem:[%s3700_s12 + $0x244] sm:$0xf]  ;;  %v3867_v39 = vld [vmem:[%s3821_s10 + $0x48] sm:$0xff]   ;;  %v3870_v40 = vld [vmem:[%s3821_s10 + $0x50] sm:$0xff]  }
  0x25   : > { %3004 = vmatmul.msk.bf16.vlgmr.msra.gmra.mxu2 %vm1140_vm1, %v2551_v22  ;;  %1247 = vmatpush.bf16.msra.mxu0 %v3137_v23  ;;  %v3903_v51 = vld [vmem:[%s3821_s10 + $0xd8] sm:$0xff]  }
  0x26   : > { %3512 = vmatpush.bf16.msra.mxu3 %v3137_v23  ;;  %1416 = vmatpush.bf16.msra.mxu1 %v3145_v24  ;;  %v2602_v23 = vld [vmem:[%s3700_s12 + $0x78] sm:$0xf] }
  0x27   : > { %v3906_v52 = vld [vmem:[%s3821_s10 + $0x98] sm:$0xff]  }
  0x29   : > { %1248 = vmatpush.bf16.msra.mxu0 %v3136_v25 }
  0x2a   : > { %3513 = vmatpush.bf16.msra.mxu3 %v3136_v25  ;;  %1417 = vmatpush.bf16.msra.mxu1 %v3144_v26  ;;  %v2890_v25 = vld [vmem:[%s3700_s12 + $0x2b8] sm:$0xf] }
  0x2c   : > { %1249 = vmatmul.bf16.vlgmr.msra.gmra.mxu0 %v2543_v33  ;;  %v3060_v33 = vld [vmem:[%s3700_s12 + $0xa0] sm:$0xf0] }
  0x2d   : > { %1369 = vmatmul.bf16.vlgmr.msra.gmra.mxu3 %v2831_v34  ;;  %1418 = vmatmul.bf16.vlgmr.msra.gmra.mxu1 %v2547_v35  ;;  %v2623_v34 = vor.u32 %v3060_v33, %v2622_v32  ;;  %v2614_v35 = vld [vmem:[%s3700_s12 + $0x90] sm:$0xf]  ;;  %v3849_v33 = vld [vmem:[%s3821_s10 + $0x18] sm:$0xff]  }
  0x2e   : > { %3514 = vmatpush.bf16.msrb.mxu3 %v3639_v1  ;;  %v2866_v1 = vld [vmem:[%s3700_s12 + $0x288] sm:$0xf]  ;;  %v2615_v41 = vor.u32 %v3059_v36, %v2614_v35  ;;  %v3846_v32 = vld [vmem:[%s3821_s10 + $0x10] sm:$0xff]  }
  0x2f   : > { %v3855_v35 = vld [vmem:[%s3821_s10 + $0x28] sm:$0xff]   ;;  %v3858_v36 = vld [vmem:[%s3821_s10 + $0x30] sm:$0xff]  }
  0x32   : > { %3515 = vmatpush.bf16.msrb.mxu3 %v3651_v6  ;;  %v2867_v6 = vor.u32 %v3122_v2, %v2866_v1 }
  0x35   : > { %3005 = vmatmul.msk.bf16.gmra.mxu2 %vm1140_vm1, %v2563_v38  ;;  %v3131_v38 = vld [vmem:[%s3700_s12 + $0x2d8] sm:$0xf0] }
  0x36   : > { %3516 = vmatpush.bf16.msrb.mxu3 %v3149_v10  ;;  %v2903_v42 = vor.u32 %v3131_v38, %v2902_v37  ;;  %v3861_v37 = vld [vmem:[%s3821_s10 + $0x38] sm:$0xff]   ;;  %v3864_v38 = vld [vmem:[%s3821_s10 + $0x40] sm:$0xff]  }
  0x3a   : > { %3517 = vmatpush.bf16.msrb.mxu3 %v3148_v13  ;;  %v2878_v13 = vld [vmem:[%s3700_s12 + $0x2a0] sm:$0xf] }
  0x3c   : > { %1254 = vmatmul.bf16.gmra.mxu0 %v2555_v45  ;;  %v3063_v45 = vld [vmem:[%s3700_s12 + $0xb8] sm:$0xf0] }
  0x3d   : > { %1374 = vmatmul.bf16.gmra.mxu3 %v2843_v46  ;;  %1423 = vmatmul.bf16.gmra.mxu1 %v2559_v47  ;;  %v2635_v46 = vor.u32 %v3063_v45, %v2634_v44  ;;  %v2626_v47 = vld [vmem:[%s3700_s12 + $0xa8] sm:$0xf]  ;;  %v3882_v44 = vld [vmem:[%s3821_s10 + $0x70] sm:$0xff]   ;;  %v3885_v45 = vld [vmem:[%s3821_s10 + $0x78] sm:$0xff]  }
  0x3e   : > { %3518 = vmatpush.bf16.msrb.mxu3 %v3147_v16  ;;  %v2592_v16 = vld [vmem:[%s3700_s12 + $0x6c] sm:$0xf0]  ;;  %v2627_v53 = vor.u32 %v3062_v48, %v2626_v47  ;;  %v3891_v47 = vld [vmem:[%s3821_s10 + $0xc8] sm:$0xff]  }
  0x3f   : > { %v2595_v19 = vor.u32 %v3052_v15, %v2592_v16  ;;  %v3894_v48 = vld [vmem:[%s3821_s10 + $0x88] sm:$0xff]  }
  0x42   : > { %3519 = vmatpush.bf16.msrb.mxu3 %v3146_v21  ;;  %v3057_v21 = vld [vmem:[%s3700_s12 + $0x88] sm:$0xf0] }
  0x43   : > { %v2611_v22 = vor.u32 %v3057_v21, %v2610_v20 }
  0x45   : > { %3006 = vmatmul.msk.bf16.gmra.mxu2 %vm1140_vm1, %v2575_v50  ;;  %v3134_v50 = vld [vmem:[%s3700_s12 + $0x2f0] sm:$0xf0] }
  0x46   : > { %3520 = vmatpush.bf16.msrb.mxu3 %v3145_v24  ;;  %v3056_v24 = vld [vmem:[%s3700_s12 + $0x80] sm:$0xf0]  ;;  %v2915_v54 = vor.u32 %v3134_v50, %v2914_v49  ;;  %v3897_v49 = vld [vmem:[%s3821_s10 + $0xd0] sm:$0xff]  }
  0x47   : > { %v2603_v29 = vor.u32 %v3056_v24, %v2602_v23  ;;  %v3836_v23 = vld [vmem:[%s3821_s10 + $0x8] sm:$0xff]   ;;  %v2650_v24 = vld [vmem:[%s3700_s12 + $0xd8] sm:$0xf]  ;;  %v3900_v50 = vld [vmem:[%s3821_s10 + $0x90] sm:$0xff]  }
  0x4a   : > { %3521 = vmatpush.bf16.msrb.mxu3 %v3144_v26  ;;  %v3128_v26 = vld [vmem:[%s3700_s12 + $0x2c0] sm:$0xf0] }
  0x4b   : > { %v2891_v30 = vor.u32 %v3128_v26, %v2890_v25  ;;  %v3068_v25 = vld [vmem:[%s3700_s12 + $0xe0] sm:$0xf0]  ;;  %v3067_v26 = vld [vmem:[%s3700_s12 + $0xdc] sm:$0xf] }
  0x4c   : > { %1259 = vmatmul.bf16.gmra.mxu0 %v2567_v57  ;;  %v3066_v57 = vld [vmem:[%s3700_s12 + $0xd0] sm:$0xf0] }
  0x4d   : > { %1379 = vmatmul.bf16.gmra.mxu3 %v2855_v58  ;;  %1428 = vmatmul.bf16.gmra.mxu1 %v2571_v59  ;;  %v2647_v58 = vor.u32 %v3066_v57, %v2646_v56  ;;  %v2638_v59 = vld [vmem:[%s3700_s12 + $0xc0] sm:$0xf] }
  0x4e   : > { %3522 = vmatpush.bf16.msra.mxu3 %v3654_v7  ;;  %v2583_v7 = vor.u32 %v3049_v3, %v2580_v4  ;;  %v2639_v2 = vor.u32 %v3065_v60, %v2638_v59  ;;  %v3919_v59 = vld [vmem:[%s3821_s10 + $0xa8] sm:$0xff]   ;;  %v3922_v60 = vld [vmem:[%s3821_s10 + $0xf0] sm:$0xff]  }
  0x52   : > { %3523 = vmatpush.bf16.msra.mxu3 %v3660_v8  ;;  %v2598_v8 = vld [vmem:[%s3700_s12 + $0x68] sm:$0xf] }
  0x53   : > { %v2599_v10 = vor.u32 %v3054_v9, %v2598_v8 }
  0x55   : > { %3007 = vmatmul.msk.bf16.gmra.mxu2 %vm1140_vm1, %v2587_v62  ;;  %v2640_v62 = vld [vmem:[%s3700_s12 + $0xcc] sm:$0xf0] }
  0x56   : > { %3524 = vmatpush.bf16.msra.mxu3 %v3676_v11  ;;  %v2590_v11 = vld [vmem:[%s3700_s12 + $0x60] sm:$0xf]  ;;  %v2643_v4 = vor.u32 %v3064_v61, %v2640_v62  ;;  %v3925_v61 = vld [vmem:[%s3821_s10 + $0xb0] sm:$0xff]  }
  0x5a   : > { %3525 = vmatpush.bf16.msra.mxu3 %v3689_v14  ;;  %v3125_v14 = vld [vmem:[%s3700_s12 + $0x2a8] sm:$0xf0] }
  0x5b   : > { %v2879_v18 = vor.u32 %v3125_v14, %v2878_v13 }
  0x5c   : > { %1264 = vmatmul.bf16.gmra.mxu0 %v2579_v5  ;;  %v2835_v5 = vor.u32 %v3112_v63, %v2832_v0  ;;  %v2651_v63 = vor.u32 %v3068_v25, %v2650_v24 }
  0x5d   : > { %1384 = vmatmul.bf16.gmra.mxu3 %v2867_v6  ;;  %1433 = vmatmul.bf16.gmra.mxu1 %v2583_v7  ;;  %v3157_v7 = vld [vmem:[%s3821_s10] sm:$0xff]  }
  0x5e   : > { %3526 = vmatpush.bf16.msra.mxu3 %v3705_v17  ;;  %v2591_v17 = vor.u32 %v3053_v12, %v2590_v11  ;;  %v3158_v9 = vunpack.c.l.bf16 %v3157_v7  ;;  %v2658_v11 = vld [vmem:[%s3700_s12 + $0xe0] sm:$0xf]  ;;  %v3069_v12 = vld [vmem:[%s3700_s12 + $0xe8] sm:$0xf0]  ;;  %v3159_v14 = vunpack.c.h.bf16 %v3157_v7 }
  0x5f   : > { %v2659_v16 = vor.u32 %v3069_v12, %v2658_v11 }
  0x65   : > { %3008 = vmatmul.msk.bf16.gmra.mxu2 %vm1140_vm1, %v2599_v10  ;;  %v3827_v10 = vld [vmem:[%s4477_s3] ss:$0 sm:$0xff] }
  0x6c   : > { %1269 = vmatmul.bf16.gmra.mxu0 %v2591_v17 }
  0x6d   : > { %1389 = vmatmul.bf16.gmra.mxu3 %v2879_v18  ;;  %1438 = vmatmul.bf16.gmra.mxu1 %v2595_v19  ;;  %v1880_v18 = vmul.f32 %v3827_v10, %v3158_v9 }
  0x75   : > { %3009 = vmatmul.msk.bf16.gmra.mxu2 %vm1140_vm1, %v2611_v22  ;;  %v1881_v22 = vmul.f32 %v3827_v10, %v3159_v14 }
  0x7c   : > { %1274 = vmatmul.bf16.gmra.mxu0 %v2603_v29  ;;  %v2652_v29 = vld [vmem:[%s3700_s12 + $0xe4] sm:$0xf0] }
  0x7d   : > { %1394 = vmatmul.bf16.gmra.mxu3 %v2891_v30  ;;  %1443 = vmatmul.bf16.gmra.mxu1 %v2607_v31  ;;  %v3115_v30 = vld [vmem:[%s3700_s12 + $0x25c] sm:$0xf]  ;;  %v2844_v31 = vld [vmem:[%s3700_s12 + $0x264] sm:$0xf0]  ;;  %v2655_v0 = vor.u32 %v3067_v26, %v2652_v29 }
  0x85   : > { %3010 = vmatmul.msk.bf16.gmra.mxu2 %vm1140_vm1, %v2623_v34  ;;  %v3852_v34 = vld [vmem:[%s3821_s10 + $0x20] sm:$0xff]  }
  0x8c   : > { %1279 = vmatmul.bf16.gmra.mxu0 %v2615_v41  ;;  %v3873_v41 = vld [vmem:[%s3821_s10 + $0x58] sm:$0xff]  }
  0x8d   : > { %1399 = vmatmul.bf16.gmra.mxu3 %v2903_v42  ;;  %1448 = vmatmul.bf16.gmra.mxu1 %v2619_v43  ;;  %v3876_v42 = vld [vmem:[%s3821_s10 + $0x60] sm:$0xff]   ;;  %v3879_v43 = vld [vmem:[%s3821_s10 + $0x68] sm:$0xff]  }
  0x95   : > { %3011 = vmatmul.msk.bf16.gmra.mxu2 %vm1140_vm1, %v2635_v46  ;;  %v3888_v46 = vld [vmem:[%s3821_s10 + $0x80] sm:$0xff]  }
  0x9c   : > { %1284 = vmatmul.bf16.gmra.mxu0 %v2627_v53  ;;  %v3909_v53 = vld [vmem:[%s3821_s10 + $0xe0] sm:$0xff]  }
  0x9d   : > { %1404 = vmatmul.bf16.gmra.mxu3 %v2915_v54  ;;  %1453 = vmatmul.bf16.gmra.mxu1 %v2631_v55  ;;  %v3912_v54 = vld [vmem:[%s3821_s10 + $0xa0] sm:$0xff]   ;;  %v3915_v55 = vld [vmem:[%s3821_s10 + $0xe8] sm:$0xff]  }
  0xa5   : > { %3012 = vmatmul.msk.bf16.gmra.mxu2 %vm1140_vm1, %v2647_v58  ;;  %v3162_v58 = vunpack.c.l.bf16 %v3836_v23 }
  0xa7   : > { %v1882_v14 = vmul.f32 %v3827_v10, %v3162_v58  ;;  %v3071_v58 = vld [vmem:[%s3700_s12 + $0xf8] sm:$0xf0] }
  0xa8   : > { %v1588_v1 = vpop.f32.mrf.mxu2 }
  0xa9   : > { %v1250_v3 = vpop.f32.mrf.mxu0 }
  0xaa   : > { %v1419_v6 = vpop.f32.mrf.mxu1 }
  0xab   : > { %v1420_v8 = vadd.f32 %v1419_v6, %v1250_v3  ;;  %v3940_v3 = vld [vmem:[%s3821_s10 + $0xb8] sm:$0xff]  }
  0xac   : > { %1289 = vmatmul.bf16.gmra.mxu0 %v2639_v2  ;;  %v3937_v2 = vld [vmem:[%s3821_s10 + $0xf8] sm:$0xff]   ;;  %4487 = vst [vmem:[#allocation5_spill] sm:$0xff] %v3940_v3 }
  0xad   : > { %1458 = vmatmul.bf16.gmra.mxu1 %v2643_v4  ;;  %1538 = vmatmul.bf16.vlgmr.msrb.gmra.mxu3 %v2835_v5  ;;  %v1589_v17 = vadd.f32 %v1588_v1, %v1420_v8  ;;  %v2847_v1 = vor.u32 %v3115_v30, %v2844_v31  ;;  %4486 = vst [vmem:[#allocation4_spill] sm:$0xff] %v3937_v2  ;;  %v3943_v4 = vld [vmem:[%s3821_s10 + $0xc0] sm:$0xff]  }
  0xae   : > { %4488 = vst [vmem:[#allocation6_spill] sm:$0xff] %v3943_v4 }
  0xaf   : > { %v1944_v27 = vadd.f32 %v1880_v18, %v1589_v17  ;;  %v2670_v17 = vld [vmem:[%s3700_s12 + $0xf8] sm:$0xf]  ;;  %v3072_v18 = vld [vmem:[%s3700_s12 + $0x100] sm:$0xf0] }
  0xb0   : > { %v1590_v13 = vpop.f32.mrf.mxu2  ;;  %v3831_v15 = vpop.f32.mrf.mxu3  ;;  %v2671_v24 = vor.u32 %v3072_v18, %v2670_v17 }
  0xb1   : > { %4484 = vst [vmem:[#allocation2_spill] sm:$0xff] %v3831_v15  ;;  %v1252_v19 = vpop.f32.mrf.mxu0  ;;  %v2206_v5 = vmul.f32 %v1944_v27, %v1944_v27 }
  0xb2   : > { %v1421_v20 = vpop.f32.mrf.mxu1 }
  0xb3   : > { %v1422_v21 = vadd.f32 %v1421_v20, %v1252_v19 }
  0xb5   : > { %3013 = vmatmul.msk.bf16.gmra.mxu2 %vm1140_vm1, %v2659_v16  ;;  %v1591_v28 = vadd.f32 %v1590_v13, %v1422_v21  ;;  %v3163_v21 = vunpack.c.h.bf16 %v3836_v23  ;;  %v2664_v23 = vld [vmem:[%s3700_s12 + $0xfc] sm:$0xf0] }
  0xb7   : > { %v1945_v56 = vadd.f32 %v1881_v22, %v1591_v28  ;;  %v1883_v31 = vmul.f32 %v3827_v10, %v3163_v21 }
  0xb8   : > { %v1593_v57 = vpop.f32.mrf.mxu2  ;;  %v3927_v62 = vpop.f32.mrf.mxu3 }
  0xb9   : > { %4485 = vst [vmem:[#allocation3_spill] sm:$0xff] %v3927_v62  ;;  %v3287_v6 = vpack.c.bf16 %v1945_v56, %v1944_v27  ;;  %v2136_v7 = vadd.f32 %v1945_v56, %v1944_v27  ;;  %v2207_v8 = vmul.f32 %v1945_v56, %v1945_v56  ;;  %v1255_v9 = vpop.f32.mrf.mxu0  ;;  %v2662_v56 = vld [vmem:[%s3700_s12 + $0xf0] sm:$0xf] }
  0xba   : > { %v1424_v11 = vpop.f32.mrf.mxu1 }
  0xbb   : > { %v2270_v12 = vadd.f32 %v2207_v8, %v2206_v5  ;;  %v1425_v13 = vadd.f32 %v1424_v11, %v1255_v9  ;;  %3288 = vst [vmem:[%s3934_s16] sm:$0xff] %v3287_v6   ;;  %v2663_v9 = vor.u32 %v3071_v58, %v2662_v56 }
  0xbc   : > { %1294 = vmatmul.bf16.gmra.mxu0 %v2651_v63  ;;  %v3070_v63 = vld [vmem:[%s3700_s12 + $0xf4] sm:$0xf] }
  0xbd   : > { %v1594_v16 = vadd.f32 %v1593_v57, %v1425_v13  ;;  %1463 = vmatmul.bf16.gmra.mxu1 %v2655_v0  ;;  %1543 = vmatmul.bf16.gmra.mxu3 %v2847_v1  ;;  %v3118_v0 = vld [vmem:[%s3700_s12 + $0x274] sm:$0xf]  ;;  %v2856_v1 = vld [vmem:[%s3700_s12 + $0x27c] sm:$0xf0]  ;;  %v2667_v11 = vor.u32 %v3070_v63, %v2664_v23 }
  0xbe   : > { %v2859_v17 = vor.u32 %v3118_v0, %v2856_v1 }
  0xbf   : > { %v1946_v19 = vadd.f32 %v1882_v14, %v1594_v16 }
  0xc0   : > { %v1595_v20 = vpop.f32.mrf.mxu2  ;;  %v3950_v22 = vpop.f32.mrf.mxu3 }
  0xc1   : > { %v2137_v25 = vadd.f32 %v2136_v7, %v1946_v19  ;;  %v2208_v26 = vmul.f32 %v1946_v19, %v1946_v19  ;;  %v1257_v27 = vpop.f32.mrf.mxu0  ;;  %v3166_v7 = vunpack.c.l.bf16 %v3846_v32 }
  0xc2   : > { %v1426_v28 = vpop.f32.mrf.mxu1 }
  0xc3   : > { %v2271_v29 = vadd.f32 %v2270_v12, %v2208_v26  ;;  %v1427_v30 = vadd.f32 %v1426_v28, %v1257_v27  ;;  %v2682_v27 = vld [vmem:[%s3700_s12 + $0x110] sm:$0xf]  ;;  %v3075_v28 = vld [vmem:[%s3700_s12 + $0x118] sm:$0xf0] }
  0xc5   : > { %3014 = vmatmul.msk.bf16.gmra.mxu2 %vm1140_vm1, %v2671_v24  ;;  %v1596_v57 = vadd.f32 %v1595_v20, %v1427_v30  ;;  %v1884_v24 = vmul.f32 %v3827_v10, %v3166_v7  ;;  %v3074_v7 = vld [vmem:[%s3700_s12 + $0x110] sm:$0xf0] }
  0xc7   : > { %v1947_v5 = vadd.f32 %v1883_v31, %v1596_v57  ;;  %v2683_v31 = vor.u32 %v3075_v28, %v2682_v27 }
  0xc8   : > { %v1598_v6 = vpop.f32.mrf.mxu2  ;;  %v3961_v8 = vpop.f32.mrf.mxu3 }
  0xc9   : > { %v3292_v12 = vpack.c.bf16 %v1947_v5, %v1946_v19  ;;  %v2138_v13 = vadd.f32 %v2137_v25, %v1947_v5  ;;  %v2209_v14 = vmul.f32 %v1947_v5, %v1947_v5  ;;  %v1260_v16 = vpop.f32.mrf.mxu0  ;;  %v3167_v25 = vunpack.c.h.bf16 %v3846_v32  ;;  %v2674_v5 = vld [vmem:[%s3700_s12 + $0x108] sm:$0xf]  ;;  %v2676_v32 = vld [vmem:[%s3700_s12 + $0x114] sm:$0xf0] }
  0xca   : > { %v1429_v18 = vpop.f32.mrf.mxu1 }
  0xcb   : > { %v2272_v20 = vadd.f32 %v2271_v29, %v2209_v14  ;;  %v1430_v21 = vadd.f32 %v1429_v18, %v1260_v16  ;;  %3475 = vst [vmem:[%s3934_s16 + $0x8] sm:$0xff] %v3292_v12   ;;  %v1885_v1 = vmul.f32 %v3827_v10, %v3167_v25  ;;  %v2868_v12 = vld [vmem:[%s3700_s12 + $0x294] sm:$0xf0]  ;;  %v2675_v18 = vor.u32 %v3074_v7, %v2674_v5 }
  0xcc   : > { %1299 = vmatmul.bf16.gmra.mxu0 %v2663_v9  ;;  %v3073_v9 = vld [vmem:[%s3700_s12 + $0x10c] sm:$0xf] }
  0xcd   : > { %v1599_v26 = vadd.f32 %v1598_v6, %v1430_v21  ;;  %1468 = vmatmul.bf16.gmra.mxu1 %v2667_v11  ;;  %1548 = vmatmul.bf16.gmra.mxu3 %v2859_v17  ;;  %v3121_v11 = vld [vmem:[%s3700_s12 + $0x28c] sm:$0xf] }
  0xce   : > { %v2871_v28 = vor.u32 %v3121_v11, %v2868_v12 }
  0xcf   : > { %v1948_v30 = vadd.f32 %v1884_v24, %v1599_v26 }
  0xd0   : > { %v1600_v19 = vpop.f32.mrf.mxu2  ;;  %v3968_v29 = vpop.f32.mrf.mxu3 }
  0xd1   : > { %v2139_v56 = vadd.f32 %v2138_v13, %v1948_v30  ;;  %v2210_v57 = vmul.f32 %v1948_v30, %v1948_v30  ;;  %v1262_v58 = vpop.f32.mrf.mxu0  ;;  %v3170_v13 = vunpack.c.l.bf16 %v3849_v33 }
  0xd2   : > { %v1431_v63 = vpop.f32.mrf.mxu1 }
  0xd3   : > { %v2273_v23 = vadd.f32 %v2272_v20, %v2210_v57  ;;  %v1432_v0 = vadd.f32 %v1431_v63, %v1262_v58  ;;  %v2679_v20 = vor.u32 %v3073_v9, %v2676_v32  ;;  %v1886_v57 = vmul.f32 %v3827_v10, %v3170_v13  ;;  %v2694_v63 = vld [vmem:[%s3700_s12 + $0x128] sm:$0xf] }
  0xd5   : > { %3015 = vmatmul.msk.bf16.gmra.mxu2 %vm1140_vm1, %v2683_v31  ;;  %v1601_v6 = vadd.f32 %v1600_v19, %v1432_v0  ;;  %v3078_v0 = vld [vmem:[%s3700_s12 + $0x130] sm:$0xf0] }
  0xd6   : > { %v2695_v5 = vor.u32 %v3078_v0, %v2694_v63 }
  0xd7   : > { %v1949_v14 = vadd.f32 %v1885_v1, %v1601_v6 }
  0xd8   : > { %v1603_v16 = vpop.f32.mrf.mxu2  ;;  %v3979_v17 = vpop.f32.mrf.mxu3 }
  0xd9   : > { %v3297_v21 = vpack.c.bf16 %v1949_v14, %v1948_v30  ;;  %v2140_v24 = vadd.f32 %v2139_v56, %v1949_v14  ;;  %v2211_v26 = vmul.f32 %v1949_v14, %v1949_v14  ;;  %v1265_v27 = vpop.f32.mrf.mxu0  ;;  %v3171_v56 = vunpack.c.h.bf16 %v3849_v33  ;;  %v2688_v33 = vld [vmem:[%s3700_s12 + $0x12c] sm:$0xf0] }
  0xda   : > { %v1434_v19 = vpop.f32.mrf.mxu1 }
  0xdb   : > { %v2274_v25 = vadd.f32 %v2273_v23, %v2211_v26  ;;  %v1435_v31 = vadd.f32 %v1434_v19, %v1265_v27  ;;  %3476 = vst [vmem:[%s3934_s16 + $0x10] sm:$0xff] %v3297_v21   ;;  %v1887_v14 = vmul.f32 %v3827_v10, %v3171_v56  ;;  %v3124_v21 = vld [vmem:[%s3700_s12 + $0x2a4] sm:$0xf]  ;;  %v2880_v26 = vld [vmem:[%s3700_s12 + $0x2ac] sm:$0xf0] }
  0xdc   : > { %1304 = vmatmul.bf16.gmra.mxu0 %v2675_v18  ;;  %v3077_v18 = vld [vmem:[%s3700_s12 + $0x128] sm:$0xf0] }
  0xdd   : > { %v1604_v58 = vadd.f32 %v1603_v16, %v1435_v31  ;;  %1473 = vmatmul.bf16.gmra.mxu1 %v2679_v20  ;;  %1553 = vmatmul.bf16.gmra.mxu3 %v2871_v28  ;;  %v2686_v16 = vld [vmem:[%s3700_s12 + $0x120] sm:$0xf]  ;;  %v3076_v20 = vld [vmem:[%s3700_s12 + $0x124] sm:$0xf] }
  0xde   : > { %v2691_v31 = vor.u32 %v3076_v20, %v2688_v33 }
  0xdf   : > { %v1950_v1 = vadd.f32 %v1886_v57, %v1604_v58 }
  0xe0   : > { %v1605_v30 = vpop.f32.mrf.mxu2  ;;  %v3986_v23 = vpop.f32.mrf.mxu3 }
  0xe1   : > { %v2141_v6 = vadd.f32 %v2140_v24, %v1950_v1  ;;  %v2212_v7 = vmul.f32 %v1950_v1, %v1950_v1  ;;  %v1267_v9 = vpop.f32.mrf.mxu0  ;;  %v3174_v24 = vunpack.c.l.bf16 %v3852_v34 }
  0xe2   : > { %v1436_v32 = vpop.f32.mrf.mxu1 }
  0xe3   : > { %v2275_v11 = vadd.f32 %v2274_v25, %v2212_v7  ;;  %v1437_v12 = vadd.f32 %v1436_v32, %v1267_v9  ;;  %v2687_v25 = vor.u32 %v3077_v18, %v2686_v16  ;;  %v1888_v9 = vmul.f32 %v3827_v10, %v3174_v24  ;;  %v2698_v24 = vld [vmem:[%s3700_s12 + $0x138] sm:$0xf] }
  0xe5   : > { %3016 = vmatmul.msk.bf16.gmra.mxu2 %vm1140_vm1, %v2695_v5  ;;  %v1606_v13 = vadd.f32 %v1605_v30, %v1437_v12  ;;  %v2883_v30 = vor.u32 %v3124_v21, %v2880_v26  ;;  %v2706_v12 = vld [vmem:[%s3700_s12 + $0x140] sm:$0xf] }
  0xe7   : > { %v1951_v27 = vadd.f32 %v1887_v14, %v1606_v13  ;;  %v3081_v14 = vld [vmem:[%s3700_s12 + $0x148] sm:$0xf0] }
  0xe8   : > { %v1608_v28 = vpop.f32.mrf.mxu2  ;;  %v3997_v19 = vpop.f32.mrf.mxu3  ;;  %v2707_v13 = vor.u32 %v3081_v14, %v2706_v12 }
  0xe9   : > { %v3302_v57 = vpack.c.bf16 %v1951_v27, %v1950_v1  ;;  %v2142_v58 = vadd.f32 %v2141_v6, %v1951_v27  ;;  %v2213_v63 = vmul.f32 %v1951_v27, %v1951_v27  ;;  %v1270_v0 = vpop.f32.mrf.mxu0  ;;  %v3175_v6 = vunpack.c.h.bf16 %v3852_v34  ;;  %v2700_v34 = vld [vmem:[%s3700_s12 + $0x144] sm:$0xf0] }
  0xea   : > { %v1439_v56 = vpop.f32.mrf.mxu1 }
  0xeb   : > { %v2276_v5 = vadd.f32 %v2275_v11, %v2213_v63  ;;  %v1440_v7 = vadd.f32 %v1439_v56, %v1270_v0  ;;  %3477 = vst [vmem:[%s3934_s16 + $0x18] sm:$0xff] %v3302_v57   ;;  %v3079_v57 = vld [vmem:[%s3700_s12 + $0x13c] sm:$0xf]  ;;  %v2892_v0 = vld [vmem:[%s3700_s12 + $0x2c4] sm:$0xf0] }
  0xec   : > { %1309 = vmatmul.bf16.gmra.mxu0 %v2687_v25  ;;  %v3127_v63 = vld [vmem:[%s3700_s12 + $0x2bc] sm:$0xf] }
  0xed   : > { %v1609_v32 = vadd.f32 %v1608_v28, %v1440_v7  ;;  %1478 = vmatmul.bf16.gmra.mxu1 %v2691_v31  ;;  %1558 = vmatmul.bf16.gmra.mxu3 %v2883_v30  ;;  %v1889_v28 = vmul.f32 %v3827_v10, %v3175_v6  ;;  %v3080_v31 = vld [vmem:[%s3700_s12 + $0x140] sm:$0xf0]  ;;  %v2895_v6 = vor.u32 %v3127_v63, %v2892_v0 }
  0xef   : > { %v1952_v16 = vadd.f32 %v1888_v9, %v1609_v32  ;;  %v2703_v9 = vor.u32 %v3079_v57, %v2700_v34 }
  0xf0   : > { %v1610_v1 = vpop.f32.mrf.mxu2  ;;  %v4004_v11 = vpop.f32.mrf.mxu3 }
  0xf1   : > { %v2143_v18 = vadd.f32 %v2142_v58, %v1952_v16  ;;  %v2214_v20 = vmul.f32 %v1952_v16, %v1952_v16  ;;  %v1272_v33 = vpop.f32.mrf.mxu0  ;;  %v3178_v58 = vunpack.c.l.bf16 %v3855_v35 }
  0xf2   : > { %v1441_v21 = vpop.f32.mrf.mxu1 }
  0xf3   : > { %v2277_v26 = vadd.f32 %v2276_v5, %v2214_v20  ;;  %v1442_v27 = vadd.f32 %v1441_v21, %v1272_v33  ;;  %v2699_v5 = vor.u32 %v3080_v31, %v2698_v24  ;;  %v1890_v21 = vmul.f32 %v3827_v10, %v3178_v58  ;;  %v3084_v24 = vld [vmem:[%s3700_s12 + $0x160] sm:$0xf0] }
  0xf5   : > { %3017 = vmatmul.msk.bf16.gmra.mxu2 %vm1140_vm1, %v2707_v13  ;;  %v1611_v25 = vadd.f32 %v1610_v1, %v1442_v27 }
  0xf7   : > { %v1953_v30 = vadd.f32 %v1889_v28, %v1611_v25  ;;  %v2718_v28 = vld [vmem:[%s3700_s12 + $0x158] sm:$0xf] }
  0xf8   : > { %v1613_v56 = vpop.f32.mrf.mxu2  ;;  %v4015_v7 = vpop.f32.mrf.mxu3  ;;  %v2719_v31 = vor.u32 %v3084_v24, %v2718_v28 }
  0xf9   : > { %v3307_v32 = vpack.c.bf16 %v1953_v30, %v1952_v16  ;;  %v2144_v12 = vadd.f32 %v2143_v18, %v1953_v30  ;;  %v2215_v14 = vmul.f32 %v1953_v30, %v1953_v30  ;;  %v1275_v1 = vpop.f32.mrf.mxu0  ;;  %v3179_v18 = vunpack.c.h.bf16 %v3855_v35  ;;  %v2712_v35 = vld [vmem:[%s3700_s12 + $0x15c] sm:$0xf0] }
  0xfa   : > { %v1444_v13 = vpop.f32.mrf.mxu1 }
  0xfb   : > { %v2278_v20 = vadd.f32 %v2277_v26, %v2215_v14  ;;  %v1445_v33 = vadd.f32 %v1444_v13, %v1275_v1  ;;  %3478 = vst [vmem:[%s3934_s16 + $0x20] sm:$0xff] %v3307_v32   ;;  %v1891_v58 = vmul.f32 %v3827_v10, %v3179_v18  ;;  %v3083_v32 = vld [vmem:[%s3700_s12 + $0x158] sm:$0xf0]  ;;  %v3082_v14 = vld [vmem:[%s3700_s12 + $0x154] sm:$0xf] }
  0xfc   : > { %1314 = vmatmul.bf16.gmra.mxu0 %v2699_v5  ;;  %v2710_v5 = vld [vmem:[%s3700_s12 + $0x150] sm:$0xf]  ;;  %v3130_v1 = vld [vmem:[%s3700_s12 + $0x2d4] sm:$0xf] }
  0xfd   : > { %v1614_v27 = vadd.f32 %v1613_v56, %v1445_v33  ;;  %1483 = vmatmul.bf16.gmra.mxu1 %v2703_v9  ;;  %1563 = vmatmul.bf16.gmra.mxu3 %v2895_v6  ;;  %v2904_v6 = vld [vmem:[%s3700_s12 + $0x2dc] sm:$0xf0] }
  0xff   : > { %v1954_v25 = vadd.f32 %v1890_v21, %v1614_v27  ;;  %v2715_v27 = vor.u32 %v3082_v14, %v2712_v35 }
 0x100   : > { %v1615_v16 = vpop.f32.mrf.mxu2  ;;  %v4022_v26 = vpop.f32.mrf.mxu3 }
 0x101   : > { %v2145_v57 = vadd.f32 %v2144_v12, %v1954_v25  ;;  %v2216_v34 = vmul.f32 %v1954_v25, %v1954_v25  ;;  %v1277_v63 = vpop.f32.mrf.mxu0  ;;  %v3182_v12 = vunpack.c.l.bf16 %v3858_v36 }
 0x102   : > { %v1446_v0 = vpop.f32.mrf.mxu1 }
 0x103   : > { %v2279_v30 = vadd.f32 %v2278_v20, %v2216_v34  ;;  %v1447_v56 = vadd.f32 %v1446_v0, %v1277_v63  ;;  %v2711_v20 = vor.u32 %v3083_v32, %v2710_v5  ;;  %v2730_v5 = vld [vmem:[%s3700_s12 + $0x170] sm:$0xf] }
 0x105   : > { %3018 = vmatmul.msk.bf16.gmra.mxu2 %vm1140_vm1, %v2719_v31  ;;  %v1616_v9 = vadd.f32 %v1615_v16, %v1447_v56  ;;  %v2907_v31 = vor.u32 %v3130_v1, %v2904_v6  ;;  %v1892_v56 = vmul.f32 %v3827_v10, %v3182_v12 }
 0x107   : > { %v1955_v13 = vadd.f32 %v1891_v58, %v1616_v9  ;;  %v3087_v9 = vld [vmem:[%s3700_s12 + $0x178] sm:$0xf0] }
 0x108   : > { %v1618_v33 = vpop.f32.mrf.mxu2  ;;  %v4033_v21 = vpop.f32.mrf.mxu3  ;;  %v2731_v14 = vor.u32 %v3087_v9, %v2730_v5 }
 0x109   : > { %v3312_v28 = vpack.c.bf16 %v1955_v13, %v1954_v25  ;;  %v2146_v24 = vadd.f32 %v2145_v57, %v1955_v13  ;;  %v2217_v18 = vmul.f32 %v1955_v13, %v1955_v13  ;;  %v1280_v16 = vpop.f32.mrf.mxu0  ;;  %v3183_v57 = vunpack.c.h.bf16 %v3858_v36  ;;  %v2724_v36 = vld [vmem:[%s3700_s12 + $0x174] sm:$0xf0] }
 0x10a   : > { %v1449_v34 = vpop.f32.mrf.mxu1 }
 0x10b   : > { %v2280_v63 = vadd.f32 %v2279_v30, %v2217_v18  ;;  %v1450_v0 = vadd.f32 %v1449_v34, %v1280_v16  ;;  %3479 = vst [vmem:[%s3934_s16 + $0x28] sm:$0xff] %v3312_v28   ;;  %v3086_v18 = vld [vmem:[%s3700_s12 + $0x170] sm:$0xf0]  ;;  %v3085_v16 = vld [vmem:[%s3700_s12 + $0x16c] sm:$0xf] }
 0x10c   : > { %1319 = vmatmul.bf16.gmra.mxu0 %v2711_v20  ;;  %v1893_v20 = vmul.f32 %v3827_v10, %v3183_v57  ;;  %v2916_v34 = vld [vmem:[%s3700_s12 + $0x2f4] sm:$0xf0]  ;;  %v2727_v5 = vor.u32 %v3085_v16, %v2724_v36 }
 0x10d   : > { %v1619_v58 = vadd.f32 %v1618_v33, %v1450_v0  ;;  %1488 = vmatmul.bf16.gmra.mxu1 %v2715_v27  ;;  %1568 = vmatmul.bf16.gmra.mxu3 %v2907_v31  ;;  %v2722_v27 = vld [vmem:[%s3700_s12 + $0x168] sm:$0xf]  ;;  %v3133_v31 = vld [vmem:[%s3700_s12 + $0x2ec] sm:$0xf] }
 0x10f   : > { %v1956_v32 = vadd.f32 %v1892_v56, %v1619_v58 }
 0x110   : > { %v1620_v25 = vpop.f32.mrf.mxu2  ;;  %v4040_v30 = vpop.f32.mrf.mxu3 }
 0x111   : > { %v2147_v35 = vadd.f32 %v2146_v24, %v1956_v32  ;;  %v2218_v1 = vmul.f32 %v1956_v32, %v1956_v32  ;;  %v1282_v6 = vpop.f32.mrf.mxu0  ;;  %v3186_v24 = vunpack.c.l.bf16 %v3861_v37 }
 0x112   : > { %v1451_v13 = vpop.f32.mrf.mxu1 }
 0x113   : > { %v2281_v33 = vadd.f32 %v2280_v63, %v2218_v1  ;;  %v1452_v12 = vadd.f32 %v1451_v13, %v1282_v6  ;;  %v2723_v63 = vor.u32 %v3086_v18, %v2722_v27  ;;  %v2919_v1 = vor.u32 %v3133_v31, %v2916_v34  ;;  %v2742_v27 = vld [vmem:[%s3700_s12 + $0x188] sm:$0xf]  ;;  %v3090_v18 = vld [vmem:[%s3700_s12 + $0x190] sm:$0xf0] }
 0x114   : > { %v2743_v36 = vor.u32 %v3090_v18, %v2742_v27 }
 0x115   : > { %3019 = vmatmul.msk.bf16.gmra.mxu2 %vm1140_vm1, %v2731_v14  ;;  %v1621_v28 = vadd.f32 %v1620_v25, %v1452_v12 }
 0x117   : > { %v1957_v0 = vadd.f32 %v1893_v20, %v1621_v28  ;;  %v1894_v20 = vmul.f32 %v3827_v10, %v3186_v24 }
 0x118   : > { %v1623_v56 = vpop.f32.mrf.mxu2  ;;  %v4051_v58 = vpop.f32.mrf.mxu3 }
 0x119   : > { %v3317_v9 = vpack.c.bf16 %v1957_v0, %v1956_v32  ;;  %v2148_v57 = vadd.f32 %v2147_v35, %v1957_v0  ;;  %v2219_v14 = vmul.f32 %v1957_v0, %v1957_v0  ;;  %v1285_v25 = vpop.f32.mrf.mxu0  ;;  %v3187_v35 = vunpack.c.h.bf16 %v3861_v37  ;;  %v2736_v37 = vld [vmem:[%s3700_s12 + $0x18c] sm:$0xf0] }
 0x11a   : > { %v1454_v6 = vpop.f32.mrf.mxu1 }
 0x11b   : > { %v2282_v13 = vadd.f32 %v2281_v33, %v2219_v14  ;;  %v1455_v12 = vadd.f32 %v1454_v6, %v1285_v25  ;;  %3480 = vst [vmem:[%s3934_s16 + $0x30] sm:$0xff] %v3317_v9   ;;  %v2734_v9 = vld [vmem:[%s3700_s12 + $0x180] sm:$0xf]  ;;  %v3089_v25 = vld [vmem:[%s3700_s12 + $0x188] sm:$0xf0] }
 0x11c   : > { %1324 = vmatmul.bf16.gmra.mxu0 %v2723_v63  ;;  %v2850_v6 = vld [vmem:[%s3700_s12 + $0x260] sm:$0xf] }
 0x11d   : > { %v1624_v28 = vadd.f32 %v1623_v56, %v1455_v12  ;;  %1493 = vmatmul.bf16.gmra.mxu1 %v2727_v5  ;;  %1573 = vmatmul.bf16.gmra.mxu3 %v2919_v1  ;;  %v1895_v5 = vmul.f32 %v3827_v10, %v3187_v35  ;;  %v3088_v1 = vld [vmem:[%s3700_s12 + $0x184] sm:$0xf]  ;;  %v3117_v12 = vld [vmem:[%s3700_s12 + $0x268] sm:$0xf0] }
 0x11e   : > { %v2739_v18 = vor.u32 %v3088_v1, %v2736_v37  ;;  %v3191_v1 = vunpack.c.h.bf16 %v3864_v38 }
 0x11f   : > { %v1958_v16 = vadd.f32 %v1894_v20, %v1624_v28 }
 0x120   : > { %v1625_v32 = vpop.f32.mrf.mxu2  ;;  %v4058_v33 = vpop.f32.mrf.mxu3 }
 0x121   : > { %4489 = vst [vmem:[#allocation7_spill] sm:$0xff] %v4058_v33  ;;  %v2149_v31 = vadd.f32 %v2148_v57, %v1958_v16  ;;  %v2220_v34 = vmul.f32 %v1958_v16, %v1958_v16  ;;  %v1287_v0 = vpop.f32.mrf.mxu0  ;;  %v3190_v57 = vunpack.c.l.bf16 %v3864_v38  ;;  %v2748_v38 = vld [vmem:[%s3700_s12 + $0x1a4] sm:$0xf0] }
 0x122   : > { %v1456_v56 = vpop.f32.mrf.mxu1 }
 0x123   : > { %v2283_v24 = vadd.f32 %v2282_v13, %v2220_v34  ;;  %v1457_v63 = vadd.f32 %v1456_v56, %v1287_v0  ;;  %v2735_v13 = vor.u32 %v3089_v25, %v2734_v9  ;;  %v2851_v0 = vor.u32 %v3117_v12, %v2850_v6  ;;  %v2754_v9 = vld [vmem:[%s3700_s12 + $0x1a0] sm:$0xf]  ;;  %v3093_v25 = vld [vmem:[%s3700_s12 + $0x1a8] sm:$0xf0] }
 0x124   : > { %v2755_v37 = vor.u32 %v3093_v25, %v2754_v9 }
 0x125   : > { %3020 = vmatmul.msk.bf16.gmra.mxu2 %vm1140_vm1, %v2743_v36  ;;  %v1626_v14 = vadd.f32 %v1625_v32, %v1457_v63 }
 0x127   : > { %v1959_v20 = vadd.f32 %v1895_v5, %v1626_v14  ;;  %v1896_v5 = vmul.f32 %v3827_v10, %v3190_v57 }
 0x128   : > { %v1628_v28 = vpop.f32.mrf.mxu2  ;;  %v4069_v27 = vpop.f32.mrf.mxu3 }
 0x129   : > { %4490 = vst [vmem:[#allocation8_spill] sm:$0xff] %v4069_v27  ;;  %v3322_v35 = vpack.c.bf16 %v1959_v20, %v1958_v16  ;;  %v2150_v36 = vadd.f32 %v2149_v31, %v1959_v20  ;;  %v2221_v34 = vmul.f32 %v1959_v20, %v1959_v20  ;;  %v1290_v32 = vpop.f32.mrf.mxu0 }
 0x12a   : > { %v1459_v56 = vpop.f32.mrf.mxu1 }
 0x12b   : > { %v2284_v63 = vadd.f32 %v2283_v24, %v2221_v34  ;;  %v1460_v62 = vadd.f32 %v1459_v56, %v1290_v32  ;;  %3481 = vst [vmem:[%s3934_s16 + $0x38] sm:$0xff] %v3322_v35   ;;  %v3092_v34 = vld [vmem:[%s3700_s12 + $0x1a0] sm:$0xf0]  ;;  %v3091_v32 = vld [vmem:[%s3700_s12 + $0x19c] sm:$0xf] }
 0x12c   : > { %1329 = vmatmul.bf16.gmra.mxu0 %v2735_v13  ;;  %v1897_v13 = vmul.f32 %v3827_v10, %v3191_v1  ;;  %v3120_v56 = vld [vmem:[%s3700_s12 + $0x280] sm:$0xf0]  ;;  %v2751_v25 = vor.u32 %v3091_v32, %v2748_v38  ;;  %v3195_v32 = vunpack.c.h.bf16 %v3867_v39 }
 0x12d   : > { %v1629_v14 = vadd.f32 %v1628_v28, %v1460_v62  ;;  %1498 = vmatmul.bf16.gmra.mxu1 %v2739_v18  ;;  %3029 = vmatmul.msk.bf16.vlgmr.msra.gmra.mxu3 %vm1140_vm1, %v2851_v0  ;;  %v2746_v18 = vld [vmem:[%s3700_s12 + $0x198] sm:$0xf] }
 0x12e   : > { %v2862_v0 = vld [vmem:[%s3700_s12 + $0x278] sm:$0xf] }
 0x12f   : > { %v1960_v16 = vadd.f32 %v1896_v5, %v1629_v14 }
 0x130   : > { %v1630_v31 = vpop.f32.mrf.mxu2  ;;  %v4077_v24 = vpop.f32.mrf.mxu3 }
 0x131   : > { %4491 = vst [vmem:[#allocation9_spill] sm:$0xff] %v4077_v24  ;;  %v2151_v6 = vadd.f32 %v2150_v36, %v1960_v16  ;;  %v2222_v62 = vmul.f32 %v1960_v16, %v1960_v16  ;;  %v1292_v12 = vpop.f32.mrf.mxu0  ;;  %v3194_v36 = vunpack.c.l.bf16 %v3867_v39  ;;  %v2760_v39 = vld [vmem:[%s3700_s12 + $0x1bc] sm:$0xf0] }
 0x132   : > { %v1461_v20 = vpop.f32.mrf.mxu1 }
 0x133   : > { %v2285_v28 = vadd.f32 %v2284_v63, %v2222_v62  ;;  %v1462_v57 = vadd.f32 %v1461_v20, %v1292_v12  ;;  %v2747_v63 = vor.u32 %v3092_v34, %v2746_v18  ;;  %v2863_v12 = vor.u32 %v3120_v56, %v2862_v0  ;;  %v2766_v18 = vld [vmem:[%s3700_s12 + $0x1b8] sm:$0xf]  ;;  %v3096_v34 = vld [vmem:[%s3700_s12 + $0x1c0] sm:$0xf0] }
 0x134   : > { %v2767_v38 = vor.u32 %v3096_v34, %v2766_v18 }
 0x135   : > { %3021 = vmatmul.msk.bf16.gmra.mxu2 %vm1140_vm1, %v2755_v37  ;;  %v1631_v35 = vadd.f32 %v1630_v31, %v1462_v57 }
 0x137   : > { %v1961_v5 = vadd.f32 %v1897_v13, %v1631_v35  ;;  %v1898_v13 = vmul.f32 %v3827_v10, %v3194_v36 }
 0x138   : > { %v1633_v14 = vpop.f32.mrf.mxu2  ;;  %v4088_v9 = vpop.f32.mrf.mxu3 }
 0x139   : > { %4492 = vst [vmem:[#allocation10_spill] sm:$0xff] %v4088_v9  ;;  %v3327_v1 = vpack.c.bf16 %v1961_v5, %v1960_v16  ;;  %v2152_v37 = vadd.f32 %v2151_v6, %v1961_v5  ;;  %v2223_v62 = vmul.f32 %v1961_v5, %v1961_v5  ;;  %v1295_v31 = vpop.f32.mrf.mxu0 }
 0x13a   : > { %v1464_v20 = vpop.f32.mrf.mxu1 }
 0x13b   : > { %v2286_v57 = vadd.f32 %v2285_v28, %v2223_v62  ;;  %v1465_v24 = vadd.f32 %v1464_v20, %v1295_v31  ;;  %3482 = vst [vmem:[%s3934_s16 + $0x40] sm:$0xff] %v3327_v1   ;;  %v3095_v62 = vld [vmem:[%s3700_s12 + $0x1b8] sm:$0xf0]  ;;  %v3094_v31 = vld [vmem:[%s3700_s12 + $0x1b4] sm:$0xf] }
 0x13c   : > { %1334 = vmatmul.bf16.gmra.mxu0 %v2747_v63  ;;  %v1899_v63 = vmul.f32 %v3827_v10, %v3195_v32  ;;  %v3123_v20 = vld [vmem:[%s3700_s12 + $0x298] sm:$0xf0]  ;;  %v2763_v34 = vor.u32 %v3094_v31, %v2760_v39  ;;  %v3199_v31 = vunpack.c.h.bf16 %v3870_v40 }
 0x13d   : > { %v1634_v35 = vadd.f32 %v1633_v14, %v1465_v24  ;;  %1503 = vmatmul.bf16.gmra.mxu1 %v2751_v25  ;;  %3030 = vmatmul.msk.bf16.gmra.mxu3 %vm1140_vm1, %v2863_v12  ;;  %v2758_v25 = vld [vmem:[%s3700_s12 + $0x1b0] sm:$0xf] }
 0x13e   : > { %v2874_v12 = vld [vmem:[%s3700_s12 + $0x290] sm:$0xf] }
 0x13f   : > { %v1962_v16 = vadd.f32 %v1898_v13, %v1634_v35 }
 0x140   : > { %v1635_v6 = vpop.f32.mrf.mxu2  ;;  %v4096_v28 = vpop.f32.mrf.mxu3 }
 0x141   : > { %v2153_v0 = vadd.f32 %v2152_v37, %v1962_v16  ;;  %v2224_v24 = vmul.f32 %v1962_v16, %v1962_v16  ;;  %v1297_v56 = vpop.f32.mrf.mxu0  ;;  %v3198_v37 = vunpack.c.l.bf16 %v3870_v40  ;;  %v2772_v40 = vld [vmem:[%s3700_s12 + $0x1d4] sm:$0xf0] }
 0x142   : > { %v1466_v5 = vpop.f32.mrf.mxu1 }
 0x143   : > { %v2287_v14 = vadd.f32 %v2286_v57, %v2224_v24  ;;  %v1467_v36 = vadd.f32 %v1466_v5, %v1297_v56  ;;  %v2759_v57 = vor.u32 %v3095_v62, %v2758_v25  ;;  %v2875_v56 = vor.u32 %v3123_v20, %v2874_v12  ;;  %v2778_v25 = vld [vmem:[%s3700_s12 + $0x1d0] sm:$0xf]  ;;  %v3099_v62 = vld [vmem:[%s3700_s12 + $0x1d8] sm:$0xf0] }
 0x144   : > { %v2779_v39 = vor.u32 %v3099_v62, %v2778_v25 }
 0x145   : > { %3022 = vmatmul.msk.bf16.gmra.mxu2 %vm1140_vm1, %v2767_v38  ;;  %v1636_v1 = vadd.f32 %v1635_v6, %v1467_v36 }
 0x147   : > { %v1963_v13 = vadd.f32 %v1899_v63, %v1636_v1  ;;  %v1900_v63 = vmul.f32 %v3827_v10, %v3198_v37 }
 0x148   : > { %v1638_v35 = vpop.f32.mrf.mxu2  ;;  %v4107_v18 = vpop.f32.mrf.mxu3 }
 0x149   : > { %v3332_v32 = vpack.c.bf16 %v1963_v13, %v1962_v16  ;;  %v2154_v38 = vadd.f32 %v2153_v0, %v1963_v13  ;;  %v2225_v24 = vmul.f32 %v1963_v13, %v1963_v13  ;;  %v1300_v6 = vpop.f32.mrf.mxu0 }
 0x14a   : > { %v1469_v5 = vpop.f32.mrf.mxu1 }
 0x14b   : > { %v2288_v36 = vadd.f32 %v2287_v14, %v2225_v24  ;;  %v1470_v9 = vadd.f32 %v1469_v5, %v1300_v6  ;;  %3483 = vst [vmem:[%s3934_s16 + $0x48] sm:$0xff] %v3332_v32   ;;  %v3098_v24 = vld [vmem:[%s3700_s12 + $0x1d0] sm:$0xf0]  ;;  %v3097_v6 = vld [vmem:[%s3700_s12 + $0x1cc] sm:$0xf] }
 0x14c   : > { %1339 = vmatmul.bf16.gmra.mxu0 %v2759_v57  ;;  %v1901_v57 = vmul.f32 %v3827_v10, %v3199_v31  ;;  %v3126_v5 = vld [vmem:[%s3700_s12 + $0x2b0] sm:$0xf0]  ;;  %v2775_v62 = vor.u32 %v3097_v6, %v2772_v40  ;;  %v3203_v6 = vunpack.c.h.bf16 %v3873_v41 }
 0x14d   : > { %v1639_v1 = vadd.f32 %v1638_v35, %v1470_v9  ;;  %1508 = vmatmul.bf16.gmra.mxu1 %v2763_v34  ;;  %3031 = vmatmul.msk.bf16.gmra.mxu3 %vm1140_vm1, %v2875_v56  ;;  %v2770_v34 = vld [vmem:[%s3700_s12 + $0x1c8] sm:$0xf] }
 0x14e   : > { %v2886_v56 = vld [vmem:[%s3700_s12 + $0x2a8] sm:$0xf] }
 0x14f   : > { %v1964_v16 = vadd.f32 %v1900_v63, %v1639_v1 }
 0x150   : > { %v1640_v0 = vpop.f32.mrf.mxu2  ;;  %v4115_v14 = vpop.f32.mrf.mxu3 }
 0x151   : > { %v2155_v12 = vadd.f32 %v2154_v38, %v1964_v16  ;;  %v2226_v9 = vmul.f32 %v1964_v16, %v1964_v16  ;;  %v1302_v20 = vpop.f32.mrf.mxu0  ;;  %v3202_v38 = vunpack.c.l.bf16 %v3873_v41  ;;  %v2784_v41 = vld [vmem:[%s3700_s12 + $0x1ec] sm:$0xf0] }
 0x152   : > { %v1471_v13 = vpop.f32.mrf.mxu1 }
 0x153   : > { %v2289_v35 = vadd.f32 %v2288_v36, %v2226_v9  ;;  %v1472_v37 = vadd.f32 %v1471_v13, %v1302_v20  ;;  %v2771_v36 = vor.u32 %v3098_v24, %v2770_v34  ;;  %v2887_v20 = vor.u32 %v3126_v5, %v2886_v56  ;;  %v2790_v34 = vld [vmem:[%s3700_s12 + $0x1e8] sm:$0xf]  ;;  %v3102_v24 = vld [vmem:[%s3700_s12 + $0x1f0] sm:$0xf0] }
 0x154   : > { %v2791_v40 = vor.u32 %v3102_v24, %v2790_v34 }
 0x155   : > { %3023 = vmatmul.msk.bf16.gmra.mxu2 %vm1140_vm1, %v2779_v39  ;;  %v1641_v32 = vadd.f32 %v1640_v0, %v1472_v37 }
 0x157   : > { %v1965_v63 = vadd.f32 %v1901_v57, %v1641_v32  ;;  %v1902_v57 = vmul.f32 %v3827_v10, %v3202_v38 }
 0x158   : > { %v1643_v1 = vpop.f32.mrf.mxu2  ;;  %v4126_v25 = vpop.f32.mrf.mxu3 }
 0x159   : > { %v3337_v31 = vpack.c.bf16 %v1965_v63, %v1964_v16  ;;  %v2156_v39 = vadd.f32 %v2155_v12, %v1965_v63  ;;  %v2227_v9 = vmul.f32 %v1965_v63, %v1965_v63  ;;  %v1305_v0 = vpop.f32.mrf.mxu0 }
 0x15a   : > { %v1474_v13 = vpop.f32.mrf.mxu1 }
 0x15b   : > { %v2290_v37 = vadd.f32 %v2289_v35, %v2227_v9  ;;  %v1475_v15 = vadd.f32 %v1474_v13, %v1305_v0  ;;  %3484 = vst [vmem:[%s3934_s16 + $0x50] sm:$0xff] %v3337_v31   ;;  %v3101_v9 = vld [vmem:[%s3700_s12 + $0x1e8] sm:$0xf0]  ;;  %v3100_v0 = vld [vmem:[%s3700_s12 + $0x1e4] sm:$0xf] }
 0x15c   : > { %1344 = vmatmul.bf16.gmra.mxu0 %v2771_v36  ;;  %v1903_v36 = vmul.f32 %v3827_v10, %v3203_v6  ;;  %v3129_v13 = vld [vmem:[%s3700_s12 + $0x2c8] sm:$0xf0]  ;;  %v2787_v24 = vor.u32 %v3100_v0, %v2784_v41  ;;  %v3207_v0 = vunpack.c.h.bf16 %v3876_v42 }
 0x15d   : > { %v1644_v32 = vadd.f32 %v1643_v1, %v1475_v15  ;;  %1513 = vmatmul.bf16.gmra.mxu1 %v2775_v62  ;;  %3032 = vmatmul.msk.bf16.gmra.mxu3 %vm1140_vm1, %v2887_v20  ;;  %v2782_v62 = vld [vmem:[%s3700_s12 + $0x1e0] sm:$0xf] }
 0x15e   : > { %v2898_v20 = vld [vmem:[%s3700_s12 + $0x2c0] sm:$0xf] }
 0x15f   : > { %v1966_v16 = vadd.f32 %v1902_v57, %v1644_v32 }
 0x160   : > { %v1645_v12 = vpop.f32.mrf.mxu2  ;;  %v4134_v35 = vpop.f32.mrf.mxu3 }
 0x161   : > { %v2157_v56 = vadd.f32 %v2156_v39, %v1966_v16  ;;  %v2228_v15 = vmul.f32 %v1966_v16, %v1966_v16  ;;  %v1307_v5 = vpop.f32.mrf.mxu0  ;;  %v3206_v39 = vunpack.c.l.bf16 %v3876_v42  ;;  %v2796_v42 = vld [vmem:[%s3700_s12 + $0x204] sm:$0xf0] }
 0x162   : > { %v1476_v63 = vpop.f32.mrf.mxu1 }
 0x163   : > { %v2291_v1 = vadd.f32 %v2290_v37, %v2228_v15  ;;  %v1477_v38 = vadd.f32 %v1476_v63, %v1307_v5  ;;  %v2783_v37 = vor.u32 %v3101_v9, %v2782_v62  ;;  %v2899_v15 = vor.u32 %v3129_v13, %v2898_v20 }
 0x165   : > { %3024 = vmatmul.msk.bf16.gmra.mxu2 %vm1140_vm1, %v2791_v40  ;;  %v1646_v31 = vadd.f32 %v1645_v12, %v1477_v38 }
 0x167   : > { %v1967_v57 = vadd.f32 %v1903_v36, %v1646_v31  ;;  %v4150_v36 = vld [vmem:[%s4477_s3] ss:$0 sm:$0xff] }
 0x168   : > { %v1648_v32 = vpop.f32.mrf.mxu2  ;;  %v4145_v34 = vpop.f32.mrf.mxu3  ;;  %v1904_v31 = vmul.f32 %v4150_v36, %v3206_v39 }
 0x169   : > { %v3342_v10 = vpack.c.bf16 %v1967_v57, %v1966_v16  ;;  %v2158_v6 = vadd.f32 %v2157_v56, %v1967_v57  ;;  %v2229_v40 = vmul.f32 %v1967_v57, %v1967_v57  ;;  %v1310_v12 = vpop.f32.mrf.mxu0  ;;  %v2802_v16 = vld [vmem:[%s3700_s12 + $0x200] sm:$0xf]  ;;  %v3105_v56 = vld [vmem:[%s3700_s12 + $0x208] sm:$0xf0] }
 0x16a   : > { %v1479_v5 = vpop.f32.mrf.mxu1  ;;  %v2803_v20 = vor.u32 %v3105_v56, %v2802_v16 }
 0x16b   : > { %v2292_v63 = vadd.f32 %v2291_v1, %v2229_v40  ;;  %v1480_v38 = vadd.f32 %v1479_v5, %v1310_v12  ;;  %3485 = vst [vmem:[%s3934_s16 + $0x58] sm:$0xff] %v3342_v10   ;;  %v1905_v10 = vmul.f32 %v4150_v36, %v3207_v0  ;;  %v2794_v40 = vld [vmem:[%s3700_s12 + $0x1f8] sm:$0xf]  ;;  %v3103_v5 = vld [vmem:[%s3700_s12 + $0x1fc] sm:$0xf] }
 0x16c   : > { %1349 = vmatmul.bf16.gmra.mxu0 %v2783_v37 }
 0x16d   : > { %v1649_v62 = vadd.f32 %v1648_v32, %v1480_v38  ;;  %1518 = vmatmul.bf16.gmra.mxu1 %v2787_v24  ;;  %3033 = vmatmul.msk.bf16.gmra.mxu3 %vm1140_vm1, %v2899_v15  ;;  %v3104_v15 = vld [vmem:[%s3700_s12 + $0x200] sm:$0xf0]  ;;  %v2910_v38 = vld [vmem:[%s3700_s12 + $0x2d8] sm:$0xf] }
 0x16f   : > { %v1968_v9 = vadd.f32 %v1904_v31, %v1649_v62  ;;  %v3132_v31 = vld [vmem:[%s3700_s12 + $0x2e0] sm:$0xf0] }
 0x170   : > { %v1650_v1 = vpop.f32.mrf.mxu2  ;;  %v4158_v41 = vpop.f32.mrf.mxu3 }
 0x171   : > { %v2159_v13 = vadd.f32 %v2158_v6, %v1968_v9  ;;  %v2230_v57 = vmul.f32 %v1968_v9, %v1968_v9  ;;  %v1312_v32 = vpop.f32.mrf.mxu0  ;;  %v3210_v6 = vunpack.c.l.bf16 %v3879_v43 }
 0x172   : > { %v1481_v39 = vpop.f32.mrf.mxu1 }
 0x173   : > { %v2293_v37 = vadd.f32 %v2292_v63, %v2230_v57  ;;  %v1482_v24 = vadd.f32 %v1481_v39, %v1312_v32  ;;  %v2795_v63 = vor.u32 %v3104_v15, %v2794_v40  ;;  %v2799_v57 = vor.u32 %v3103_v5, %v2796_v42  ;;  %v2814_v40 = vld [vmem:[%s3700_s12 + $0x218] sm:$0xf] }
 0x174   : > { %v2911_v39 = vor.u32 %v3132_v31, %v2910_v38  ;;  %v1906_v27 = vmul.f32 %v4150_v36, %v3210_v6  ;;  %v3211_v15 = vunpack.c.h.bf16 %v3879_v43  ;;  %v2808_v43 = vld [vmem:[%s3700_s12 + $0x21c] sm:$0xf0] }
 0x175   : > { %3025 = vmatmul.msk.bf16.gmra.mxu2 %vm1140_vm1, %v2803_v20  ;;  %v1651_v12 = vadd.f32 %v1650_v1, %v1482_v24 }
 0x176   : > { %v1907_v6 = vmul.f32 %v4150_v36, %v3211_v15 }
 0x177   : > { %v1969_v62 = vadd.f32 %v1905_v10, %v1651_v12  ;;  %v3108_v12 = vld [vmem:[%s3700_s12 + $0x220] sm:$0xf0] }
 0x178   : > { %v1653_v16 = vpop.f32.mrf.mxu2  ;;  %v4169_v56 = vpop.f32.mrf.mxu3  ;;  %v2815_v5 = vor.u32 %v3108_v12, %v2814_v40 }
 0x179   : > { %v3347_v0 = vpack.c.bf16 %v1969_v62, %v1968_v9  ;;  %v2160_v20 = vadd.f32 %v2159_v13, %v1969_v62  ;;  %v2231_v32 = vmul.f32 %v1969_v62, %v1969_v62  ;;  %v1315_v1 = vpop.f32.mrf.mxu0 }
 0x17a   : > { %v1484_v24 = vpop.f32.mrf.mxu1 }
 0x17b   : > { %v2294_v4 = vadd.f32 %v2293_v37, %v2231_v32  ;;  %v1485_v3 = vadd.f32 %v1484_v24, %v1315_v1  ;;  %3486 = vst [vmem:[%s3934_s16 + $0x60] sm:$0xff] %v3347_v0   ;;  %v3106_v0 = vld [vmem:[%s3700_s12 + $0x214] sm:$0xf]  ;;  %v2922_v32 = vld [vmem:[%s3700_s12 + $0x2f0] sm:$0xf] }
 0x17c   : > { %1354 = vmatmul.bf16.gmra.mxu0 %v2795_v63  ;;  %v3135_v1 = vld [vmem:[%s3700_s12 + $0x2f8] sm:$0xf0]  ;;  %v2811_v40 = vor.u32 %v3106_v0, %v2808_v43 }
 0x17d   : > { %v1654_v10 = vadd.f32 %v1653_v16, %v1485_v3  ;;  %1523 = vmatmul.bf16.gmra.mxu1 %v2799_v57  ;;  %3034 = vmatmul.msk.bf16.gmra.mxu3 %vm1140_vm1, %v2911_v39  ;;  %v3107_v57 = vld [vmem:[%s3700_s12 + $0x218] sm:$0xf0] }
 0x17f   : > { %v1970_v9 = vadd.f32 %v1906_v27, %v1654_v10  ;;  %v2806_v27 = vld [vmem:[%s3700_s12 + $0x210] sm:$0xf] }
 0x180   : > { %v1655_v13 = vpop.f32.mrf.mxu2  ;;  %v4177_v37 = vpop.f32.mrf.mxu3 }
 0x181   : > { %v2161_v42 = vadd.f32 %v2160_v20, %v1970_v9  ;;  %v2232_v3 = vmul.f32 %v1970_v9, %v1970_v9  ;;  %v1317_v38 = vpop.f32.mrf.mxu0  ;;  %v3214_v20 = vunpack.c.l.bf16 %v3882_v44 }
 0x182   : > { %v1486_v31 = vpop.f32.mrf.mxu1 }
 0x183   : > { %v2295_v62 = vadd.f32 %v2294_v4, %v2232_v3  ;;  %v1487_v16 = vadd.f32 %v1486_v31, %v1317_v38  ;;  %v2807_v4 = vor.u32 %v3107_v57, %v2806_v27  ;;  %v2923_v3 = vor.u32 %v3135_v1, %v2922_v32  ;;  %v2826_v27 = vld [vmem:[%s3700_s12 + $0x230] sm:$0xf] }
 0x184   : > { %v1908_v33 = vmul.f32 %v4150_v36, %v3214_v20  ;;  %v3215_v57 = vunpack.c.h.bf16 %v3882_v44 }
 0x185   : > { %3026 = vmatmul.msk.bf16.gmra.mxu2 %vm1140_vm1, %v2815_v5  ;;  %v1656_v63 = vadd.f32 %v1655_v13, %v1487_v16 }
 0x187   : > { %v1971_v39 = vadd.f32 %v1907_v6, %v1656_v63  ;;  %v3111_v63 = vld [vmem:[%s3700_s12 + $0x238] sm:$0xf0] }
 0x188   : > { %v1658_v24 = vpop.f32.mrf.mxu2  ;;  %v4188_v10 = vpop.f32.mrf.mxu3  ;;  %v2827_v0 = vor.u32 %v3111_v63, %v2826_v27 }
 0x189   : > { %v3352_v12 = vpack.c.bf16 %v1971_v39, %v1970_v9  ;;  %v2162_v15 = vadd.f32 %v2161_v42, %v1971_v39  ;;  %v2233_v5 = vmul.f32 %v1971_v39, %v1971_v39  ;;  %v1320_v13 = vpop.f32.mrf.mxu0 }
 0x18a   : > { %v1489_v38 = vpop.f32.mrf.mxu1 }
 0x18b   : > { %v2296_v31 = vadd.f32 %v2295_v62, %v2233_v5  ;;  %v1490_v16 = vadd.f32 %v1489_v38, %v1320_v13  ;;  %3487 = vst [vmem:[%s3934_s16 + $0x68] sm:$0xff] %v3352_v12   ;;  %v3110_v12 = vld [vmem:[%s3700_s12 + $0x230] sm:$0xf0]  ;;  %v3109_v5 = vld [vmem:[%s3700_s12 + $0x22c] sm:$0xf]  ;;  %v3218_v38 = vunpack.c.l.bf16 %v3885_v45 }
 0x18c   : > { %1359 = vmatmul.bf16.gmra.mxu0 %v2807_v4  ;;  %v1909_v4 = vmul.f32 %v4150_v36, %v3215_v57  ;;  %v2820_v13 = vld [vmem:[%s3700_s12 + $0x234] sm:$0xf0] }
 0x18d   : > { %v1659_v6 = vadd.f32 %v1658_v24, %v1490_v16  ;;  %1528 = vmatmul.bf16.gmra.mxu1 %v2811_v40  ;;  %3035 = vmatmul.msk.bf16.gmra.mxu3 %vm1140_vm1, %v2923_v3  ;;  %v2823_v57 = vor.u32 %v3109_v5, %v2820_v13 }
 0x18f   : > { %v1972_v9 = vadd.f32 %v1908_v33, %v1659_v6  ;;  %v2818_v33 = vld [vmem:[%s3700_s12 + $0x228] sm:$0xf] }
 0x190   : > { %v1660_v42 = vpop.f32.mrf.mxu2  ;;  %v4196_v62 = vpop.f32.mrf.mxu3 }
 0x191   : > { %v2163_v43 = vadd.f32 %v2162_v15, %v1972_v9  ;;  %v2234_v32 = vmul.f32 %v1972_v9, %v1972_v9  ;;  %v1322_v1 = vpop.f32.mrf.mxu0 }
 0x192   : > { %v1491_v39 = vpop.f32.mrf.mxu1 }
 0x193   : > { %v2297_v24 = vadd.f32 %v2296_v31, %v2234_v32  ;;  %v1492_v20 = vadd.f32 %v1491_v39, %v1322_v1  ;;  %v2819_v31 = vor.u32 %v3110_v12, %v2818_v33  ;;  %v1910_v1 = vmul.f32 %v4150_v36, %v3218_v38 }
 0x194   : > { %v3219_v33 = vunpack.c.h.bf16 %v3885_v45 }
 0x195   : > { %3027 = vmatmul.msk.bf16.gmra.mxu2 %vm1140_vm1, %v2827_v0  ;;  %v1661_v40 = vadd.f32 %v1660_v42, %v1492_v20  ;;  %v2838_v20 = vld [vmem:[%s3700_s12 + $0x248] sm:$0xf] }
 0x196   : > { %v1911_v38 = vmul.f32 %v4150_v36, %v3219_v33 }
 0x197   : > { %v1973_v44 = vadd.f32 %v1909_v4, %v1661_v40  ;;  %v3114_v4 = vld [vmem:[%s3700_s12 + $0x250] sm:$0xf0] }
 0x198   : > { %v1663_v3 = vpop.f32.mrf.mxu2  ;;  %v4205_v15 = vpop.f32.mrf.mxu3 }
 0x199   : > { %v3357_v16 = vpack.c.bf16 %v1973_v44, %v1972_v9  ;;  %v2164_v6 = vadd.f32 %v2163_v43, %v1973_v44  ;;  %v2235_v27 = vmul.f32 %v1973_v44, %v1973_v44  ;;  %v1325_v63 = vpop.f32.mrf.mxu0  ;;  %v2839_v43 = vor.u32 %v3114_v4, %v2838_v20 }
 0x19a   : > { %v1494_v42 = vpop.f32.mrf.mxu1 }
 0x19b   : > { %v2298_v0 = vadd.f32 %v2297_v24, %v2235_v27  ;;  %v1495_v32 = vadd.f32 %v1494_v42, %v1325_v63  ;;  %3488 = vst [vmem:[%s3934_s16 + $0x70] sm:$0xff] %v3357_v16   ;;  %v3222_v63 = vunpack.c.l.bf16 %v3888_v46 }
 0x19c   : > { %1364 = vmatmul.bf16.gmra.mxu0 %v2819_v31 }
 0x19d   : > { %v1664_v39 = vadd.f32 %v1663_v3, %v1495_v32  ;;  %1533 = vmatmul.bf16.gmra.mxu1 %v2823_v57  ;;  %v1912_v20 = vmul.f32 %v4150_v36, %v3222_v63 }
 0x19f   : > { %v1974_v40 = vadd.f32 %v1910_v1, %v1664_v39 }
 0x1a0   : > { %v1665_v2 = vpop.f32.mrf.mxu2  ;;  %v4212_v9 = vpop.f32.mrf.mxu3 }
 0x1a1   : > { %v2165_v12 = vadd.f32 %v2164_v6, %v1974_v40  ;;  %v2236_v5 = vmul.f32 %v1974_v40, %v1974_v40  ;;  %v1327_v13 = vpop.f32.mrf.mxu0 }
 0x1a2   : > { %v1496_v24 = vpop.f32.mrf.mxu1 }
 0x1a3   : > { %v2299_v44 = vadd.f32 %v2298_v0, %v2236_v5  ;;  %v1497_v27 = vadd.f32 %v1496_v24, %v1327_v13 }
 0x1a5   : > { %3028 = vmatmul.msk.bf16.gmra.mxu2 %vm1140_vm1, %v2839_v43  ;;  %v1666_v3 = vadd.f32 %v1665_v2, %v1497_v27  ;;  %v3223_v2 = vunpack.c.h.bf16 %v3888_v46  ;;  %v1547_v46 = vadd.f32 %v4107_v18, %v3961_v8 }
 0x1a7   : > { %v1975_v31 = vadd.f32 %v1911_v38, %v1666_v3 }
 0x1a8   : > { %v1668_v16 = vpop.f32.mrf.mxu2  ;;  %v4217_v45 = vpop.f32.mrf.mxu3 }
 0x1a9   : > { %v3362_v57 = vpack.c.bf16 %v1975_v31, %v1974_v40  ;;  %v2166_v42 = vadd.f32 %v2165_v12, %v1975_v31  ;;  %v2237_v6 = vmul.f32 %v1975_v31, %v1975_v31  ;;  %v1330_v32 = vpop.f32.mrf.mxu0  ;;  %v3258_v40 = vunpack.c.l.bf16 %v3891_v47 }
 0x1aa   : > { %v1499_v1 = vpop.f32.mrf.mxu1  ;;  %v3259_v31 = vunpack.c.h.bf16 %v3891_v47 }
 0x1ab   : > { %v2300_v39 = vadd.f32 %v2299_v44, %v2237_v6  ;;  %v1500_v0 = vadd.f32 %v1499_v1, %v1330_v32  ;;  %3489 = vst [vmem:[%s3934_s16 + $0x78] sm:$0xff] %v3362_v57   ;;  %v1913_v44 = vmul.f32 %v4150_v36, %v3223_v2  ;;  %v3226_v57 = vunpack.c.l.bf16 %v3894_v48 }
 0x1ac   : > { %v1930_v6 = vmul.f32 %v4150_v36, %v3258_v40 }
 0x1ad   : > { %v1669_v4 = vadd.f32 %v1668_v16, %v1500_v0  ;;  %v1545_v16 = vadd.f32 %v4096_v28, %v3950_v22  ;;  %v1914_v8 = vmul.f32 %v4150_v36, %v3226_v57 }
 0x1af   : > { %v1976_v33 = vadd.f32 %v1912_v20, %v1669_v4 }
 0x1b0   : > { %v1670_v43 = vpop.f32.mrf.mxu2  ;;  %v1713_v5 = vpop.f32.mrf.mxu3 }
 0x1b1   : > { %v2167_v13 = vadd.f32 %v2166_v42, %v1976_v33  ;;  %v2238_v24 = vmul.f32 %v1976_v33, %v1976_v33  ;;  %v1332_v27 = vpop.f32.mrf.mxu0  ;;  %v1714_v42 = vadd.f32 %v1713_v5, %v1545_v16 }
 0x1b2   : > { %v1501_v12 = vpop.f32.mrf.mxu1 }
 0x1b3   : > { %v2301_v38 = vadd.f32 %v2300_v39, %v2238_v24  ;;  %v1502_v3 = vadd.f32 %v1501_v12, %v1332_v27  ;;  %v1931_v39 = vmul.f32 %v4150_v36, %v3259_v31  ;;  %v4233_v18 = vadd.f32 %v1930_v6, %v1714_v42 }
 0x1b4   : > { %v3227_v12 = vunpack.c.h.bf16 %v3894_v48  ;;  %v3263_v6 = vunpack.c.h.bf16 %v3897_v49  ;;  %v1552_v48 = vadd.f32 %v4126_v25, %v3979_v17 }
 0x1b5   : > { %v1671_v63 = vadd.f32 %v1670_v43, %v1502_v3 }
 0x1b6   : > { %v1915_v42 = vmul.f32 %v4150_v36, %v3227_v12 }
 0x1b7   : > { %v1977_v32 = vadd.f32 %v1913_v44, %v1671_v63  ;;  %v3262_v63 = vunpack.c.l.bf16 %v3897_v49 }
 0x1b8   : > { %v1673_v1 = vpop.f32.mrf.mxu2  ;;  %v1715_v0 = vpop.f32.mrf.mxu3 }
 0x1b9   : > { %v3367_v20 = vpack.c.bf16 %v1977_v32, %v1976_v33  ;;  %v2168_v47 = vadd.f32 %v2167_v13, %v1977_v32  ;;  %v2239_v4 = vmul.f32 %v1977_v32, %v1977_v32  ;;  %v1716_v22 = vadd.f32 %v1715_v0, %v1547_v46  ;;  %v1335_v28 = vpop.f32.mrf.mxu0 }
 0x1ba   : > { %v1504_v43 = vpop.f32.mrf.mxu1  ;;  %v1550_v32 = vadd.f32 %v4115_v14, %v3968_v29 }
 0x1bb   : > { %v2302_v2 = vadd.f32 %v2301_v38, %v2239_v4  ;;  %v4235_v5 = vadd.f32 %v1931_v39, %v1716_v22  ;;  %v1505_v24 = vadd.f32 %v1504_v43, %v1335_v28  ;;  %3490 = vst [vmem:[%s3934_s16 + $0x80] sm:$0xff] %v3367_v20   ;;  %v3230_v39 = vunpack.c.l.bf16 %v3900_v50 }
 0x1bc   : > { %v1932_v20 = vmul.f32 %v4150_v36, %v3262_v63  ;;  %v1933_v22 = vmul.f32 %v4150_v36, %v3263_v6 }
 0x1bd   : > { %v3412_v27 = vpack.c.bf16 %v4235_v5, %v4233_v18  ;;  %v1674_v40 = vadd.f32 %v1673_v1, %v1505_v24  ;;  %v1916_v17 = vmul.f32 %v4150_v36, %v3230_v39 }
 0x1bf   : > { %v1978_v33 = vadd.f32 %v1914_v8, %v1674_v40  ;;  %3499 = vst [vmem:[%s3934_s16 + $0xc8] sm:$0xff] %v3412_v27  }
 0x1c0   : > { %v1675_v13 = vpop.f32.mrf.mxu2  ;;  %v1718_v3 = vpop.f32.mrf.mxu3 }
 0x1c1   : > { %v2169_v44 = vadd.f32 %v2168_v47, %v1978_v33  ;;  %v2240_v31 = vmul.f32 %v1978_v33, %v1978_v33  ;;  %v1337_v16 = vpop.f32.mrf.mxu0  ;;  %v1719_v0 = vadd.f32 %v1718_v3, %v1550_v32 }
 0x1c2   : > { %v1506_v38 = vpop.f32.mrf.mxu1 }
 0x1c3   : > { %v2303_v46 = vadd.f32 %v2302_v2, %v2240_v31  ;;  %v1507_v57 = vadd.f32 %v1506_v38, %v1337_v16  ;;  %v4253_v25 = vadd.f32 %v1932_v20, %v1719_v0 }
 0x1c5   : > { %v1676_v1 = vadd.f32 %v1675_v13, %v1507_v57  ;;  %v3266_v57 = vunpack.c.l.bf16 %v3903_v51 }
 0x1c7   : > { %v1979_v47 = vadd.f32 %v1915_v42, %v1676_v1  ;;  %v3267_v1 = vunpack.c.h.bf16 %v3903_v51  ;;  %v1934_v20 = vmul.f32 %v4150_v36, %v3266_v57  ;;  %v1560_v57 = vadd.f32 %v4158_v41, %v4004_v11 }
 0x1c8   : > { %v1678_v4 = vpop.f32.mrf.mxu2  ;;  %v1720_v28 = vpop.f32.mrf.mxu3 }
 0x1c9   : > { %v3372_v43 = vpack.c.bf16 %v1979_v47, %v1978_v33  ;;  %v2170_v49 = vadd.f32 %v2169_v44, %v1979_v47  ;;  %v2241_v8 = vmul.f32 %v1979_v47, %v1979_v47  ;;  %v1721_v29 = vadd.f32 %v1720_v28, %v1552_v48  ;;  %v1340_v14 = vpop.f32.mrf.mxu0 }
 0x1ca   : > { %v1509_v2 = vpop.f32.mrf.mxu1  ;;  %v3231_v44 = vunpack.c.h.bf16 %v3900_v50  ;;  %v1555_v48 = vadd.f32 %v4134_v35, %v3986_v23  ;;  %v1557_v50 = vadd.f32 %v4145_v34, %v3997_v19 }
 0x1cb   : > { %v2304_v24 = vadd.f32 %v2303_v46, %v2241_v8  ;;  %v4255_v27 = vadd.f32 %v1933_v22, %v1721_v29  ;;  %v1510_v40 = vadd.f32 %v1509_v2, %v1340_v14  ;;  %3491 = vst [vmem:[%s3934_s16 + $0x88] sm:$0xff] %v3372_v43   ;;  %v1935_v22 = vmul.f32 %v4150_v36, %v3267_v1 }
 0x1cc   : > { %v1917_v32 = vmul.f32 %v4150_v36, %v3231_v44  ;;  %v3234_v2 = vunpack.c.l.bf16 %v3906_v52 }
 0x1cd   : > { %v3417_v13 = vpack.c.bf16 %v4255_v27, %v4253_v25  ;;  %v1679_v12 = vadd.f32 %v1678_v4, %v1510_v40  ;;  %v3235_v40 = vunpack.c.h.bf16 %v3906_v52  ;;  %v1562_v52 = vadd.f32 %v4169_v56, %v4015_v7 }
 0x1cf   : > { %v1980_v33 = vadd.f32 %v1916_v17, %v1679_v12  ;;  %3500 = vst [vmem:[%s3934_s16 + $0xd0] sm:$0xff] %v3417_v13  }
 0x1d0   : > { %v1680_v3 = vpop.f32.mrf.mxu2  ;;  %v1723_v31 = vpop.f32.mrf.mxu3 }
 0x1d1   : > { %v2171_v16 = vadd.f32 %v2170_v49, %v1980_v33  ;;  %v2242_v63 = vmul.f32 %v1980_v33, %v1980_v33  ;;  %v1342_v38 = vpop.f32.mrf.mxu0  ;;  %v1724_v0 = vadd.f32 %v1723_v31, %v1555_v48 }
 0x1d2   : > { %v1511_v46 = vpop.f32.mrf.mxu1 }
 0x1d3   : > { %v2305_v42 = vadd.f32 %v2304_v24, %v2242_v63  ;;  %v1512_v6 = vadd.f32 %v1511_v46, %v1342_v38  ;;  %v4273_v29 = vadd.f32 %v1934_v20, %v1724_v0  ;;  %v1919_v63 = vmul.f32 %v4150_v36, %v3235_v40 }
 0x1d4   : > { %v3271_v38 = vunpack.c.h.bf16 %v3909_v53  ;;  %v1565_v40 = vadd.f32 %v4177_v37, %v4022_v26 }
 0x1d5   : > { %v1681_v39 = vadd.f32 %v1680_v3, %v1512_v6  ;;  %v3270_v3 = vunpack.c.l.bf16 %v3909_v53 }
 0x1d7   : > { %v1981_v47 = vadd.f32 %v1917_v32, %v1681_v39  ;;  %v1937_v39 = vmul.f32 %v4150_v36, %v3271_v38 }
 0x1d8   : > { %v1683_v4 = vpop.f32.mrf.mxu2  ;;  %v1725_v28 = vpop.f32.mrf.mxu3 }
 0x1d9   : > { %v3377_v43 = vpack.c.bf16 %v1981_v47, %v1980_v33  ;;  %v4271_v49 = vadd.f32 %v2171_v16, %v1981_v47  ;;  %v2243_v51 = vmul.f32 %v1981_v47, %v1981_v47  ;;  %v1726_v8 = vadd.f32 %v1725_v28, %v1557_v50  ;;  %v1345_v23 = vpop.f32.mrf.mxu0 }
 0x1da   : > { %v1514_v35 = vpop.f32.mrf.mxu1  ;;  %v1918_v33 = vmul.f32 %v4150_v36, %v3234_v2  ;;  %v3238_v47 = vunpack.c.l.bf16 %v3912_v54  ;;  %v3239_v28 = vunpack.c.h.bf16 %v3912_v54  ;;  %v1567_v54 = vadd.f32 %v4188_v10, %v4033_v21 }
 0x1db   : > { %v4275_v19 = vadd.f32 %v2305_v42, %v2243_v51  ;;  %v4277_v34 = vadd.f32 %v1935_v22, %v1726_v8  ;;  %3492 = vst [vmem:[%s3934_s16 + $0x90] sm:$0xff] %v3377_v43   ;;  %v1515_v17 = vadd.f32 %v1514_v35, %v1345_v23  ;;  %v1936_v42 = vmul.f32 %v4150_v36, %v3270_v3 }
 0x1dc   : > { %v1920_v8 = vmul.f32 %v4150_v36, %v3238_v47  ;;  %v3274_v23 = vunpack.c.l.bf16 %v3915_v55  ;;  %v3279_v47 = vunpack.c.h.bf16 %v3922_v60 }
 0x1dd   : > { %v3422_v14 = vpack.c.bf16 %v4277_v34, %v4273_v29  ;;  %v1684_v31 = vadd.f32 %v1683_v4, %v1515_v17  ;;  %v1921_v17 = vmul.f32 %v4150_v36, %v3239_v28 }
 0x1df   : > { %3501 = vst [vmem:[%s3934_s16 + $0xd8] sm:$0xff] %v3422_v14   ;;  %v4294_v6 = vadd.f32 %v1918_v33, %v1684_v31 }
 0x1e0   : > { %v1685_v24 = vpop.f32.mrf.mxu2  ;;  %v1728_v13 = vpop.f32.mrf.mxu3 }
 0x1e1   : > { %v1347_v12 = vpop.f32.mrf.mxu0  ;;  %v1729_v32 = vadd.f32 %v1728_v13, %v1560_v57 }
 0x1e2   : > { %v1516_v44 = vpop.f32.mrf.mxu1 }
 0x1e3   : > { %v1517_v16 = vadd.f32 %v1516_v44, %v1347_v12  ;;  %v4301_v20 = vadd.f32 %v1936_v42, %v1729_v32  ;;  %v1938_v12 = vmul.f32 %v4150_v36, %v3274_v23  ;;  %v3243_v32 = vunpack.c.h.bf16 %v3919_v59 }
 0x1e5   : > { %v1686_v46 = vadd.f32 %v1685_v24, %v1517_v16  ;;  %v3275_v24 = vunpack.c.h.bf16 %v3915_v55 }
 0x1e7   : > { %v4296_v1 = vadd.f32 %v1919_v63, %v1686_v46  ;;  %v1939_v16 = vmul.f32 %v4150_v36, %v3275_v24  ;;  %v3242_v46 = vunpack.c.l.bf16 %v3919_v59  ;;  %v1572_v59 = vadd.f32 %v4205_v15, %v4051_v58 }
 0x1e8   : > { %v1688_v48 = vpop.f32.mrf.mxu2  ;;  %v1730_v53 = vpop.f32.mrf.mxu3  ;;  %v3246_v24 = vunpack.c.l.bf16 %v3925_v61 }
 0x1e9   : > { %v3382_v11 = vpack.c.bf16 %v4296_v1, %v4294_v6  ;;  %v1731_v41 = vadd.f32 %v1730_v53, %v1562_v52  ;;  %v1350_v50 = vpop.f32.mrf.mxu0  ;;  %v1922_v53 = vmul.f32 %v4150_v36, %v3242_v46  ;;  %v2244_v46 = vmul.f32 %v4294_v6, %v4294_v6 }
 0x1ea   : > { %v1519_v0 = vpop.f32.mrf.mxu1 }
 0x1eb   : > { %v4303_v7 = vadd.f32 %v1937_v39, %v1731_v41  ;;  %3493 = vst [vmem:[%s3934_s16 + $0x98] sm:$0xff] %v3382_v11   ;;  %v1520_v4 = vadd.f32 %v1519_v0, %v1350_v50  ;;  %v3278_v11 = vunpack.c.l.bf16 %v3922_v60 }
 0x1ed   : > { %v3427_v56 = vpack.c.bf16 %v4303_v7, %v4301_v20  ;;  %v1689_v14 = vadd.f32 %v1688_v48, %v1520_v4  ;;  %v1570_v4 = vadd.f32 %v4196_v62, %v4040_v30  ;;  %v1940_v28 = vmul.f32 %v4150_v36, %v3278_v11 }
 0x1ef   : > { %3502 = vst [vmem:[%s3934_s16 + $0xe0] sm:$0xff] %v3427_v56   ;;  %v4320_v33 = vadd.f32 %v1920_v8, %v1689_v14  ;;  %v1923_v56 = vmul.f32 %v4150_v36, %v3243_v32  ;;  %v4495_v32 = vld [vmem:[#allocation8_spill] sm:$0xff] }
 0x1f0   : > { %v1690_v22 = vpop.f32.mrf.mxu2  ;;  %v1733_v43 = vpop.f32.mrf.mxu3 }
 0x1f1   : > { %v1352_v51 = vpop.f32.mrf.mxu0  ;;  %v1734_v3 = vadd.f32 %v1733_v43, %v1565_v40 }
 0x1f2   : > { %v1521_v35 = vpop.f32.mrf.mxu1 }
 0x1f3   : > { %v1522_v2 = vadd.f32 %v1521_v35, %v1352_v51  ;;  %v4327_v57 = vadd.f32 %v1938_v12, %v1734_v3  ;;  %v1941_v35 = vmul.f32 %v4150_v36, %v3279_v47  ;;  %v2173_v47 = vadd.f32 %v4271_v49, %v4294_v6 }
 0x1f5   : > { %v1691_v13 = vadd.f32 %v1690_v22, %v1522_v2 }
 0x1f7   : > { %v4322_v44 = vadd.f32 %v1921_v17, %v1691_v13 }
 0x1f8   : > { %v1693_v31 = vpop.f32.mrf.mxu2  ;;  %v1735_v55 = vpop.f32.mrf.mxu3 }
 0x1f9   : > { %v3387_v26 = vpack.c.bf16 %v4322_v44, %v4320_v33  ;;  %v1736_v37 = vadd.f32 %v1735_v55, %v1567_v54  ;;  %v1355_v63 = vpop.f32.mrf.mxu0  ;;  %v3247_v54 = vunpack.c.h.bf16 %v3925_v61 }
 0x1fa   : > { %v1524_v38 = vpop.f32.mrf.mxu1 }
 0x1fb   : > { %v4329_v21 = vadd.f32 %v1939_v16, %v1736_v37  ;;  %3494 = vst [vmem:[%s3934_s16 + $0xa0] sm:$0xff] %v3387_v26   ;;  %v1525_v52 = vadd.f32 %v1524_v38, %v1355_v63  ;;  %v4493_v16 = vld [vmem:[#allocation4_spill] sm:$0xff]  ;;  %v1925_v38 = vmul.f32 %v4150_v36, %v3247_v54 }
 0x1fc   : > { %v3282_v55 = vunpack.c.l.bf16 %v4493_v16 }
 0x1fd   : > { %v3432_v10 = vpack.c.bf16 %v4329_v21, %v4327_v57  ;;  %v1694_v50 = vadd.f32 %v1693_v31, %v1525_v52  ;;  %v1924_v31 = vmul.f32 %v4150_v36, %v3246_v24  ;;  %v4494_v52 = vld [vmem:[#allocation7_spill] sm:$0xff] }
 0x1fe   : > { %v1575_v61 = vadd.f32 %v4212_v9, %v4494_v52  ;;  %v2307_v9 = vadd.f32 %v4275_v19, %v2244_v46 }
 0x1ff   : > { %3503 = vst [vmem:[%s3934_s16 + $0xe8] sm:$0xff] %v3432_v10   ;;  %v4346_v43 = vadd.f32 %v1922_v53, %v1694_v50  ;;  %v3283_v10 = vunpack.c.h.bf16 %v4493_v16  ;;  %v1942_v53 = vmul.f32 %v4150_v36, %v3282_v55 }
 0x200   : > { %v1695_v42 = vpop.f32.mrf.mxu2  ;;  %v1738_v48 = vpop.f32.mrf.mxu3 }
 0x201   : > { %v1357_v39 = vpop.f32.mrf.mxu0  ;;  %v1739_v51 = vadd.f32 %v1738_v48, %v1570_v4  ;;  %v1577_v48 = vadd.f32 %v4217_v45, %v4495_v32  ;;  %v2246_v45 = vmul.f32 %v4320_v33, %v4320_v33 }
 0x202   : > { %v1526_v41 = vpop.f32.mrf.mxu1 }
 0x203   : > { %v1527_v0 = vadd.f32 %v1526_v41, %v1357_v39  ;;  %v4353_v17 = vadd.f32 %v1940_v28, %v1739_v51  ;;  %v2245_v39 = vmul.f32 %v4296_v1, %v4296_v1  ;;  %v2174_v51 = vadd.f32 %v2173_v47, %v4296_v1 }
 0x204   : > { %v2248_v1 = vmul.f32 %v4346_v43, %v4346_v43 }
 0x205   : > { %v1696_v22 = vadd.f32 %v1695_v42, %v1527_v0 }
 0x207   : > { %v4348_v8 = vadd.f32 %v1923_v56, %v1696_v22  ;;  %v1943_v56 = vmul.f32 %v4150_v36, %v3283_v10 }
 0x208   : > { %v1698_v23 = vpop.f32.mrf.mxu2  ;;  %v1740_v60 = vpop.f32.mrf.mxu3 }
 0x209   : > { %v3392_v30 = vpack.c.bf16 %v4348_v8, %v4346_v43  ;;  %v1741_v62 = vadd.f32 %v1740_v60, %v1572_v59  ;;  %v1360_v14 = vpop.f32.mrf.mxu0  ;;  %v4496_v60 = vld [vmem:[#allocation5_spill] sm:$0xff] }
 0x20a   : > { %v1529_v2 = vpop.f32.mrf.mxu1 }
 0x20b   : > { %v4355_v58 = vadd.f32 %v1941_v35, %v1741_v62  ;;  %3495 = vst [vmem:[%s3934_s16 + $0xa8] sm:$0xff] %v3392_v30   ;;  %v1530_v40 = vadd.f32 %v1529_v2, %v1360_v14  ;;  %v3250_v30 = vunpack.c.l.bf16 %v4496_v60  ;;  %v2247_v62 = vmul.f32 %v4322_v44, %v4322_v44 }
 0x20c   : > { %v2175_v14 = vadd.f32 %v2174_v51, %v4320_v33  ;;  %v2249_v33 = vmul.f32 %v4348_v8, %v4348_v8 }
 0x20d   : > { %v3437_v15 = vpack.c.bf16 %v4355_v58, %v4353_v17  ;;  %v1699_v37 = vadd.f32 %v1698_v23, %v1530_v40  ;;  %v2308_v23 = vadd.f32 %v2307_v9, %v2245_v39 }
 0x20e   : > { %v2176_v24 = vadd.f32 %v2175_v14, %v4322_v44 }
 0x20f   : > { %3504 = vst [vmem:[%s3934_s16 + $0xf0] sm:$0xff] %v3437_v15   ;;  %v1988_v11 = vadd.f32 %v1924_v31, %v1699_v37  ;;  %v2309_v2 = vadd.f32 %v2308_v23, %v2246_v45 }
 0x210   : > { %v1700_v13 = vpop.f32.mrf.mxu2  ;;  %v1743_v12 = vpop.f32.mrf.mxu3  ;;  %v2177_v31 = vadd.f32 %v2176_v24, %v4346_v43  ;;  %v4499_v43 = vld [vmem:[#allocation9_spill] sm:$0xff] }
 0x211   : > { %v1362_v3 = vpop.f32.mrf.mxu0  ;;  %v1744_v41 = vadd.f32 %v1743_v12, %v1575_v61  ;;  %v2310_v54 = vadd.f32 %v2309_v2, %v2247_v62  ;;  %v2250_v37 = vmul.f32 %v1988_v11, %v1988_v11  ;;  %v4500_v62 = vld [vmem:[#allocation3_spill] sm:$0xff] }
 0x212   : > { %v1531_v26 = vpop.f32.mrf.mxu1 }
 0x213   : > { %v1532_v63 = vadd.f32 %v1531_v26, %v1362_v3  ;;  %v4386_v49 = vadd.f32 %v1942_v53, %v1744_v41  ;;  %v3251_v3 = vunpack.c.h.bf16 %v4496_v60  ;;  %v2311_v16 = vadd.f32 %v2310_v54, %v2248_v1 }
 0x214   : > { %v2178_v26 = vadd.f32 %v2177_v31, %v4348_v8 }
 0x215   : > { %v1701_v42 = vadd.f32 %v1700_v13, %v1532_v63  ;;  %v1926_v13 = vmul.f32 %v4150_v36, %v3250_v30  ;;  %v1927_v52 = vmul.f32 %v4150_v36, %v3251_v3  ;;  %v2312_v61 = vadd.f32 %v2311_v16, %v2249_v33 }
 0x216   : > { %v2256_v3 = vmul.f32 %v4233_v18, %v4233_v18  ;;  %v2257_v16 = vmul.f32 %v4235_v5, %v4235_v5 }
 0x217   : > { %v1989_v50 = vadd.f32 %v1925_v38, %v1701_v42  ;;  %v4497_v38 = vld [vmem:[#allocation6_spill] sm:$0xff]  ;;  %v2179_v42 = vadd.f32 %v2178_v26, %v1988_v11  ;;  %v2313_v41 = vadd.f32 %v2312_v61, %v2250_v37 }
 0x218   : > { %v1703_v0 = vpop.f32.mrf.mxu2  ;;  %v1745_v4 = vpop.f32.mrf.mxu3  ;;  %v3254_v10 = vunpack.c.l.bf16 %v4497_v38 }
 0x219   : > { %v3397_v22 = vpack.c.bf16 %v1989_v50, %v1988_v11  ;;  %v1746_v59 = vadd.f32 %v1745_v4, %v1577_v48  ;;  %v1365_v28 = vpop.f32.mrf.mxu0  ;;  %v2251_v32 = vmul.f32 %v1989_v50, %v1989_v50  ;;  %v4498_v48 = vld [vmem:[#allocation2_spill] sm:$0xff] }
 0x21a   : > { %v1534_v35 = vpop.f32.mrf.mxu1  ;;  %v1540_v39 = vadd.f32 %v4499_v43, %v4498_v48  ;;  %v1928_v8 = vmul.f32 %v4150_v36, %v3254_v10 }
 0x21b   : > { %v4388_v19 = vadd.f32 %v1943_v56, %v1746_v59  ;;  %v1535_v6 = vadd.f32 %v1534_v35, %v1365_v28  ;;  %3496 = vst [vmem:[%s3934_s16 + $0xb0] sm:$0xff] %v3397_v22   ;;  %v2314_v4 = vadd.f32 %v2313_v41, %v2251_v32  ;;  %v3255_v35 = vunpack.c.h.bf16 %v4497_v38 }
 0x21d   : > { %v3442_v15 = vpack.c.bf16 %v4388_v19, %v4386_v49  ;;  %v1704_v40 = vadd.f32 %v1703_v0, %v1535_v6  ;;  %v2180_v0 = vadd.f32 %v2179_v42, %v1989_v50  ;;  %v4501_v6 = vld [vmem:[#allocation10_spill] sm:$0xff]  ;;  %v1929_v1 = vmul.f32 %v4150_v36, %v3255_v35 }
 0x21e   : > { %v1542_v14 = vadd.f32 %v4501_v6, %v4500_v62  ;;  %v2258_v36 = vmul.f32 %v4253_v25, %v4253_v25 }
 0x21f   : > { %3505 = vst [vmem:[%s3934_s16 + $0xf8] sm:$0xff] %v3442_v15   ;;  %v1990_v63 = vadd.f32 %v1926_v13, %v1704_v40 }
 0x220   : > { %v1705_v12 = vpop.f32.mrf.mxu2 }
 0x221   : > { %v1367_v55 = vpop.f32.mrf.mxu0  ;;  %v2252_v56 = vmul.f32 %v1990_v63, %v1990_v63  ;;  %v2181_v45 = vadd.f32 %v2180_v0, %v1990_v63 }
 0x222   : > { %v1536_v44 = vpop.f32.mrf.mxu1 }
 0x223   : > { %v1537_v46 = vadd.f32 %v1536_v44, %v1367_v55  ;;  %v2315_v51 = vadd.f32 %v2314_v4, %v2252_v56  ;;  %v2259_v44 = vmul.f32 %v4255_v27, %v4255_v27 }
 0x225   : > { %v1706_v53 = vadd.f32 %v1705_v12, %v1537_v46 }
 0x227   : > { %v1991_v47 = vadd.f32 %v1927_v52, %v1706_v53 }
 0x228   : > { %v1708_v9 = vpop.f32.mrf.mxu2 }
 0x229   : > { %v1709_v22 = vadd.f32 %v1708_v9, %v1540_v39  ;;  %v3402_v59 = vpack.c.bf16 %v1991_v47, %v1990_v63  ;;  %v2253_v28 = vmul.f32 %v1991_v47, %v1991_v47  ;;  %v2182_v23 = vadd.f32 %v2181_v45, %v1991_v47 }
 0x22b   : > { %v1992_v11 = vadd.f32 %v1928_v8, %v1709_v22  ;;  %3497 = vst [vmem:[%s3934_s16 + $0xb8] sm:$0xff] %v3402_v59   ;;  %v2316_v50 = vadd.f32 %v2315_v51, %v2253_v28  ;;  %v2269_v22 = vmul.f32 %v4388_v19, %v4388_v19 }
 0x22d   : > { %v2183_v60 = vadd.f32 %v2182_v23, %v1992_v11  ;;  %v2254_v30 = vmul.f32 %v1992_v11, %v1992_v11 }
 0x22f   : > { %v2317_v2 = vadd.f32 %v2316_v50, %v2254_v30 }
 0x230   : > { %v1710_v15 = vpop.f32.mrf.mxu2 }
 0x231   : > { %v1711_v24 = vadd.f32 %v1710_v15, %v1542_v14 }
 0x233   : > { %v1993_v40 = vadd.f32 %v1929_v1, %v1711_v24 }
 0x235   : > { %v3407_v13 = vpack.c.bf16 %v1993_v40, %v1992_v11  ;;  %v2184_v54 = vadd.f32 %v2183_v60, %v1993_v40  ;;  %v2255_v12 = vmul.f32 %v1993_v40, %v1993_v40 }
 0x237   : > { %3498 = vst [vmem:[%s3934_s16 + $0xc0] sm:$0xff] %v3407_v13   ;;  %v2185_v31 = vadd.f32 %v2184_v54, %v4233_v18  ;;  %v2318_v33 = vadd.f32 %v2317_v2, %v2255_v12  ;;  %v2260_v18 = vmul.f32 %v4273_v29, %v4273_v29 }
 0x239   : > { %v2186_v55 = vadd.f32 %v2185_v31, %v4235_v5  ;;  %v2319_v26 = vadd.f32 %v2318_v33, %v2256_v3  ;;  %v2261_v5 = vmul.f32 %v4277_v34, %v4277_v34 }
 0x23b   : > { %v2187_v37 = vadd.f32 %v2186_v55, %v4253_v25  ;;  %v2320_v63 = vadd.f32 %v2319_v26, %v2257_v16  ;;  %v2262_v25 = vmul.f32 %v4301_v20, %v4301_v20 }
 0x23d   : > { %v2188_v38 = vadd.f32 %v2187_v37, %v4255_v27  ;;  %v2321_v10 = vadd.f32 %v2320_v63, %v2258_v36  ;;  %v2263_v27 = vmul.f32 %v4303_v7, %v4303_v7 }
 0x23f   : > { %v2189_v46 = vadd.f32 %v2188_v38, %v4273_v29  ;;  %v2322_v52 = vadd.f32 %v2321_v10, %v2259_v44  ;;  %v2264_v29 = vmul.f32 %v4327_v57, %v4327_v57 }
 0x241   : > { %v2190_v61 = vadd.f32 %v2189_v46, %v4277_v34  ;;  %v2323_v42 = vadd.f32 %v2322_v52, %v2260_v18  ;;  %v2265_v34 = vmul.f32 %v4329_v21, %v4329_v21 }
 0x243   : > { %v2191_v32 = vadd.f32 %v2190_v61, %v4301_v20  ;;  %v2324_v48 = vadd.f32 %v2323_v42, %v2261_v5  ;;  %v2266_v20 = vmul.f32 %v4353_v17, %v4353_v17 }
 0x245   : > { %v2192_v43 = vadd.f32 %v2191_v32, %v4303_v7  ;;  %v2325_v39 = vadd.f32 %v2324_v48, %v2262_v25  ;;  %v2267_v7 = vmul.f32 %v4355_v58, %v4355_v58 }
 0x247   : > { %v2193_v53 = vadd.f32 %v2192_v43, %v4327_v57  ;;  %v2326_v41 = vadd.f32 %v2325_v39, %v2263_v27  ;;  %v2268_v57 = vmul.f32 %v4386_v49, %v4386_v49 }
 0x249   : > { %v2194_v0 = vadd.f32 %v2193_v53, %v4329_v21  ;;  %v2327_v56 = vadd.f32 %v2326_v41, %v2264_v29 }
 0x24b   : > { %v2195_v8 = vadd.f32 %v2194_v0, %v4353_v17  ;;  %v2328_v47 = vadd.f32 %v2327_v56, %v2265_v34 }
 0x24d   : > { %v2196_v9 = vadd.f32 %v2195_v8, %v4355_v58  ;;  %v2329_v4 = vadd.f32 %v2328_v47, %v2266_v20 }
 0x24f   : > { %v2197_v45 = vadd.f32 %v2196_v9, %v4386_v49  ;;  %v2330_v21 = vadd.f32 %v2329_v4, %v2267_v7 }
 0x251   : > { %v2198_v17 = vadd.f32 %v2197_v45, %v4388_v19  ;;  %v2331_v59 = vadd.f32 %v2330_v21, %v2268_v57 }
 0x253   : > { %v2199_v28 = vrot.slane %v2198_v17, 4  ;;  %v2332_v51 = vadd.f32 %v2331_v59, %v2269_v22 }
 0x255   : > { %v2200_v11 = vadd.f32 %v2199_v28, %v2198_v17  ;;  %v2333_v23 = vrot.slane %v2332_v51, 4 }
 0x257   : > { %v2201_v58 = vrot.slane %v2200_v11, 2  ;;  %v2334_v35 = vadd.f32 %v2333_v23, %v2332_v51 }
 0x259   : > { %v2202_v60 = vadd.f32 %v2201_v58, %v2200_v11  ;;  %v2335_v30 = vrot.slane %v2334_v35, 2 }
 0x25b   : > { %v2203_v50 = vrot.slane %v2202_v60, 1  ;;  %v2336_v62 = vadd.f32 %v2335_v30, %v2334_v35 }
 0x25d   : > { %v2204_v49 = vadd.f32 %v2203_v50, %v2202_v60  ;;  %v2337_v6 = vrot.slane %v2336_v62, 1 }
 0x25f   : > { %2205 = vst [vmem:[%s359_s20] sm:$0x1] %v2204_v49  ;;  %v2338_v19 = vadd.f32 %v2337_v6, %v2336_v62 }
 0x261   : > { %2339 = vst [vmem:[%s366_s27] sm:$0x1] %v2338_v19 }
 0x262 PF: > { %s17_s23 = sadd.s32 1, %s3576_s23   ;;  %s4502_s21 = smov %s3572_s22 }
 0x263   : > { %p14_p5 = scmp.ge.s32.totalorder %s17_s23, 4   ;;  %s4503_s22 = smov %s4505_s24 }
 0x265   :  { %16 = sbr.rel (!%p14_p5) target bundleno = 2 (0x2), region = 93 }

</bundles_post_ra>
